<compile_context>
chip_gen: v7x
topology: tpu7x:2x2x1
jax: 0.10.0
libtpu: 0.0.40
codegen_flags: <defaults>
</compile_context>

<pallas_src>
import math
import functools

import numpy as np
import jax
import jax.numpy as jnp
from jax.experimental import pallas as pl
from jax.experimental.pallas import tpu as pltpu  # noqa: F401  (TPU backend)


# ----------------------------------------------------------------------------
# Fused Pallas kernel (single block, no grid)
# ----------------------------------------------------------------------------
def _fused_kernel(x_ref, ea_ref, seq_ref, nidx_ref,
                  full_ref, dstoh_ref, srcoh_ref, adj_ref, rep_ref, amask_ref,
                  last_ref,
                  ew_ref, eb_ref, wlin_ref, wsd_ref, weatt_ref, gbias_ref,
                  inwg_ref, inws_ref, posb_ref,
                  wqkv_ref, bqkv_ref, wo_ref, bo_ref,
                  w1_ref, b1_ref, w2_ref, b2_ref, ln_ref, hw_ref, hb_ref,
                  o_ref, *, gat_heads, gat_c, nhead, d_head):
    f32 = jnp.float32
    H, C, NL = gat_heads, gat_c, 2
    neg = f32(-1e30)

    x = x_ref[...]                                                # (N, F)
    adj = adj_ref[...]                                            # (N, N)
    srcoh = srcoh_ref[...]                                        # (M, N)
    dstoh = dstoh_ref[...]                                        # (N, M)

    # ---------------- GAT stage ----------------
    # edge_attr_transform + self-loop 'mean' attrs for the full edge list
    tea = jnp.dot(ea_ref[...], ew_ref[...], preferred_element_type=f32) + eb_ref[...]
    full_attr = jnp.dot(full_ref[...], tea, preferred_element_type=f32)       # (M, C)

    # all heads of BOTH layers batched along lanes
    xw = jnp.dot(x, wlin_ref[...], preferred_element_type=f32)                # (N, 2HC)
    asd = jnp.dot(x, wsd_ref[...], preferred_element_type=f32)                # (N, 4H)
    a_src = asd[:, : NL * H]                                                  # (N, 2H)
    a_dst = asd[:, NL * H:]                                                   # (N, 2H)
    a_edge = jnp.dot(full_attr, weatt_ref[...], preferred_element_type=f32)   # (M, 2H)
    # per-(edge, head/layer) score term: alpha_src[src] + alpha_edge
    pe = a_edge + jnp.dot(srcoh, a_src, preferred_element_type=f32)           # (M, 2H)

    gbias = gbias_ref[...]
    layer_outs = []
    for layer in range(NL):                                       # static unroll
        acc = None
        for h in range(H):                                        # static unroll
            hl = layer * H + h
            x_h = xw[:, hl * C:(hl + 1) * C]                                  # (N, C)
            # dense (dst, src) scatter of the per-edge score via one-hot matmul
            dense = jnp.dot(dstoh, pe[:, hl:hl + 1] * srcoh,
                            preferred_element_type=f32)                      # (N, N)
            s = a_dst[:, hl:hl + 1] + dense
            s = jnp.where(s > 0, s, 0.2 * s)                      # leaky_relu(0.2)
            s = jnp.where(adj > 0, s, neg)
            s = s - jnp.max(s, axis=-1, keepdims=True)
            p = jnp.exp(s)                     # masked entries underflow to exactly 0
            attn = p * pl.reciprocal(jnp.sum(p, axis=-1, keepdims=True), approx=True)
            contrib = jnp.dot(attn, x_h, preferred_element_type=f32)          # (N, C)
            acc = contrib if acc is None else acc + contrib
        # concat=False -> head mean, + bias, then outer ReLU (dropout = identity)
        layer_outs.append(jnp.maximum(
            acc * f32(1.0 / H) + gbias[:, layer * C:(layer + 1) * C], 0.0))
    gat_cat = jnp.concatenate(layer_outs, axis=1)                             # (N, 2C)

    # -------- node gather + combined in_proj + positional encoding --------
    B = nidx_ref.shape[0]
    N = x_ref.shape[0]
    node_oh = (nidx_ref[...] ==
               jax.lax.broadcasted_iota(jnp.int32, (B, N), 1)).astype(f32)    # (B, N)
    gsel = jnp.dot(node_oh, gat_cat, preferred_element_type=f32)              # (B, 2C)
    gproj = jnp.dot(gsel, inwg_ref[...], preferred_element_type=f32)          # (B, d)
    # combined = [gat_cat | sequences] @ in_w  ==  gat part + seq part (split)
    h0 = (jnp.dot(rep_ref[...], gproj, preferred_element_type=f32)
          + jnp.dot(seq_ref[...], inws_ref[...], preferred_element_type=f32)
          + posb_ref[...])                                                    # (BS, d)

    # -------- transformer encoder layer (post-norm) --------
    d_model = wo_ref.shape[0]
    mask = amask_ref[...]                                                     # (BS, BS)
    qkv = jnp.dot(h0, wqkv_ref[...], preferred_element_type=f32) + bqkv_ref[...]
    scale = f32(1.0 / math.sqrt(d_head))
    heads = []
    for hd in range(nhead):                                       # static unroll
        q = qkv[:, hd * d_head:(hd + 1) * d_head]
        k = qkv[:, d_model + hd * d_head: d_model + (hd + 1) * d_head]
        v = qkv[:, 2 * d_model + hd * d_head: 2 * d_model + (hd + 1) * d_head]
        s = jnp.dot(q, k.T, preferred_element_type=f32) * scale               # (BS, BS)
        s = jnp.where(mask > 0, s, neg)                           # batch block-diag
        s = s - jnp.max(s, axis=-1, keepdims=True)
        p = jnp.exp(s)
        p = p * pl.reciprocal(jnp.sum(p, axis=-1, keepdims=True), approx=True)
        heads.append(jnp.dot(p, v, preferred_element_type=f32))               # (BS, dh)
    attn_out = (jnp.dot(jnp.concatenate(heads, axis=1), wo_ref[...],
                        preferred_element_type=f32) + bo_ref[...])

    ln = ln_ref[...]                                                          # (4, d)
    r1 = h0 + attn_out
    mu1 = jnp.mean(r1, axis=-1, keepdims=True)
    var1 = jnp.mean((r1 - mu1) ** 2, axis=-1, keepdims=True)
    h1 = (r1 - mu1) * jax.lax.rsqrt(var1 + 1e-5) * ln[0:1, :] + ln[1:2, :]

    ff = jnp.maximum(
        jnp.dot(h1, w1_ref[...], preferred_element_type=f32) + b1_ref[...], 0.0)
    ff = jnp.dot(ff, w2_ref[...], preferred_element_type=f32) + b2_ref[...]
    r2 = h1 + ff
    mu2 = jnp.mean(r2, axis=-1, keepdims=True)
    var2 = jnp.mean((r2 - mu2) ** 2, axis=-1, keepdims=True)
    h2 = (r2 - mu2) * jax.lax.rsqrt(var2 + 1e-5) * ln[2:3, :] + ln[3:4, :]

    # -------- last-timestep select + output head --------
    lastrows = jnp.dot(last_ref[...], h2, preferred_element_type=f32)         # (B, d)
    o_ref[...] = (jnp.dot(lastrows, hw_ref[...], preferred_element_type=f32)
                  + hb_ref[...])                                              # (B, 1)


# ----------------------------------------------------------------------------
# Forward: one pallas_call, everything else is free reshapes
# ----------------------------------------------------------------------------
def gat_transformer_forward(packed, structs, sequences, edge_index, edge_attr,
                            node_features, node_indices):
    del edge_index  # graph structure consumed via precomputed structs
    meta = packed["meta"]
    B, S, Fs = sequences.shape
    seq2d = sequences.reshape(B * S, Fs)
    nidx = node_indices.astype(jnp.int32).reshape(B, 1)
    kernel = functools.partial(_fused_kernel, gat_heads=meta["H"], gat_c=meta["C"],
                               nhead=meta["nhead"], d_head=meta["dh"])
    return pl.pallas_call(
        kernel,
        out_shape=jax.ShapeDtypeStruct((B, 1), jnp.float32),
    )(node_features, edge_attr, seq2d, nidx,
      structs["full_mat"], structs["dst_oh"], structs["src_oh"], structs["adj"],
      structs["rep_oh"], structs["attn_mask"], structs["last_oh"],
      packed["ew"], packed["eb"], packed["wlin"], packed["wsd"],
      packed["weatt"], packed["gbias"],
      packed["inwg"], packed["inws"], packed["posb"],
      packed["wqkv"], packed["bqkv"], packed["wo"], packed["bo"],
      packed["w1"], packed["b1"], packed["w2"], packed["b2"],
      packed["ln"], packed["head_w"], packed["head_b"])


# ----------------------------------------------------------------------------
# Host-side precomputed graph / batching structures (edge list is static)
# ----------------------------------------------------------------------------
def build_structs(edge_index_np, num_nodes, batch, seq_len):
    src = np.asarray(edge_index_np[0])
    dst = np.asarray(edge_index_np[1])
    E = src.shape[0]
    N = num_nodes
    M = E + N

    deg = np.zeros((N,), np.float32)
    for e in range(E):
        deg[dst[e]] += 1.0

    # [I_E ; scatter-mean-by-dst]: transformed edge attrs -> attrs of the full
    # (edges + self-loops) list, self-loop fill_value='mean'.
    full_mat = np.zeros((M, E), np.float32)
    full_mat[:E, :E] = np.eye(E, dtype=np.float32)
    for e in range(E):
        full_mat[E + dst[e], e] = 1.0 / max(deg[dst[e]], 1.0)

    full_src = np.concatenate([src, np.arange(N, dtype=src.dtype)])
    full_dst = np.concatenate([dst, np.arange(N, dtype=dst.dtype)])
    dst_oh = np.zeros((N, M), np.float32)     # one-hot: dst of every edge+loop
    src_oh = np.zeros((M, N), np.float32)     # one-hot: src of every edge+loop
    adj = np.zeros((N, N), np.float32)        # valid (dst, src) positions
    for m in range(M):
        dst_oh[full_dst[m], m] = 1.0
        src_oh[m, full_src[m]] = 1.0
        adj[full_dst[m], full_src[m]] = 1.0

    BS = batch * seq_len
    rep_oh = np.zeros((BS, batch), np.float32)     # repeat per-batch row over S
    attn_mask = np.zeros((BS, BS), np.float32)     # block-diagonal batch mask
    last_oh = np.zeros((batch, BS), np.float32)    # select last timestep row
    for b in range(batch):
        rep_oh[b * seq_len:(b + 1) * seq_len, b] = 1.0
        attn_mask[b * seq_len:(b + 1) * seq_len, b * seq_len:(b + 1) * seq_len] = 1.0
        last_oh[b, b * seq_len + seq_len - 1] = 1.0

    arrays = dict(full_mat=full_mat, dst_oh=dst_oh, src_oh=src_oh, adj=adj,
                  rep_oh=rep_oh, attn_mask=attn_mask, last_oh=last_oh)
    return {k: jnp.asarray(v) for k, v in arrays.items()}


# ----------------------------------------------------------------------------
# Deterministic parameter initialization (module-shaped) + kernel packing
# ----------------------------------------------------------------------------
def _w(key, shape, scale=0.1):
    return scale * jax.random.normal(key, shape, dtype=jnp.float32)


def init_params(key, node_feature_dim, sequence_feature_dim, seq_len,
                gat_out_channels, gat_heads, edge_dim, d_model, nhead, dim_ff):
    keys = iter(jax.random.split(key, 64))
    C, H = gat_out_channels, gat_heads
    dh = d_model // nhead

    def gat_params():
        return {
            "lin_w": _w(next(keys), (H, node_feature_dim, C)),
            "lin_edge_w": _w(next(keys), (H, C, C)),
            "att_src": _w(next(keys), (H, 1, C)),
            "att_dst": _w(next(keys), (H, 1, C)),
            "att_edge": _w(next(keys), (H, 1, C)),
            "bias": _w(next(keys), (1, C)),
        }

    d_in = 2 * C + sequence_feature_dim

    # sinusoidal positional encoding
    pos = np.zeros((seq_len, d_model), np.float32)
    position = np.arange(seq_len, dtype=np.float32)[:, None]
    div = np.exp(np.arange(0, d_model, 2, dtype=np.float32)
                 * (-math.log(10000.0) / d_model))
    pos[:, 0::2] = np.sin(position * div)
    pos[:, 1::2] = np.cos(position * div)

    transformer = {
        "pos": jnp.asarray(pos),
        "in_w": _w(next(keys), (d_in, d_model)),
        "in_b": _w(next(keys), (1, d_model)),
        "wq": _w(next(keys), (nhead, d_model, dh)),
        "bq": _w(next(keys), (nhead, 1, dh)),
        "wk": _w(next(keys), (nhead, d_model, dh)),
        "bk": _w(next(keys), (nhead, 1, dh)),
        "wv": _w(next(keys), (nhead, d_model, dh)),
        "bv": _w(next(keys), (nhead, 1, dh)),
        "wo": _w(next(keys), (nhead, dh, d_model)),
        "bo": _w(next(keys), (1, d_model)),
        "ln1_g": jnp.ones((1, d_model), jnp.float32),
        "ln1_b": jnp.zeros((1, d_model), jnp.float32),
        "w1": _w(next(keys), (d_model, dim_ff)),
        "b1": _w(next(keys), (1, dim_ff)),
        "w2": _w(next(keys), (dim_ff, d_model)),
        "b2": _w(next(keys), (1, d_model)),
        "ln2_g": jnp.ones((1, d_model), jnp.float32),
        "ln2_b": jnp.zeros((1, d_model), jnp.float32),
    }

    return {
        "edge_w": _w(next(keys), (edge_dim, C)),
        "edge_b": _w(next(keys), (1, C)),
        "gat1": gat_params(),
        "gat2": gat_params(),
        "transformer": transformer,
        "out_w": _w(next(keys), (d_model, 1)),
        "out_b": _w(next(keys), (1,)),
    }


def pack_params(p, batch, seq_len):
    """Fold attention vectors into weights and pack per-head params along lanes."""
    g1, g2 = p["gat1"], p["gat2"]
    H, _, C = g1["lin_w"].shape

    def fold(lin_w, att):
        # sum(x @ lin_w_h * att_h, -1) == x @ (lin_w_h @ att_h.T): one column per head
        return jnp.concatenate([lin_w[h] @ att[h].T for h in range(lin_w.shape[0])],
                               axis=1)

    wlin = jnp.concatenate([g1["lin_w"][h] for h in range(H)]
                           + [g2["lin_w"][h] for h in range(H)], axis=1)      # (F, 2HC)
    wsd = jnp.concatenate([fold(g1["lin_w"], g1["att_src"]),
                           fold(g2["lin_w"], g2["att_src"]),
                           fold(g1["lin_w"], g1["att_dst"]),
                           fold(g2["lin_w"], g2["att_dst"])], axis=1)         # (F, 4H)
    weatt = jnp.concatenate([fold(g1["lin_edge_w"], g1["att_edge"]),
                             fold(g2["lin_edge_w"], g2["att_edge"])], axis=1)  # (C, 2H)
    gbias = jnp.concatenate([g1["bias"], g2["bias"]], axis=1)                 # (1, 2C)

    t = p["transformer"]
    nhead, d_model, dh = t["wq"].shape
    posb = jnp.tile(t["pos"][:seq_len], (batch, 1)) + t["in_b"]               # (BS, d)
    wqkv = jnp.concatenate(
        [jnp.concatenate([t[n][h] for h in range(nhead)], axis=1)
         for n in ("wq", "wk", "wv")], axis=1)                                # (d, 3d)
    bqkv = jnp.concatenate(
        [jnp.concatenate([t[n][h] for h in range(nhead)], axis=1)
         for n in ("bq", "bk", "bv")], axis=1)                                # (1, 3d)
    wo = jnp.concatenate([t["wo"][h] for h in range(nhead)], axis=0)          # (d, d)
    ln = jnp.concatenate([t["ln1_g"], t["ln1_b"], t["ln2_g"], t["ln2_b"]], axis=0)

    return {
        "ew": p["edge_w"], "eb": p["edge_b"],
        "wlin": wlin, "wsd": wsd, "weatt": weatt, "gbias": gbias,
        "inwg": t["in_w"][:2 * C, :], "inws": t["in_w"][2 * C:, :],
        "posb": posb, "wqkv": wqkv, "bqkv": bqkv, "wo": wo, "bo": t["bo"],
        "w1": t["w1"], "b1": t["b1"], "w2": t["w2"], "b2": t["b2"], "ln": ln,
        "head_w": p["out_w"], "head_b": p["out_b"].reshape(1, 1),
        "meta": {"H": int(H), "C": int(C), "nhead": int(nhead), "dh": int(dh)},
    }


# ----------------------------------------------------------------------------
# Main
# ----------------------------------------------------------------------------
if __name__ == "__main__":
    node_feature_dim = 8
    sequence_feature_dim = 6
    seq_len = 8
    gat_out_channels = 8
    gat_heads = 2
    edge_dim = 4
    d_model = 32
    nhead = 4
    dim_ff = 2 * d_model

    num_nodes = 16
    num_edges = 24
    batch = 4

    key = jax.random.PRNGKey(0)
    k_params, k_seq, k_ea, k_nf = jax.random.split(key, 4)

    params = init_params(k_params, node_feature_dim, sequence_feature_dim, seq_len,
                         gat_out_channels, gat_heads, edge_dim, d_model, nhead, dim_ff)
    packed = pack_params(params, batch, seq_len)

    # unique, non-self-loop edge list (static -> structures precomputed on host)
    pairs = [(a, (a + k) % num_nodes) for k in (1, 2, 3) for a in range(num_nodes)]
    pairs = pairs[:num_edges]
    edge_index_np = np.array(pairs, np.int32).T                   # [2, E]
    edge_index = jnp.asarray(edge_index_np)

    structs = build_structs(edge_index_np, num_nodes, batch, seq_len)

    sequences = jax.random.normal(
        k_seq, (batch, seq_len, sequence_feature_dim), dtype=jnp.float32)
    edge_attr = jax.random.normal(k_ea, (num_edges, edge_dim), dtype=jnp.float32)
    node_features = jax.random.normal(
        k_nf, (num_nodes, node_feature_dim), dtype=jnp.float32)
    node_indices = jnp.asarray([0, 3, 7, 12], dtype=jnp.int32)

    fwd = jax.jit(functools.partial(gat_transformer_forward, packed, structs))
    out = fwd(sequences, edge_index, edge_attr, node_features, node_indices)
    out = jax.block_until_ready(out)

    assert out.shape == (batch, 1), out.shape
    assert bool(jnp.all(jnp.isfinite(out)))
    print("KERNEL_OK")
</pallas_src>

<mosaic_0001>
module attributes {stable_mosaic.version = 11 : i64} {
  func.func @_fused_kernel(%arg0: memref<16x8xf32, #tpu.memory_space<vmem>>, %arg1: memref<24x4xf32, #tpu.memory_space<vmem>>, %arg2: memref<32x6xf32, #tpu.memory_space<vmem>>, %arg3: memref<4x1xi32, #tpu.memory_space<vmem>>, %arg4: memref<40x24xf32, #tpu.memory_space<vmem>>, %arg5: memref<16x40xf32, #tpu.memory_space<vmem>>, %arg6: memref<40x16xf32, #tpu.memory_space<vmem>>, %arg7: memref<16x16xf32, #tpu.memory_space<vmem>>, %arg8: memref<32x4xf32, #tpu.memory_space<vmem>>, %arg9: memref<32x32xf32, #tpu.memory_space<vmem>>, %arg10: memref<4x32xf32, #tpu.memory_space<vmem>>, %arg11: memref<4x8xf32, #tpu.memory_space<vmem>>, %arg12: memref<1x8xf32, #tpu.memory_space<vmem>>, %arg13: memref<8x32xf32, #tpu.memory_space<vmem>>, %arg14: memref<8x8xf32, #tpu.memory_space<vmem>>, %arg15: memref<8x4xf32, #tpu.memory_space<vmem>>, %arg16: memref<1x16xf32, #tpu.memory_space<vmem>>, %arg17: memref<16x32xf32, #tpu.memory_space<vmem>>, %arg18: memref<6x32xf32, #tpu.memory_space<vmem>>, %arg19: memref<32x32xf32, #tpu.memory_space<vmem>>, %arg20: memref<32x96xf32, #tpu.memory_space<vmem>>, %arg21: memref<1x96xf32, #tpu.memory_space<vmem>>, %arg22: memref<32x32xf32, #tpu.memory_space<vmem>>, %arg23: memref<1x32xf32, #tpu.memory_space<vmem>>, %arg24: memref<32x64xf32, #tpu.memory_space<vmem>>, %arg25: memref<1x64xf32, #tpu.memory_space<vmem>>, %arg26: memref<64x32xf32, #tpu.memory_space<vmem>>, %arg27: memref<1x32xf32, #tpu.memory_space<vmem>>, %arg28: memref<4x32xf32, #tpu.memory_space<vmem>>, %arg29: memref<32x1xf32, #tpu.memory_space<vmem>>, %arg30: memref<1x1xf32, #tpu.memory_space<vmem>>, %arg31: memref<4x1xf32, #tpu.memory_space<vmem>>) attributes {dimension_semantics = [], scalar_prefetch = 0 : i64, scratch_operands = 0 : i64, tpu.core_type = #tpu.core_type<tc>} {
    %c0 = arith.constant 0 : index
    %c0_0 = arith.constant 0 : index
    %0 = vector.load %arg0[%c0, %c0_0] : memref<16x8xf32, #tpu.memory_space<vmem>>, vector<16x8xf32>
    %c0_1 = arith.constant 0 : index
    %c0_2 = arith.constant 0 : index
    %1 = vector.load %arg7[%c0_1, %c0_2] : memref<16x16xf32, #tpu.memory_space<vmem>>, vector<16x16xf32>
    %c0_3 = arith.constant 0 : index
    %c0_4 = arith.constant 0 : index
    %2 = vector.load %arg6[%c0_3, %c0_4] : memref<40x16xf32, #tpu.memory_space<vmem>>, vector<40x16xf32>
    %c0_5 = arith.constant 0 : index
    %c0_6 = arith.constant 0 : index
    %3 = vector.load %arg5[%c0_5, %c0_6] : memref<16x40xf32, #tpu.memory_space<vmem>>, vector<16x40xf32>
    %c0_7 = arith.constant 0 : index
    %c0_8 = arith.constant 0 : index
    %4 = vector.load %arg1[%c0_7, %c0_8] : memref<24x4xf32, #tpu.memory_space<vmem>>, vector<24x4xf32>
    %c0_9 = arith.constant 0 : index
    %c0_10 = arith.constant 0 : index
    %5 = vector.load %arg11[%c0_9, %c0_10] : memref<4x8xf32, #tpu.memory_space<vmem>>, vector<4x8xf32>
    %cst = arith.constant dense<0.000000e+00> : vector<24x8xf32>
    %6 = tpu.matmul %4, %5, %cst {dimension_numbers = #tpu.dot_dimension_numbers<[1], [0], [0], [1], [0, 0, 1, 1], [], []>} : vector<24x4xf32>, vector<4x8xf32>, vector<24x8xf32> -> vector<24x8xf32>
    %c0_11 = arith.constant 0 : index
    %c0_12 = arith.constant 0 : index
    %7 = vector.load %arg12[%c0_11, %c0_12] : memref<1x8xf32, #tpu.memory_space<vmem>>, vector<1x8xf32>
    %8 = vector.broadcast %7 : vector<1x8xf32> to vector<24x8xf32>
    %9 = arith.addf %6, %8 : vector<24x8xf32>
    %c0_13 = arith.constant 0 : index
    %c0_14 = arith.constant 0 : index
    %10 = vector.load %arg4[%c0_13, %c0_14] : memref<40x24xf32, #tpu.memory_space<vmem>>, vector<40x24xf32>
    %cst_15 = arith.constant dense<0.000000e+00> : vector<40x8xf32>
    %11 = tpu.matmul %10, %9, %cst_15 {dimension_numbers = #tpu.dot_dimension_numbers<[1], [0], [0], [1], [0, 0, 1, 1], [], []>} : vector<40x24xf32>, vector<24x8xf32>, vector<40x8xf32> -> vector<40x8xf32>
    %c0_16 = arith.constant 0 : index
    %c0_17 = arith.constant 0 : index
    %12 = vector.load %arg13[%c0_16, %c0_17] : memref<8x32xf32, #tpu.memory_space<vmem>>, vector<8x32xf32>
    %cst_18 = arith.constant dense<0.000000e+00> : vector<16x32xf32>
    %13 = tpu.matmul %0, %12, %cst_18 {dimension_numbers = #tpu.dot_dimension_numbers<[1], [0], [0], [1], [0, 0, 1, 1], [], []>} : vector<16x8xf32>, vector<8x32xf32>, vector<16x32xf32> -> vector<16x32xf32>
    %c0_19 = arith.constant 0 : index
    %c0_20 = arith.constant 0 : index
    %14 = vector.load %arg14[%c0_19, %c0_20] : memref<8x8xf32, #tpu.memory_space<vmem>>, vector<8x8xf32>
    %cst_21 = arith.constant dense<0.000000e+00> : vector<16x8xf32>
    %15 = tpu.matmul %0, %14, %cst_21 {dimension_numbers = #tpu.dot_dimension_numbers<[1], [0], [0], [1], [0, 0, 1, 1], [], []>} : vector<16x8xf32>, vector<8x8xf32>, vector<16x8xf32> -> vector<16x8xf32>
    %16 = vector.extract_strided_slice %15 {offsets = [0, 0], sizes = [16, 4], strides = [1, 1]} : vector<16x8xf32> to vector<16x4xf32>
    %17 = vector.extract_strided_slice %15 {offsets = [0, 4], sizes = [16, 4], strides = [1, 1]} : vector<16x8xf32> to vector<16x4xf32>
    %c0_22 = arith.constant 0 : index
    %c0_23 = arith.constant 0 : index
    %18 = vector.load %arg15[%c0_22, %c0_23] : memref<8x4xf32, #tpu.memory_space<vmem>>, vector<8x4xf32>
    %cst_24 = arith.constant dense<0.000000e+00> : vector<40x4xf32>
    %19 = tpu.matmul %11, %18, %cst_24 {dimension_numbers = #tpu.dot_dimension_numbers<[1], [0], [0], [1], [0, 0, 1, 1], [], []>} : vector<40x8xf32>, vector<8x4xf32>, vector<40x4xf32> -> vector<40x4xf32>
    %cst_25 = arith.constant dense<0.000000e+00> : vector<40x4xf32>
    %20 = tpu.matmul %2, %16, %cst_25 {dimension_numbers = #tpu.dot_dimension_numbers<[1], [0], [0], [1], [0, 0, 1, 1], [], []>} : vector<40x16xf32>, vector<16x4xf32>, vector<40x4xf32> -> vector<40x4xf32>
    %21 = arith.addf %19, %20 : vector<40x4xf32>
    %c0_26 = arith.constant 0 : index
    %c0_27 = arith.constant 0 : index
    %22 = vector.load %arg16[%c0_26, %c0_27] : memref<1x16xf32, #tpu.memory_space<vmem>>, vector<1x16xf32>
    %23 = vector.extract_strided_slice %13 {offsets = [0, 0], sizes = [16, 8], strides = [1, 1]} : vector<16x32xf32> to vector<16x8xf32>
    %24 = vector.extract_strided_slice %21 {offsets = [0, 0], sizes = [40, 1], strides = [1, 1]} : vector<40x4xf32> to vector<40x1xf32>
    %25 = vector.broadcast %24 : vector<40x1xf32> to vector<40x16xf32>
    %26 = arith.mulf %25, %2 : vector<40x16xf32>
    %cst_28 = arith.constant dense<0.000000e+00> : vector<16x16xf32>
    %27 = tpu.matmul %3, %26, %cst_28 {dimension_numbers = #tpu.dot_dimension_numbers<[1], [0], [0], [1], [0, 0, 1, 1], [], []>} : vector<16x40xf32>, vector<40x16xf32>, vector<16x16xf32> -> vector<16x16xf32>
    %28 = vector.extract_strided_slice %17 {offsets = [0, 0], sizes = [16, 1], strides = [1, 1]} : vector<16x4xf32> to vector<16x1xf32>
    %29 = vector.broadcast %28 : vector<16x1xf32> to vector<16x16xf32>
    %30 = arith.addf %29, %27 : vector<16x16xf32>
    %cst_29 = arith.constant 0.000000e+00 : f32
    %31 = vector.broadcast %cst_29 : f32 to vector<16x16xf32>
    %32 = arith.cmpf ogt, %30, %31 : vector<16x16xf32>
    %cst_30 = arith.constant 2.000000e-01 : f32
    %33 = vector.broadcast %cst_30 : f32 to vector<16x16xf32>
    %34 = arith.mulf %33, %30 : vector<16x16xf32>
    %35 = arith.select %32, %30, %34 : vector<16x16xi1>, vector<16x16xf32>
    %cst_31 = arith.constant 0.000000e+00 : f32
    %36 = vector.broadcast %cst_31 : f32 to vector<16x16xf32>
    %37 = arith.cmpf ogt, %1, %36 : vector<16x16xf32>
    %cst_32 = arith.constant -1.000000e+30 : f32
    %38 = vector.broadcast %cst_32 : f32 to vector<16x16xf32>
    %39 = arith.select %37, %35, %38 : vector<16x16xi1>, vector<16x16xf32>
    %cst_33 = arith.constant dense<0xFF800000> : vector<16xf32>
    %40 = vector.multi_reduction <maximumf>, %39, %cst_33 [1] : vector<16x16xf32> to vector<16xf32>
    %41 = vector.shape_cast %40 : vector<16xf32> to vector<16x1xf32>
    %42 = vector.broadcast %41 : vector<16x1xf32> to vector<16x16xf32>
    %43 = arith.subf %39, %42 : vector<16x16xf32>
    %44 = math.exp %43 : vector<16x16xf32>
    %cst_34 = arith.constant dense<0.000000e+00> : vector<16xf32>
    %45 = vector.multi_reduction <add>, %44, %cst_34 [1] : vector<16x16xf32> to vector<16xf32>
    %46 = vector.shape_cast %45 : vector<16xf32> to vector<16x1xf32>
    %47 = tpu.reciprocal %46 {approx = true} : vector<16x1xf32> -> vector<16x1xf32>
    %48 = vector.broadcast %47 : vector<16x1xf32> to vector<16x16xf32>
    %49 = arith.mulf %44, %48 : vector<16x16xf32>
    %cst_35 = arith.constant dense<0.000000e+00> : vector<16x8xf32>
    %50 = tpu.matmul %49, %23, %cst_35 {dimension_numbers = #tpu.dot_dimension_numbers<[1], [0], [0], [1], [0, 0, 1, 1], [], []>} : vector<16x16xf32>, vector<16x8xf32>, vector<16x8xf32> -> vector<16x8xf32>
    %51 = vector.extract_strided_slice %13 {offsets = [0, 8], sizes = [16, 8], strides = [1, 1]} : vector<16x32xf32> to vector<16x8xf32>
    %52 = vector.extract_strided_slice %21 {offsets = [0, 1], sizes = [40, 1], strides = [1, 1]} : vector<40x4xf32> to vector<40x1xf32>
    %53 = vector.broadcast %52 : vector<40x1xf32> to vector<40x16xf32>
    %54 = arith.mulf %53, %2 : vector<40x16xf32>
    %cst_36 = arith.constant dense<0.000000e+00> : vector<16x16xf32>
    %55 = tpu.matmul %3, %54, %cst_36 {dimension_numbers = #tpu.dot_dimension_numbers<[1], [0], [0], [1], [0, 0, 1, 1], [], []>} : vector<16x40xf32>, vector<40x16xf32>, vector<16x16xf32> -> vector<16x16xf32>
    %56 = vector.extract_strided_slice %17 {offsets = [0, 1], sizes = [16, 1], strides = [1, 1]} : vector<16x4xf32> to vector<16x1xf32>
    %57 = vector.broadcast %56 : vector<16x1xf32> to vector<16x16xf32>
    %58 = arith.addf %57, %55 : vector<16x16xf32>
    %cst_37 = arith.constant 0.000000e+00 : f32
    %59 = vector.broadcast %cst_37 : f32 to vector<16x16xf32>
    %60 = arith.cmpf ogt, %58, %59 : vector<16x16xf32>
    %cst_38 = arith.constant 2.000000e-01 : f32
    %61 = vector.broadcast %cst_38 : f32 to vector<16x16xf32>
    %62 = arith.mulf %61, %58 : vector<16x16xf32>
    %63 = arith.select %60, %58, %62 : vector<16x16xi1>, vector<16x16xf32>
    %cst_39 = arith.constant 0.000000e+00 : f32
    %64 = vector.broadcast %cst_39 : f32 to vector<16x16xf32>
    %65 = arith.cmpf ogt, %1, %64 : vector<16x16xf32>
    %cst_40 = arith.constant -1.000000e+30 : f32
    %66 = vector.broadcast %cst_40 : f32 to vector<16x16xf32>
    %67 = arith.select %65, %63, %66 : vector<16x16xi1>, vector<16x16xf32>
    %cst_41 = arith.constant dense<0xFF800000> : vector<16xf32>
    %68 = vector.multi_reduction <maximumf>, %67, %cst_41 [1] : vector<16x16xf32> to vector<16xf32>
    %69 = vector.shape_cast %68 : vector<16xf32> to vector<16x1xf32>
    %70 = vector.broadcast %69 : vector<16x1xf32> to vector<16x16xf32>
    %71 = arith.subf %67, %70 : vector<16x16xf32>
    %72 = math.exp %71 : vector<16x16xf32>
    %cst_42 = arith.constant dense<0.000000e+00> : vector<16xf32>
    %73 = vector.multi_reduction <add>, %72, %cst_42 [1] : vector<16x16xf32> to vector<16xf32>
    %74 = vector.shape_cast %73 : vector<16xf32> to vector<16x1xf32>
    %75 = tpu.reciprocal %74 {approx = true} : vector<16x1xf32> -> vector<16x1xf32>
    %76 = vector.broadcast %75 : vector<16x1xf32> to vector<16x16xf32>
    %77 = arith.mulf %72, %76 : vector<16x16xf32>
    %cst_43 = arith.constant dense<0.000000e+00> : vector<16x8xf32>
    %78 = tpu.matmul %77, %51, %cst_43 {dimension_numbers = #tpu.dot_dimension_numbers<[1], [0], [0], [1], [0, 0, 1, 1], [], []>} : vector<16x16xf32>, vector<16x8xf32>, vector<16x8xf32> -> vector<16x8xf32>
    %79 = arith.addf %50, %78 : vector<16x8xf32>
    %cst_44 = arith.constant 5.000000e-01 : f32
    %80 = vector.broadcast %cst_44 : f32 to vector<16x8xf32>
    %81 = arith.mulf %79, %80 : vector<16x8xf32>
    %82 = vector.extract_strided_slice %22 {offsets = [0, 0], sizes = [1, 8], strides = [1, 1]} : vector<1x16xf32> to vector<1x8xf32>
    %83 = vector.broadcast %82 : vector<1x8xf32> to vector<16x8xf32>
    %84 = arith.addf %81, %83 : vector<16x8xf32>
    %cst_45 = arith.constant 0.000000e+00 : f32
    %85 = vector.broadcast %cst_45 : f32 to vector<16x8xf32>
    %86 = arith.maximumf %84, %85 : vector<16x8xf32>
    %87 = vector.extract_strided_slice %13 {offsets = [0, 16], sizes = [16, 8], strides = [1, 1]} : vector<16x32xf32> to vector<16x8xf32>
    %88 = vector.extract_strided_slice %21 {offsets = [0, 2], sizes = [40, 1], strides = [1, 1]} : vector<40x4xf32> to vector<40x1xf32>
    %89 = vector.broadcast %88 : vector<40x1xf32> to vector<40x16xf32>
    %90 = arith.mulf %89, %2 : vector<40x16xf32>
    %cst_46 = arith.constant dense<0.000000e+00> : vector<16x16xf32>
    %91 = tpu.matmul %3, %90, %cst_46 {dimension_numbers = #tpu.dot_dimension_numbers<[1], [0], [0], [1], [0, 0, 1, 1], [], []>} : vector<16x40xf32>, vector<40x16xf32>, vector<16x16xf32> -> vector<16x16xf32>
    %92 = vector.extract_strided_slice %17 {offsets = [0, 2], sizes = [16, 1], strides = [1, 1]} : vector<16x4xf32> to vector<16x1xf32>
    %93 = vector.broadcast %92 : vector<16x1xf32> to vector<16x16xf32>
    %94 = arith.addf %93, %91 : vector<16x16xf32>
    %cst_47 = arith.constant 0.000000e+00 : f32
    %95 = vector.broadcast %cst_47 : f32 to vector<16x16xf32>
    %96 = arith.cmpf ogt, %94, %95 : vector<16x16xf32>
    %cst_48 = arith.constant 2.000000e-01 : f32
    %97 = vector.broadcast %cst_48 : f32 to vector<16x16xf32>
    %98 = arith.mulf %97, %94 : vector<16x16xf32>
    %99 = arith.select %96, %94, %98 : vector<16x16xi1>, vector<16x16xf32>
    %cst_49 = arith.constant 0.000000e+00 : f32
    %100 = vector.broadcast %cst_49 : f32 to vector<16x16xf32>
    %101 = arith.cmpf ogt, %1, %100 : vector<16x16xf32>
    %cst_50 = arith.constant -1.000000e+30 : f32
    %102 = vector.broadcast %cst_50 : f32 to vector<16x16xf32>
    %103 = arith.select %101, %99, %102 : vector<16x16xi1>, vector<16x16xf32>
    %cst_51 = arith.constant dense<0xFF800000> : vector<16xf32>
    %104 = vector.multi_reduction <maximumf>, %103, %cst_51 [1] : vector<16x16xf32> to vector<16xf32>
    %105 = vector.shape_cast %104 : vector<16xf32> to vector<16x1xf32>
    %106 = vector.broadcast %105 : vector<16x1xf32> to vector<16x16xf32>
    %107 = arith.subf %103, %106 : vector<16x16xf32>
    %108 = math.exp %107 : vector<16x16xf32>
    %cst_52 = arith.constant dense<0.000000e+00> : vector<16xf32>
    %109 = vector.multi_reduction <add>, %108, %cst_52 [1] : vector<16x16xf32> to vector<16xf32>
    %110 = vector.shape_cast %109 : vector<16xf32> to vector<16x1xf32>
    %111 = tpu.reciprocal %110 {approx = true} : vector<16x1xf32> -> vector<16x1xf32>
    %112 = vector.broadcast %111 : vector<16x1xf32> to vector<16x16xf32>
    %113 = arith.mulf %108, %112 : vector<16x16xf32>
    %cst_53 = arith.constant dense<0.000000e+00> : vector<16x8xf32>
    %114 = tpu.matmul %113, %87, %cst_53 {dimension_numbers = #tpu.dot_dimension_numbers<[1], [0], [0], [1], [0, 0, 1, 1], [], []>} : vector<16x16xf32>, vector<16x8xf32>, vector<16x8xf32> -> vector<16x8xf32>
    %115 = vector.extract_strided_slice %13 {offsets = [0, 24], sizes = [16, 8], strides = [1, 1]} : vector<16x32xf32> to vector<16x8xf32>
    %116 = vector.extract_strided_slice %21 {offsets = [0, 3], sizes = [40, 1], strides = [1, 1]} : vector<40x4xf32> to vector<40x1xf32>
    %117 = vector.broadcast %116 : vector<40x1xf32> to vector<40x16xf32>
    %118 = arith.mulf %117, %2 : vector<40x16xf32>
    %cst_54 = arith.constant dense<0.000000e+00> : vector<16x16xf32>
    %119 = tpu.matmul %3, %118, %cst_54 {dimension_numbers = #tpu.dot_dimension_numbers<[1], [0], [0], [1], [0, 0, 1, 1], [], []>} : vector<16x40xf32>, vector<40x16xf32>, vector<16x16xf32> -> vector<16x16xf32>
    %120 = vector.extract_strided_slice %17 {offsets = [0, 3], sizes = [16, 1], strides = [1, 1]} : vector<16x4xf32> to vector<16x1xf32>
    %121 = vector.broadcast %120 : vector<16x1xf32> to vector<16x16xf32>
    %122 = arith.addf %121, %119 : vector<16x16xf32>
    %cst_55 = arith.constant 0.000000e+00 : f32
    %123 = vector.broadcast %cst_55 : f32 to vector<16x16xf32>
    %124 = arith.cmpf ogt, %122, %123 : vector<16x16xf32>
    %cst_56 = arith.constant 2.000000e-01 : f32
    %125 = vector.broadcast %cst_56 : f32 to vector<16x16xf32>
    %126 = arith.mulf %125, %122 : vector<16x16xf32>
    %127 = arith.select %124, %122, %126 : vector<16x16xi1>, vector<16x16xf32>
    %cst_57 = arith.constant 0.000000e+00 : f32
    %128 = vector.broadcast %cst_57 : f32 to vector<16x16xf32>
    %129 = arith.cmpf ogt, %1, %128 : vector<16x16xf32>
    %cst_58 = arith.constant -1.000000e+30 : f32
    %130 = vector.broadcast %cst_58 : f32 to vector<16x16xf32>
    %131 = arith.select %129, %127, %130 : vector<16x16xi1>, vector<16x16xf32>
    %cst_59 = arith.constant dense<0xFF800000> : vector<16xf32>
    %132 = vector.multi_reduction <maximumf>, %131, %cst_59 [1] : vector<16x16xf32> to vector<16xf32>
    %133 = vector.shape_cast %132 : vector<16xf32> to vector<16x1xf32>
    %134 = vector.broadcast %133 : vector<16x1xf32> to vector<16x16xf32>
    %135 = arith.subf %131, %134 : vector<16x16xf32>
    %136 = math.exp %135 : vector<16x16xf32>
    %cst_60 = arith.constant dense<0.000000e+00> : vector<16xf32>
    %137 = vector.multi_reduction <add>, %136, %cst_60 [1] : vector<16x16xf32> to vector<16xf32>
    %138 = vector.shape_cast %137 : vector<16xf32> to vector<16x1xf32>
    %139 = tpu.reciprocal %138 {approx = true} : vector<16x1xf32> -> vector<16x1xf32>
    %140 = vector.broadcast %139 : vector<16x1xf32> to vector<16x16xf32>
    %141 = arith.mulf %136, %140 : vector<16x16xf32>
    %cst_61 = arith.constant dense<0.000000e+00> : vector<16x8xf32>
    %142 = tpu.matmul %141, %115, %cst_61 {dimension_numbers = #tpu.dot_dimension_numbers<[1], [0], [0], [1], [0, 0, 1, 1], [], []>} : vector<16x16xf32>, vector<16x8xf32>, vector<16x8xf32> -> vector<16x8xf32>
    %143 = arith.addf %114, %142 : vector<16x8xf32>
    %cst_62 = arith.constant 5.000000e-01 : f32
    %144 = vector.broadcast %cst_62 : f32 to vector<16x8xf32>
    %145 = arith.mulf %143, %144 : vector<16x8xf32>
    %146 = vector.extract_strided_slice %22 {offsets = [0, 8], sizes = [1, 8], strides = [1, 1]} : vector<1x16xf32> to vector<1x8xf32>
    %147 = vector.broadcast %146 : vector<1x8xf32> to vector<16x8xf32>
    %148 = arith.addf %145, %147 : vector<16x8xf32>
    %cst_63 = arith.constant 0.000000e+00 : f32
    %149 = vector.broadcast %cst_63 : f32 to vector<16x8xf32>
    %150 = arith.maximumf %148, %149 : vector<16x8xf32>
    %151 = tpu.concatenate %86, %150 in 1 : vector<16x8xf32>, vector<16x8xf32> -> vector<16x16xf32>
    %c0_64 = arith.constant 0 : index
    %c0_65 = arith.constant 0 : index
    %152 = vector.load %arg3[%c0_64, %c0_65] : memref<4x1xi32, #tpu.memory_space<vmem>>, vector<4x1xi32>
    %153 = tpu.iota {dimensions = array<i32: 1>} : vector<4x16xi32>
    %154 = vector.broadcast %152 : vector<4x1xi32> to vector<4x16xi32>
    %155 = arith.cmpi eq, %154, %153 : vector<4x16xi32>
    %156 = arith.extui %155 : vector<4x16xi1> to vector<4x16xi32>
    %157 = arith.sitofp %156 : vector<4x16xi32> to vector<4x16xf32>
    %cst_66 = arith.constant dense<0.000000e+00> : vector<4x16xf32>
    %158 = tpu.matmul %157, %151, %cst_66 {dimension_numbers = #tpu.dot_dimension_numbers<[1], [0], [0], [1], [0, 0, 1, 1], [], []>} : vector<4x16xf32>, vector<16x16xf32>, vector<4x16xf32> -> vector<4x16xf32>
    %c0_67 = arith.constant 0 : index
    %c0_68 = arith.constant 0 : index
    %159 = vector.load %arg17[%c0_67, %c0_68] : memref<16x32xf32, #tpu.memory_space<vmem>>, vector<16x32xf32>
    %cst_69 = arith.constant dense<0.000000e+00> : vector<4x32xf32>
    %160 = tpu.matmul %158, %159, %cst_69 {dimension_numbers = #tpu.dot_dimension_numbers<[1], [0], [0], [1], [0, 0, 1, 1], [], []>} : vector<4x16xf32>, vector<16x32xf32>, vector<4x32xf32> -> vector<4x32xf32>
    %c0_70 = arith.constant 0 : index
    %c0_71 = arith.constant 0 : index
    %161 = vector.load %arg8[%c0_70, %c0_71] : memref<32x4xf32, #tpu.memory_space<vmem>>, vector<32x4xf32>
    %cst_72 = arith.constant dense<0.000000e+00> : vector<32x32xf32>
    %162 = tpu.matmul %161, %160, %cst_72 {dimension_numbers = #tpu.dot_dimension_numbers<[1], [0], [0], [1], [0, 0, 1, 1], [], []>} : vector<32x4xf32>, vector<4x32xf32>, vector<32x32xf32> -> vector<32x32xf32>
    %c0_73 = arith.constant 0 : index
    %c0_74 = arith.constant 0 : index
    %163 = vector.load %arg2[%c0_73, %c0_74] : memref<32x6xf32, #tpu.memory_space<vmem>>, vector<32x6xf32>
    %c0_75 = arith.constant 0 : index
    %c0_76 = arith.constant 0 : index
    %164 = vector.load %arg18[%c0_75, %c0_76] : memref<6x32xf32, #tpu.memory_space<vmem>>, vector<6x32xf32>
    %cst_77 = arith.constant dense<0.000000e+00> : vector<32x32xf32>
    %165 = tpu.matmul %163, %164, %cst_77 {dimension_numbers = #tpu.dot_dimension_numbers<[1], [0], [0], [1], [0, 0, 1, 1], [], []>} : vector<32x6xf32>, vector<6x32xf32>, vector<32x32xf32> -> vector<32x32xf32>
    %166 = arith.addf %162, %165 : vector<32x32xf32>
    %c0_78 = arith.constant 0 : index
    %c0_79 = arith.constant 0 : index
    %167 = vector.load %arg19[%c0_78, %c0_79] : memref<32x32xf32, #tpu.memory_space<vmem>>, vector<32x32xf32>
    %168 = arith.addf %166, %167 : vector<32x32xf32>
    %c0_80 = arith.constant 0 : index
    %c0_81 = arith.constant 0 : index
    %169 = vector.load %arg9[%c0_80, %c0_81] : memref<32x32xf32, #tpu.memory_space<vmem>>, vector<32x32xf32>
    %c0_82 = arith.constant 0 : index
    %c0_83 = arith.constant 0 : index
    %170 = vector.load %arg20[%c0_82, %c0_83] : memref<32x96xf32, #tpu.memory_space<vmem>>, vector<32x96xf32>
    %cst_84 = arith.constant dense<0.000000e+00> : vector<32x96xf32>
    %171 = tpu.matmul %168, %170, %cst_84 {dimension_numbers = #tpu.dot_dimension_numbers<[1], [0], [0], [1], [0, 0, 1, 1], [], []>} : vector<32x32xf32>, vector<32x96xf32>, vector<32x96xf32> -> vector<32x96xf32>
    %c0_85 = arith.constant 0 : index
    %c0_86 = arith.constant 0 : index
    %172 = vector.load %arg21[%c0_85, %c0_86] : memref<1x96xf32, #tpu.memory_space<vmem>>, vector<1x96xf32>
    %173 = vector.broadcast %172 : vector<1x96xf32> to vector<32x96xf32>
    %174 = arith.addf %171, %173 : vector<32x96xf32>
    %175 = vector.extract_strided_slice %174 {offsets = [0, 0], sizes = [32, 8], strides = [1, 1]} : vector<32x96xf32> to vector<32x8xf32>
    %176 = vector.extract_strided_slice %174 {offsets = [0, 32], sizes = [32, 8], strides = [1, 1]} : vector<32x96xf32> to vector<32x8xf32>
    %177 = vector.extract_strided_slice %174 {offsets = [0, 64], sizes = [32, 8], strides = [1, 1]} : vector<32x96xf32> to vector<32x8xf32>
    %178 = tpu.transpose %176, [1, 0] : vector<32x8xf32> -> vector<8x32xf32>
    %cst_87 = arith.constant dense<0.000000e+00> : vector<32x32xf32>
    %179 = tpu.matmul %175, %178, %cst_87 {dimension_numbers = #tpu.dot_dimension_numbers<[1], [0], [0], [1], [0, 0, 1, 1], [], []>} : vector<32x8xf32>, vector<8x32xf32>, vector<32x32xf32> -> vector<32x32xf32>
    %cst_88 = arith.constant 0.353553385 : f32
    %180 = vector.broadcast %cst_88 : f32 to vector<32x32xf32>
    %181 = arith.mulf %179, %180 : vector<32x32xf32>
    %cst_89 = arith.constant 0.000000e+00 : f32
    %182 = vector.broadcast %cst_89 : f32 to vector<32x32xf32>
    %183 = arith.cmpf ogt, %169, %182 : vector<32x32xf32>
    %cst_90 = arith.constant -1.000000e+30 : f32
    %184 = vector.broadcast %cst_90 : f32 to vector<32x32xf32>
    %185 = arith.select %183, %181, %184 : vector<32x32xi1>, vector<32x32xf32>
    %cst_91 = arith.constant dense<0xFF800000> : vector<32xf32>
    %186 = vector.multi_reduction <maximumf>, %185, %cst_91 [1] : vector<32x32xf32> to vector<32xf32>
    %187 = vector.shape_cast %186 : vector<32xf32> to vector<32x1xf32>
    %188 = vector.broadcast %187 : vector<32x1xf32> to vector<32x32xf32>
    %189 = arith.subf %185, %188 : vector<32x32xf32>
    %190 = math.exp %189 : vector<32x32xf32>
    %cst_92 = arith.constant dense<0.000000e+00> : vector<32xf32>
    %191 = vector.multi_reduction <add>, %190, %cst_92 [1] : vector<32x32xf32> to vector<32xf32>
    %192 = vector.shape_cast %191 : vector<32xf32> to vector<32x1xf32>
    %193 = tpu.reciprocal %192 {approx = true} : vector<32x1xf32> -> vector<32x1xf32>
    %194 = vector.broadcast %193 : vector<32x1xf32> to vector<32x32xf32>
    %195 = arith.mulf %190, %194 : vector<32x32xf32>
    %cst_93 = arith.constant dense<0.000000e+00> : vector<32x8xf32>
    %196 = tpu.matmul %195, %177, %cst_93 {dimension_numbers = #tpu.dot_dimension_numbers<[1], [0], [0], [1], [0, 0, 1, 1], [], []>} : vector<32x32xf32>, vector<32x8xf32>, vector<32x8xf32> -> vector<32x8xf32>
    %197 = vector.extract_strided_slice %174 {offsets = [0, 8], sizes = [32, 8], strides = [1, 1]} : vector<32x96xf32> to vector<32x8xf32>
    %198 = vector.extract_strided_slice %174 {offsets = [0, 40], sizes = [32, 8], strides = [1, 1]} : vector<32x96xf32> to vector<32x8xf32>
    %199 = vector.extract_strided_slice %174 {offsets = [0, 72], sizes = [32, 8], strides = [1, 1]} : vector<32x96xf32> to vector<32x8xf32>
    %200 = tpu.transpose %198, [1, 0] : vector<32x8xf32> -> vector<8x32xf32>
    %cst_94 = arith.constant dense<0.000000e+00> : vector<32x32xf32>
    %201 = tpu.matmul %197, %200, %cst_94 {dimension_numbers = #tpu.dot_dimension_numbers<[1], [0], [0], [1], [0, 0, 1, 1], [], []>} : vector<32x8xf32>, vector<8x32xf32>, vector<32x32xf32> -> vector<32x32xf32>
    %cst_95 = arith.constant 0.353553385 : f32
    %202 = vector.broadcast %cst_95 : f32 to vector<32x32xf32>
    %203 = arith.mulf %201, %202 : vector<32x32xf32>
    %cst_96 = arith.constant 0.000000e+00 : f32
    %204 = vector.broadcast %cst_96 : f32 to vector<32x32xf32>
    %205 = arith.cmpf ogt, %169, %204 : vector<32x32xf32>
    %cst_97 = arith.constant -1.000000e+30 : f32
    %206 = vector.broadcast %cst_97 : f32 to vector<32x32xf32>
    %207 = arith.select %205, %203, %206 : vector<32x32xi1>, vector<32x32xf32>
    %cst_98 = arith.constant dense<0xFF800000> : vector<32xf32>
    %208 = vector.multi_reduction <maximumf>, %207, %cst_98 [1] : vector<32x32xf32> to vector<32xf32>
    %209 = vector.shape_cast %208 : vector<32xf32> to vector<32x1xf32>
    %210 = vector.broadcast %209 : vector<32x1xf32> to vector<32x32xf32>
    %211 = arith.subf %207, %210 : vector<32x32xf32>
    %212 = math.exp %211 : vector<32x32xf32>
    %cst_99 = arith.constant dense<0.000000e+00> : vector<32xf32>
    %213 = vector.multi_reduction <add>, %212, %cst_99 [1] : vector<32x32xf32> to vector<32xf32>
    %214 = vector.shape_cast %213 : vector<32xf32> to vector<32x1xf32>
    %215 = tpu.reciprocal %214 {approx = true} : vector<32x1xf32> -> vector<32x1xf32>
    %216 = vector.broadcast %215 : vector<32x1xf32> to vector<32x32xf32>
    %217 = arith.mulf %212, %216 : vector<32x32xf32>
    %cst_100 = arith.constant dense<0.000000e+00> : vector<32x8xf32>
    %218 = tpu.matmul %217, %199, %cst_100 {dimension_numbers = #tpu.dot_dimension_numbers<[1], [0], [0], [1], [0, 0, 1, 1], [], []>} : vector<32x32xf32>, vector<32x8xf32>, vector<32x8xf32> -> vector<32x8xf32>
    %219 = vector.extract_strided_slice %174 {offsets = [0, 16], sizes = [32, 8], strides = [1, 1]} : vector<32x96xf32> to vector<32x8xf32>
    %220 = vector.extract_strided_slice %174 {offsets = [0, 48], sizes = [32, 8], strides = [1, 1]} : vector<32x96xf32> to vector<32x8xf32>
    %221 = vector.extract_strided_slice %174 {offsets = [0, 80], sizes = [32, 8], strides = [1, 1]} : vector<32x96xf32> to vector<32x8xf32>
    %222 = tpu.transpose %220, [1, 0] : vector<32x8xf32> -> vector<8x32xf32>
    %cst_101 = arith.constant dense<0.000000e+00> : vector<32x32xf32>
    %223 = tpu.matmul %219, %222, %cst_101 {dimension_numbers = #tpu.dot_dimension_numbers<[1], [0], [0], [1], [0, 0, 1, 1], [], []>} : vector<32x8xf32>, vector<8x32xf32>, vector<32x32xf32> -> vector<32x32xf32>
    %cst_102 = arith.constant 0.353553385 : f32
    %224 = vector.broadcast %cst_102 : f32 to vector<32x32xf32>
    %225 = arith.mulf %223, %224 : vector<32x32xf32>
    %cst_103 = arith.constant 0.000000e+00 : f32
    %226 = vector.broadcast %cst_103 : f32 to vector<32x32xf32>
    %227 = arith.cmpf ogt, %169, %226 : vector<32x32xf32>
    %cst_104 = arith.constant -1.000000e+30 : f32
    %228 = vector.broadcast %cst_104 : f32 to vector<32x32xf32>
    %229 = arith.select %227, %225, %228 : vector<32x32xi1>, vector<32x32xf32>
    %cst_105 = arith.constant dense<0xFF800000> : vector<32xf32>
    %230 = vector.multi_reduction <maximumf>, %229, %cst_105 [1] : vector<32x32xf32> to vector<32xf32>
    %231 = vector.shape_cast %230 : vector<32xf32> to vector<32x1xf32>
    %232 = vector.broadcast %231 : vector<32x1xf32> to vector<32x32xf32>
    %233 = arith.subf %229, %232 : vector<32x32xf32>
    %234 = math.exp %233 : vector<32x32xf32>
    %cst_106 = arith.constant dense<0.000000e+00> : vector<32xf32>
    %235 = vector.multi_reduction <add>, %234, %cst_106 [1] : vector<32x32xf32> to vector<32xf32>
    %236 = vector.shape_cast %235 : vector<32xf32> to vector<32x1xf32>
    %237 = tpu.reciprocal %236 {approx = true} : vector<32x1xf32> -> vector<32x1xf32>
    %238 = vector.broadcast %237 : vector<32x1xf32> to vector<32x32xf32>
    %239 = arith.mulf %234, %238 : vector<32x32xf32>
    %cst_107 = arith.constant dense<0.000000e+00> : vector<32x8xf32>
    %240 = tpu.matmul %239, %221, %cst_107 {dimension_numbers = #tpu.dot_dimension_numbers<[1], [0], [0], [1], [0, 0, 1, 1], [], []>} : vector<32x32xf32>, vector<32x8xf32>, vector<32x8xf32> -> vector<32x8xf32>
    %241 = vector.extract_strided_slice %174 {offsets = [0, 24], sizes = [32, 8], strides = [1, 1]} : vector<32x96xf32> to vector<32x8xf32>
    %242 = vector.extract_strided_slice %174 {offsets = [0, 56], sizes = [32, 8], strides = [1, 1]} : vector<32x96xf32> to vector<32x8xf32>
    %243 = vector.extract_strided_slice %174 {offsets = [0, 88], sizes = [32, 8], strides = [1, 1]} : vector<32x96xf32> to vector<32x8xf32>
    %244 = tpu.transpose %242, [1, 0] : vector<32x8xf32> -> vector<8x32xf32>
    %cst_108 = arith.constant dense<0.000000e+00> : vector<32x32xf32>
    %245 = tpu.matmul %241, %244, %cst_108 {dimension_numbers = #tpu.dot_dimension_numbers<[1], [0], [0], [1], [0, 0, 1, 1], [], []>} : vector<32x8xf32>, vector<8x32xf32>, vector<32x32xf32> -> vector<32x32xf32>
    %cst_109 = arith.constant 0.353553385 : f32
    %246 = vector.broadcast %cst_109 : f32 to vector<32x32xf32>
    %247 = arith.mulf %245, %246 : vector<32x32xf32>
    %cst_110 = arith.constant 0.000000e+00 : f32
    %248 = vector.broadcast %cst_110 : f32 to vector<32x32xf32>
    %249 = arith.cmpf ogt, %169, %248 : vector<32x32xf32>
    %cst_111 = arith.constant -1.000000e+30 : f32
    %250 = vector.broadcast %cst_111 : f32 to vector<32x32xf32>
    %251 = arith.select %249, %247, %250 : vector<32x32xi1>, vector<32x32xf32>
    %cst_112 = arith.constant dense<0xFF800000> : vector<32xf32>
    %252 = vector.multi_reduction <maximumf>, %251, %cst_112 [1] : vector<32x32xf32> to vector<32xf32>
    %253 = vector.shape_cast %252 : vector<32xf32> to vector<32x1xf32>
    %254 = vector.broadcast %253 : vector<32x1xf32> to vector<32x32xf32>
    %255 = arith.subf %251, %254 : vector<32x32xf32>
    %256 = math.exp %255 : vector<32x32xf32>
    %cst_113 = arith.constant dense<0.000000e+00> : vector<32xf32>
    %257 = vector.multi_reduction <add>, %256, %cst_113 [1] : vector<32x32xf32> to vector<32xf32>
    %258 = vector.shape_cast %257 : vector<32xf32> to vector<32x1xf32>
    %259 = tpu.reciprocal %258 {approx = true} : vector<32x1xf32> -> vector<32x1xf32>
    %260 = vector.broadcast %259 : vector<32x1xf32> to vector<32x32xf32>
    %261 = arith.mulf %256, %260 : vector<32x32xf32>
    %cst_114 = arith.constant dense<0.000000e+00> : vector<32x8xf32>
    %262 = tpu.matmul %261, %243, %cst_114 {dimension_numbers = #tpu.dot_dimension_numbers<[1], [0], [0], [1], [0, 0, 1, 1], [], []>} : vector<32x32xf32>, vector<32x8xf32>, vector<32x8xf32> -> vector<32x8xf32>
    %263 = tpu.concatenate %196, %218, %240, %262 in 1 : vector<32x8xf32>, vector<32x8xf32>, vector<32x8xf32>, vector<32x8xf32> -> vector<32x32xf32>
    %c0_115 = arith.constant 0 : index
    %c0_116 = arith.constant 0 : index
    %264 = vector.load %arg22[%c0_115, %c0_116] : memref<32x32xf32, #tpu.memory_space<vmem>>, vector<32x32xf32>
    %cst_117 = arith.constant dense<0.000000e+00> : vector<32x32xf32>
    %265 = tpu.matmul %263, %264, %cst_117 {dimension_numbers = #tpu.dot_dimension_numbers<[1], [0], [0], [1], [0, 0, 1, 1], [], []>} : vector<32x32xf32>, vector<32x32xf32>, vector<32x32xf32> -> vector<32x32xf32>
    %c0_118 = arith.constant 0 : index
    %c0_119 = arith.constant 0 : index
    %266 = vector.load %arg23[%c0_118, %c0_119] : memref<1x32xf32, #tpu.memory_space<vmem>>, vector<1x32xf32>
    %267 = vector.broadcast %266 : vector<1x32xf32> to vector<32x32xf32>
    %268 = arith.addf %265, %267 : vector<32x32xf32>
    %c0_120 = arith.constant 0 : index
    %c0_121 = arith.constant 0 : index
    %269 = vector.load %arg28[%c0_120, %c0_121] : memref<4x32xf32, #tpu.memory_space<vmem>>, vector<4x32xf32>
    %270 = arith.addf %168, %268 : vector<32x32xf32>
    %cst_122 = arith.constant dense<0.000000e+00> : vector<32xf32>
    %271 = vector.multi_reduction <add>, %270, %cst_122 [1] : vector<32x32xf32> to vector<32xf32>
    %272 = vector.shape_cast %271 : vector<32xf32> to vector<32x1xf32>
    %cst_123 = arith.constant 3.200000e+01 : f32
    %273 = vector.broadcast %cst_123 : f32 to vector<32x1xf32>
    %274 = arith.divf %272, %273 : vector<32x1xf32>
    %275 = vector.broadcast %274 : vector<32x1xf32> to vector<32x32xf32>
    %276 = arith.subf %270, %275 : vector<32x32xf32>
    %277 = arith.mulf %276, %276 : vector<32x32xf32>
    %cst_124 = arith.constant dense<0.000000e+00> : vector<32xf32>
    %278 = vector.multi_reduction <add>, %277, %cst_124 [1] : vector<32x32xf32> to vector<32xf32>
    %279 = vector.shape_cast %278 : vector<32xf32> to vector<32x1xf32>
    %cst_125 = arith.constant 3.200000e+01 : f32
    %280 = vector.broadcast %cst_125 : f32 to vector<32x1xf32>
    %281 = arith.divf %279, %280 : vector<32x1xf32>
    %282 = vector.broadcast %274 : vector<32x1xf32> to vector<32x32xf32>
    %283 = arith.subf %270, %282 : vector<32x32xf32>
    %cst_126 = arith.constant 9.99999974E-6 : f32
    %284 = vector.broadcast %cst_126 : f32 to vector<32x1xf32>
    %285 = arith.addf %281, %284 : vector<32x1xf32>
    %286 = math.rsqrt %285 : vector<32x1xf32>
    %287 = vector.broadcast %286 : vector<32x1xf32> to vector<32x32xf32>
    %288 = arith.mulf %283, %287 : vector<32x32xf32>
    %289 = vector.extract_strided_slice %269 {offsets = [0, 0], sizes = [1, 32], strides = [1, 1]} : vector<4x32xf32> to vector<1x32xf32>
    %290 = vector.broadcast %289 : vector<1x32xf32> to vector<32x32xf32>
    %291 = arith.mulf %288, %290 : vector<32x32xf32>
    %292 = vector.extract_strided_slice %269 {offsets = [1, 0], sizes = [1, 32], strides = [1, 1]} : vector<4x32xf32> to vector<1x32xf32>
    %293 = vector.broadcast %292 : vector<1x32xf32> to vector<32x32xf32>
    %294 = arith.addf %291, %293 : vector<32x32xf32>
    %c0_127 = arith.constant 0 : index
    %c0_128 = arith.constant 0 : index
    %295 = vector.load %arg24[%c0_127, %c0_128] : memref<32x64xf32, #tpu.memory_space<vmem>>, vector<32x64xf32>
    %cst_129 = arith.constant dense<0.000000e+00> : vector<32x64xf32>
    %296 = tpu.matmul %294, %295, %cst_129 {dimension_numbers = #tpu.dot_dimension_numbers<[1], [0], [0], [1], [0, 0, 1, 1], [], []>} : vector<32x32xf32>, vector<32x64xf32>, vector<32x64xf32> -> vector<32x64xf32>
    %c0_130 = arith.constant 0 : index
    %c0_131 = arith.constant 0 : index
    %297 = vector.load %arg25[%c0_130, %c0_131] : memref<1x64xf32, #tpu.memory_space<vmem>>, vector<1x64xf32>
    %298 = vector.broadcast %297 : vector<1x64xf32> to vector<32x64xf32>
    %299 = arith.addf %296, %298 : vector<32x64xf32>
    %cst_132 = arith.constant 0.000000e+00 : f32
    %300 = vector.broadcast %cst_132 : f32 to vector<32x64xf32>
    %301 = arith.maximumf %299, %300 : vector<32x64xf32>
    %c0_133 = arith.constant 0 : index
    %c0_134 = arith.constant 0 : index
    %302 = vector.load %arg26[%c0_133, %c0_134] : memref<64x32xf32, #tpu.memory_space<vmem>>, vector<64x32xf32>
    %cst_135 = arith.constant dense<0.000000e+00> : vector<32x32xf32>
    %303 = tpu.matmul %301, %302, %cst_135 {dimension_numbers = #tpu.dot_dimension_numbers<[1], [0], [0], [1], [0, 0, 1, 1], [], []>} : vector<32x64xf32>, vector<64x32xf32>, vector<32x32xf32> -> vector<32x32xf32>
    %c0_136 = arith.constant 0 : index
    %c0_137 = arith.constant 0 : index
    %304 = vector.load %arg27[%c0_136, %c0_137] : memref<1x32xf32, #tpu.memory_space<vmem>>, vector<1x32xf32>
    %305 = vector.broadcast %304 : vector<1x32xf32> to vector<32x32xf32>
    %306 = arith.addf %303, %305 : vector<32x32xf32>
    %307 = arith.addf %294, %306 : vector<32x32xf32>
    %cst_138 = arith.constant dense<0.000000e+00> : vector<32xf32>
    %308 = vector.multi_reduction <add>, %307, %cst_138 [1] : vector<32x32xf32> to vector<32xf32>
    %309 = vector.shape_cast %308 : vector<32xf32> to vector<32x1xf32>
    %cst_139 = arith.constant 3.200000e+01 : f32
    %310 = vector.broadcast %cst_139 : f32 to vector<32x1xf32>
    %311 = arith.divf %309, %310 : vector<32x1xf32>
    %312 = vector.broadcast %311 : vector<32x1xf32> to vector<32x32xf32>
    %313 = arith.subf %307, %312 : vector<32x32xf32>
    %314 = arith.mulf %313, %313 : vector<32x32xf32>
    %cst_140 = arith.constant dense<0.000000e+00> : vector<32xf32>
    %315 = vector.multi_reduction <add>, %314, %cst_140 [1] : vector<32x32xf32> to vector<32xf32>
    %316 = vector.shape_cast %315 : vector<32xf32> to vector<32x1xf32>
    %cst_141 = arith.constant 3.200000e+01 : f32
    %317 = vector.broadcast %cst_141 : f32 to vector<32x1xf32>
    %318 = arith.divf %316, %317 : vector<32x1xf32>
    %319 = vector.broadcast %311 : vector<32x1xf32> to vector<32x32xf32>
    %320 = arith.subf %307, %319 : vector<32x32xf32>
    %cst_142 = arith.constant 9.99999974E-6 : f32
    %321 = vector.broadcast %cst_142 : f32 to vector<32x1xf32>
    %322 = arith.addf %318, %321 : vector<32x1xf32>
    %323 = math.rsqrt %322 : vector<32x1xf32>
    %324 = vector.broadcast %323 : vector<32x1xf32> to vector<32x32xf32>
    %325 = arith.mulf %320, %324 : vector<32x32xf32>
    %326 = vector.extract_strided_slice %269 {offsets = [2, 0], sizes = [1, 32], strides = [1, 1]} : vector<4x32xf32> to vector<1x32xf32>
    %327 = vector.broadcast %326 : vector<1x32xf32> to vector<32x32xf32>
    %328 = arith.mulf %325, %327 : vector<32x32xf32>
    %329 = vector.extract_strided_slice %269 {offsets = [3, 0], sizes = [1, 32], strides = [1, 1]} : vector<4x32xf32> to vector<1x32xf32>
    %330 = vector.broadcast %329 : vector<1x32xf32> to vector<32x32xf32>
    %331 = arith.addf %328, %330 : vector<32x32xf32>
    %c0_143 = arith.constant 0 : index
    %c0_144 = arith.constant 0 : index
    %332 = vector.load %arg10[%c0_143, %c0_144] : memref<4x32xf32, #tpu.memory_space<vmem>>, vector<4x32xf32>
    %cst_145 = arith.constant dense<0.000000e+00> : vector<4x32xf32>
    %333 = tpu.matmul %332, %331, %cst_145 {dimension_numbers = #tpu.dot_dimension_numbers<[1], [0], [0], [1], [0, 0, 1, 1], [], []>} : vector<4x32xf32>, vector<32x32xf32>, vector<4x32xf32> -> vector<4x32xf32>
    %c0_146 = arith.constant 0 : index
    %c0_147 = arith.constant 0 : index
    %334 = vector.load %arg29[%c0_146, %c0_147] : memref<32x1xf32, #tpu.memory_space<vmem>>, vector<32x1xf32>
    %cst_148 = arith.constant dense<0.000000e+00> : vector<4x1xf32>
    %335 = tpu.matmul %333, %334, %cst_148 {dimension_numbers = #tpu.dot_dimension_numbers<[1], [0], [0], [1], [0, 0, 1, 1], [], []>} : vector<4x32xf32>, vector<32x1xf32>, vector<4x1xf32> -> vector<4x1xf32>
    %c0_149 = arith.constant 0 : index
    %c0_150 = arith.constant 0 : index
    %336 = vector.load %arg30[%c0_149, %c0_150] : memref<1x1xf32, #tpu.memory_space<vmem>>, vector<1x1xf32>
    %337 = vector.broadcast %336 : vector<1x1xf32> to vector<4x1xf32>
    %338 = arith.addf %335, %337 : vector<4x1xf32>
    %c0_151 = arith.constant 0 : index
    %c0_152 = arith.constant 0 : index
    %339 = vector.load %arg31[%c0_151, %c0_152] : memref<4x1xf32, #tpu.memory_space<vmem>>, vector<4x1xf32>
    tpu.vector_store %arg31[%c0_151, %c0_152], %338 {strides = array<i32>} : memref<4x1xf32, #tpu.memory_space<vmem>>, vector<4x1xf32>,
    return
  }
}

</mosaic_0001>

<bundles_post_ra>
// kernel: gat_transformer_forward.1
= control target key start
LH: loop header
LB: loop body
LE: loop exit
PB: predicated region body
PF: predicated region fallthrough
CT: control target
= control target key end

     0   :  { %s5855_s6 = smov 1   ;;  %s5856_s10 = smov 2   ;;  %s6850_s0 = inlined_call_operand.smem [shape: u32[32], index: -1, kind: input, shape index: {}] }
   0x1   :  { %s5937_s5 = sld [smem:[%s6850_s0]]   ;;  %s5857_s14 = smov 3  }
   0x2   :  { %s5942_s9 = sld [smem:[%s6850_s0 + %s5855_s6]]   ;;  %s5858_s18 = smov 4  }
   0x3   :  { %s5947_s13 = sld [smem:[%s6850_s0 + %s5856_s10]]   ;;  %s5859_s22 = smov 5  }
   0x4   :  { %s5952_s17 = sld [smem:[%s6850_s0 + %s5857_s14]]   ;;  %s5860_s26 = smov 6  }
   0x5   :  { %s5957_s21 = sld [smem:[%s6850_s0 + %s5858_s18]]   ;;  %s5861_s30 = smov 7  }
   0x6   :  { %s5962_s25 = sld [smem:[%s6850_s0 + %s5859_s22]]   ;;  %s5862_s4 = smov 8  }
   0x7   :  { %6861 = sst [smem:[#allocation38_spill]] %s5937_s5  ;;  %s5863_s10 = smov 9  }
   0x8   :  { %6862 = sst [smem:[#allocation39_spill]] %s5942_s9  ;;  %s5864_s15 = smov 10  }
   0x9   :  { %6863 = sst [smem:[#allocation40_spill]] %s5947_s13  ;;  %s5865_s20 = smov 11  }
   0xa   :  { %6864 = sst [smem:[#allocation41_spill]] %s5952_s17  ;;  %s5867_s1 = smov 13  }
   0xb   :  { %s5967_s29 = sld [smem:[%s6850_s0 + %s5860_s26]]   ;;  %s5866_s26 = smov 12  }
   0xc   :  { %s5972_s3 = sld [smem:[%s6850_s0 + %s5861_s30]]   ;;  %s5868_s7 = smov 14  }
   0xd   :  { %s5977_s8 = sld [smem:[%s6850_s0 + %s5862_s4]]   ;;  %s5870_s22 = smov 16  }
   0xe   :  { %s5982_s14 = sld [smem:[%s6850_s0 + %s5863_s10]]   ;;  %s5871_s28 = smov 17  }
   0xf   :  { %s5987_s19 = sld [smem:[%s6850_s0 + %s5864_s15]]   ;;  %s5869_s15 = smov 15  }
  0x10   :  { %s5992_s24 = sld [smem:[%s6850_s0 + %s5865_s20]]   ;;  %s5885_s16 = smov 31  }
  0x11   :  { %6865 = sst [smem:[#allocation42_spill]] %s5967_s29 }
  0x12   :  { %s5997_s30 = sld [smem:[%s6850_s0 + %s5866_s26]]  }
  0x13   :  { %s6002_s6 = sld [smem:[%s6850_s0 + %s5867_s1]]  }
  0x14   :  { %s6007_s12 = sld [smem:[%s6850_s0 + %s5868_s7]]   ;;  %s5872_s7 = smov 18  }
  0x15   :  { %s6012_s20 = sld [smem:[%s6850_s0 + %s5869_s15]]   ;;  %s5873_s15 = smov 19  }
  0x16   :  { %s6017_s27 = sld [smem:[%s6850_s0 + %s5870_s22]]   ;;  %s5874_s22 = smov 20  }
  0x17   :  { %s6022_s4 = sld [smem:[%s6850_s0 + %s5871_s28]]   ;;  %s5875_s28 = smov 21  }
  0x18   :  { %s6027_s13 = sld [smem:[%s6850_s0 + %s5872_s7]]   ;;  %s5876_s7 = smov 22  }
  0x19   :  { %s6032_s17 = sld [smem:[%s6850_s0 + %s5873_s15]]   ;;  %s5877_s15 = smov 23  }
  0x1a   :  { %s6037_s29 = sld [smem:[%s6850_s0 + %s5874_s22]]   ;;  %s5878_s22 = smov 24  }
  0x1b   :  { %s6042_s5 = sld [smem:[%s6850_s0 + %s5875_s28]]   ;;  %s5879_s28 = smov 25  }
  0x1c   :  { %s6047_s9 = sld [smem:[%s6850_s0 + %s5876_s7]]   ;;  %s5880_s7 = smov 26  }
  0x1d   :  { %6866 = sst [smem:[#allocation43_spill]] %s6022_s4 }
  0x1e   :  { %s6057_s4 = sld [smem:[%s6850_s0 + %s5878_s22]]   ;;  %s5882_s22 = smov 28  }
  0x1f   :  { %6867 = sst [smem:[#allocation44_spill]] %s6032_s17 }
  0x20   :  { %s6052_s17 = sld [smem:[%s6850_s0 + %s5877_s15]]   ;;  %s5881_s15 = smov 27  }
  0x21   :  { %6868 = sst [smem:[#allocation45_spill]] %s6042_s5 }
  0x22   :  { %6869 = sst [smem:[#allocation46_spill]] %s6047_s9 }
  0x23   :  { %s6062_s5 = sld [smem:[%s6850_s0 + %s5879_s28]]   ;;  %s5883_s28 = smov 29  }
  0x24   :  { %6871 = sst [smem:[#allocation48_spill]] %s6057_s4 }
  0x25   :  { %s6067_s9 = sld [smem:[%s6850_s0 + %s5880_s7]]   ;;  %s5884_s7 = smov 30  }
  0x26   :  { %6870 = sst [smem:[#allocation47_spill]] %s6052_s17 }
  0x27   :  { %s6072_s17 = sld [smem:[%s6850_s0 + %s5881_s15]]  }
  0x28   :  { %s6077_s4 = sld [smem:[%s6850_s0 + %s5882_s22]]  }
  0x29   :  { %6872 = sst [smem:[#allocation49_spill]] %s6062_s5 }
  0x2a   :  { %s6082_s5 = sld [smem:[%s6850_s0 + %s5883_s28]]  }
  0x2b   :  { %6873 = sst [smem:[#allocation50_spill]] %s6067_s9 }
  0x2c   :  { %s4236_s9 = sld [smem:[%s6850_s0 + %s5884_s7]]  }
  0x2d   :  { %6874 = sst [smem:[#allocation51_spill]] %s6072_s17 }
  0x2e   :  { %s6090_s17 = sld [smem:[%s6850_s0 + %s5885_s16]]  }
  0x32   :  { %v68_v0 = vstv %s4236_s9 }
  0x33   :  { %69 = vst [vmem:[#allocation2] sm:$0x1] %v68_v0 }
  0x34   :  { %70 = vsyncpa [#allocation4], 0 }
  0x35   :  { %71 = vsyncpa [#allocation6], 0 }
  0x36   :  { %72 = vsyncpa [#allocation9], 0 }
  0x37   :  { %73 = vsyncpa [#allocation12], 0 }
  0x38   :  { %74 = vsyncpa [#allocation15], 0 }
  0x39   :  { %75 = vsyncpa [#allocation18], 0 }
  0x3a   :  { %76 = vsyncpa [#allocation21], 0 }
  0x3b   :  { %77 = vsyncpa [#allocation24], 0 }
  0x3c   :  { %78 = vsyncpa [#allocation27], 0  ;;  %s5886_s22 = smov [#allocation5]   ;;  %s5887_s26 = smov [#allocation8]  }
  0x3d   :  { %s104_s23 = sshll.u32 %s5886_s22, 4  ;;  %s130_s28 = sshll.u32 %s5887_s26, 4  ;;  %s105_s23 = int_to_ptr.vmem [resolvable:$true] %s104_s23  ;;  %s6092_s28 = int_to_ptr.vmem [resolvable:$true] %s130_s28 }
  0x3e   :  { %s5463_s0 = scalar_lea.hbm %s5962_s25, 256 }
  0x3f   :  { %p5464_p0 = scmp.ne.s32.totalorder %s5962_s25, %s5463_s0  ;;  %p5467_p1 = scmp.lt.u32.totalorder %s5463_s0, %s5962_s25 }
  0x41   :  { %p5469_p2 = pnand %p5467_p1, %p5464_p0 }
  0x43   :  { %5472 = shalt.err (!%p5469_p2)
}
  0x44   :  { %s5473_s9 = scalar_lea.vmem %s105_s23, 256  ;;  %p5478_p4 = scmp.lt.s32.totalorder %s105_s23, %s105_s23 }
  0x45   :  { %p5474_p3 = scmp.ne.s32.totalorder %s105_s23, %s5473_s9  ;;  %p5479_p5 = scmp.lt.s32.totalorder %s5473_s9, %s5473_s9 }
  0x47   :  { %p5480_p6 = por %p5479_p5, %p5478_p4 }
  0x49   :  { %p5481_p7 = pnand %p5480_p6, %p5474_p3 }
  0x4b   :  { %5484 = shalt.err (!%p5481_p7)
}
  0x4c   :  { %s5888_s1 = smov 128   ;;  %s5889_s2 = smov 8  }
  0x4d   :  { %110 = dma.hbm_to_vmem [thread:$0]  %s5962_s25, 256, %s105_s23, [#allocation6], %s5888_s1, %s5888_s1, %s5889_s2  }
  0x4e   :  { %s5485_s7 = scalar_lea.hbm %s5977_s8, 512 }
  0x4f   :  { %p5486_p8 = scmp.ne.s32.totalorder %s5977_s8, %s5485_s7  ;;  %p5489_p9 = scmp.lt.u32.totalorder %s5485_s7, %s5977_s8 }
  0x51   :  { %p5491_p10 = pnand %p5489_p9, %p5486_p8 }
  0x53   :  { %5494 = shalt.err (!%p5491_p10)
}
  0x54   :  { %s5495_s10 = scalar_lea.vmem %s6092_s28, 512  ;;  %p5500_p12 = scmp.lt.s32.totalorder %s6092_s28, %s6092_s28 }
  0x55   :  { %p5496_p11 = scmp.ne.s32.totalorder %s6092_s28, %s5495_s10  ;;  %p5501_p13 = scmp.lt.s32.totalorder %s5495_s10, %s5495_s10 }
  0x57   :  { %p5502_p0 = por %p5501_p13, %p5500_p12 }
  0x59   :  { %p5503_p1 = pnand %p5502_p0, %p5496_p11 }
  0x5b   :  { %5506 = shalt.err (!%p5503_p1)
}
  0x5c   :  { %136 = dma.hbm_to_vmem [thread:$0]  %s5977_s8, 512, %s6092_s28, [#allocation9], %s5888_s1, %s5888_s1, %s5889_s2  }
  0x5d   :  { %s5890_s25 = smov [#allocation11]   ;;  %s5891_s16 = smov [#allocation14]  }
  0x5e   :  { %s155_s11 = sshll.u32 %s5890_s25, 4  ;;  %s175_s15 = sshll.u32 %s5891_s16, 4  ;;  %s156_s11 = int_to_ptr.vmem [resolvable:$true] %s155_s11  ;;  %s176_s15 = int_to_ptr.vmem [resolvable:$true] %s175_s15 }
  0x5f   :  { %s5507_s18 = scalar_lea.hbm %s5987_s19, 64 }
  0x60   :  { %p5508_p2 = scmp.ne.s32.totalorder %s5987_s19, %s5507_s18  ;;  %p5511_p3 = scmp.lt.u32.totalorder %s5507_s18, %s5987_s19 }
  0x62   :  { %p5513_p4 = pnand %p5511_p3, %p5508_p2 }
  0x64   :  { %5516 = shalt.err (!%p5513_p4)
}
  0x65   :  { %s5517_s22 = scalar_lea.vmem %s156_s11, 64  ;;  %p5522_p6 = scmp.lt.s32.totalorder %s156_s11, %s156_s11 }
  0x66   :  { %p5518_p5 = scmp.ne.s32.totalorder %s156_s11, %s5517_s22  ;;  %p5523_p7 = scmp.lt.s32.totalorder %s5517_s22, %s5517_s22 }
  0x68   :  { %p5524_p8 = por %p5523_p7, %p5522_p6 }
  0x6a   :  { %p5525_p9 = pnand %p5524_p8, %p5518_p5 }
  0x6c   :  { %5528 = shalt.err (!%p5525_p9)
}
  0x6d   :  { %158 = dma.hbm_to_vmem [thread:$0]  %s5987_s19, 64, %s156_s11, [#allocation12]  }
  0x6e   :  { %s5529_s8 = scalar_lea.hbm %s5997_s30, 16 }
  0x6f   :  { %p5530_p10 = scmp.ne.s32.totalorder %s5997_s30, %s5529_s8  ;;  %p5533_p11 = scmp.lt.u32.totalorder %s5529_s8, %s5997_s30 }
  0x71   :  { %p5535_p12 = pnand %p5533_p11, %p5530_p10 }
  0x73   :  { %5538 = shalt.err (!%p5535_p12)
}
  0x74   :  { %s5539_s23 = scalar_lea.vmem %s176_s15, 16  ;;  %s5543_s26 = scalar_lea.vmem %s176_s15, 32 }
  0x75   :  { %p5540_p13 = scmp.ne.s32.totalorder %s176_s15, %s5539_s23  ;;  %p5544_p0 = scmp.lt.s32.totalorder %s176_s15, %s176_s15 }
  0x76   :  { %p5545_p1 = scmp.lt.s32.totalorder %s5543_s26, %s5539_s23 }
  0x78   :  { %p5546_p2 = por %p5545_p1, %p5544_p0 }
  0x7a   :  { %p5547_p3 = pnand %p5546_p2, %p5540_p13 }
  0x7c   :  { %5550 = shalt.err (!%p5547_p3)
}
  0x7d   :  { %178 = dma.hbm_to_vmem [thread:$0]  %s5997_s30, 16, %s176_s15, [#allocation15]  }
  0x7e   :  { %s5892_s28 = smov [#allocation17]   ;;  %s5893_s0 = smov [#allocation20]  }
  0x7f   :  { %s195_s19 = sshll.u32 %s5892_s28, 4  ;;  %s215_s9 = sshll.u32 %s5893_s0, 4  ;;  %s196_s19 = int_to_ptr.vmem [resolvable:$true] %s195_s19  ;;  %s216_s9 = int_to_ptr.vmem [resolvable:$true] %s215_s9 }
  0x80   :  { %s5551_s7 = scalar_lea.hbm %s6007_s12, 128 }
  0x81   :  { %p5552_p4 = scmp.ne.s32.totalorder %s6007_s12, %s5551_s7  ;;  %p5555_p5 = scmp.lt.u32.totalorder %s5551_s7, %s6007_s12 }
  0x83   :  { %p5557_p6 = pnand %p5555_p5, %p5552_p4 }
  0x85   :  { %5560 = shalt.err (!%p5557_p6)
}
  0x86   :  { %s5561_s10 = scalar_lea.vmem %s196_s19, 128  ;;  %p5566_p8 = scmp.lt.s32.totalorder %s196_s19, %s196_s19 }
  0x87   :  { %p5562_p7 = scmp.ne.s32.totalorder %s196_s19, %s5561_s10  ;;  %p5567_p9 = scmp.lt.s32.totalorder %s5561_s10, %s5561_s10 }
  0x89   :  { %p5568_p10 = por %p5567_p9, %p5566_p8 }
  0x8b   :  { %p5569_p11 = pnand %p5568_p10, %p5562_p7 }
  0x8d   :  { %5572 = shalt.err (!%p5569_p11)
}
  0x8e   :  { %198 = dma.hbm_to_vmem [thread:$0]  %s6007_s12, 128, %s196_s19, [#allocation18]  }
  0x8f   :  { %s5573_s30 = scalar_lea.hbm %s6017_s27, 16 }
  0x90   :  { %p5574_p12 = scmp.ne.s32.totalorder %s6017_s27, %s5573_s30  ;;  %p5577_p13 = scmp.lt.u32.totalorder %s5573_s30, %s6017_s27 }
  0x92   :  { %p5579_p0 = pnand %p5577_p13, %p5574_p12 }
  0x94   :  { %5582 = shalt.err (!%p5579_p0)
}
  0x95   :  { %s5583_s25 = scalar_lea.vmem %s216_s9, 16  ;;  %s5587_s11 = scalar_lea.vmem %s216_s9, 32 }
  0x96   :  { %p5584_p1 = scmp.ne.s32.totalorder %s216_s9, %s5583_s25  ;;  %p5588_p2 = scmp.lt.s32.totalorder %s216_s9, %s216_s9 }
  0x97   :  { %p5589_p3 = scmp.lt.s32.totalorder %s5587_s11, %s5583_s25 }
  0x99   :  { %p5590_p4 = por %p5589_p3, %p5588_p2 }
  0x9b   :  { %p5591_p5 = pnand %p5590_p4, %p5584_p1 }
  0x9d   :  { %5594 = shalt.err (!%p5591_p5)
}
  0x9e   :  { %218 = dma.hbm_to_vmem [thread:$0]  %s6017_s27, 16, %s216_s9, [#allocation21]  }
  0x9f   :  { %s5894_s16 = smov [#allocation23]   ;;  %s5895_s15 = smov [#allocation26]  }
  0xa0   :  { %s237_s12 = sshll.u32 %s5894_s16, 4  ;;  %s258_s18 = sshll.u32 %s5895_s15, 4  ;;  %s238_s12 = int_to_ptr.vmem [resolvable:$true] %s237_s12  ;;  %s6129_s18 = int_to_ptr.vmem [resolvable:$true] %s258_s18 }
  0xa1   :  { %s5595_s22 = scalar_lea.hbm %s6027_s13, 128 }
  0xa2   :  { %p5596_p6 = scmp.ne.s32.totalorder %s6027_s13, %s5595_s22  ;;  %p5599_p7 = scmp.lt.u32.totalorder %s5595_s22, %s6027_s13 }
  0xa4   :  { %p5601_p8 = pnand %p5599_p7, %p5596_p6 }
  0xa6   :  { %5604 = shalt.err (!%p5601_p8)
}
  0xa7   :  { %s5605_s8 = scalar_lea.vmem %s238_s12, 128  ;;  %p5610_p10 = scmp.lt.s32.totalorder %s238_s12, %s238_s12 }
  0xa8   :  { %p5606_p9 = scmp.ne.s32.totalorder %s238_s12, %s5605_s8  ;;  %p5611_p11 = scmp.lt.s32.totalorder %s5605_s8, %s5605_s8 }
  0xaa   :  { %p5612_p12 = por %p5611_p11, %p5610_p10 }
  0xac   :  { %p5613_p13 = pnand %p5612_p12, %p5606_p9 }
  0xae   :  { %5616 = shalt.err (!%p5613_p13)
}
  0xaf   :  { %240 = dma.hbm_to_vmem [thread:$0]  %s6027_s13, 128, %s238_s12, [#allocation24]  }
  0xb0   :  { %s5617_s27 = scalar_lea.hbm %s6037_s29, 512 }
  0xb1   :  { %p5618_p0 = scmp.ne.s32.totalorder %s6037_s29, %s5617_s27  ;;  %p5621_p1 = scmp.lt.u32.totalorder %s5617_s27, %s6037_s29 }
  0xb3   :  { %p5623_p2 = pnand %p5621_p1, %p5618_p0 }
  0xb5   :  { %5626 = shalt.err (!%p5623_p2)
}
  0xb6   :  { %s5627_s23 = scalar_lea.vmem %s6129_s18, 512  ;;  %p5632_p4 = scmp.lt.s32.totalorder %s6129_s18, %s6129_s18 }
  0xb7   :  { %p5628_p3 = scmp.ne.s32.totalorder %s6129_s18, %s5627_s23  ;;  %p5633_p5 = scmp.lt.s32.totalorder %s5627_s23, %s5627_s23 }
  0xb9   :  { %p5634_p6 = por %p5633_p5, %p5632_p4 }
  0xbb   :  { %p5635_p7 = pnand %p5634_p6, %p5628_p3 }
  0xbd   :  { %5638 = shalt.err (!%p5635_p7)
}
  0xbe   :  { %264 = dma.hbm_to_vmem [thread:$0]  %s6037_s29, 512, %s6129_s18, [#allocation27], %s5888_s1, %s5888_s1, %s5889_s2  }
  0xbf   :  { %s5896_s13 = smov [#allocation3]   ;;  %s5897_s28 = smov [#allocation7]  }
  0xc0   :  { %s92_s26 = sshll.u32 %s5896_s13, 4  ;;  %s118_s19 = sshll.u32 %s5897_s28, 4  ;;  %s93_s26 = int_to_ptr.vmem [resolvable:$true] %s92_s26  ;;  %s6147_s19 = int_to_ptr.vmem [resolvable:$true] %s118_s19 }
  0xc1   :  { %s5639_s0 = scalar_lea.hbm %s5957_s21, 640 }
  0xc2   :  { %p5640_p8 = scmp.ne.s32.totalorder %s5957_s21, %s5639_s0  ;;  %p5643_p9 = scmp.lt.u32.totalorder %s5639_s0, %s5957_s21 }
  0xc4   :  { %p5645_p10 = pnand %p5643_p9, %p5640_p8 }
  0xc6   :  { %5648 = shalt.err (!%p5645_p10)
}
  0xc7   :  { %s5649_s9 = scalar_lea.vmem %s93_s26, 640  ;;  %p5654_p12 = scmp.lt.s32.totalorder %s93_s26, %s93_s26 }
  0xc8   :  { %p5650_p11 = scmp.ne.s32.totalorder %s93_s26, %s5649_s9  ;;  %p5655_p13 = scmp.lt.s32.totalorder %s5649_s9, %s5649_s9 }
  0xca   :  { %p5656_p0 = por %p5655_p13, %p5654_p12 }
  0xcc   :  { %p5657_p1 = pnand %p5656_p0, %p5650_p11 }
  0xce   :  { %5660 = shalt.err (!%p5657_p1)
}
  0xcf   :  { %98 = dma.hbm_to_vmem [thread:$0]  %s5957_s21, 640, %s93_s26, [#allocation4], %s5888_s1, %s5888_s1, %s5889_s2  }
  0xd0   :  { %s5661_s29 = scalar_lea.hbm %s5972_s3, 256 }
  0xd1   :  { %p5662_p2 = scmp.ne.s32.totalorder %s5972_s3, %s5661_s29  ;;  %p5665_p3 = scmp.lt.u32.totalorder %s5661_s29, %s5972_s3 }
  0xd3   :  { %p5667_p4 = pnand %p5665_p3, %p5662_p2 }
  0xd5   :  { %5670 = shalt.err (!%p5667_p4)
}
  0xd6   :  { %s5671_s7 = scalar_lea.vmem %s6147_s19, 256  ;;  %p5676_p6 = scmp.lt.s32.totalorder %s6147_s19, %s6147_s19 }
  0xd7   :  { %p5672_p5 = scmp.ne.s32.totalorder %s6147_s19, %s5671_s7  ;;  %p5677_p7 = scmp.lt.s32.totalorder %s5671_s7, %s5671_s7 }
  0xd9   :  { %p5678_p8 = por %p5677_p7, %p5676_p6 }
  0xdb   :  { %p5679_p9 = pnand %p5678_p8, %p5672_p5 }
  0xdd   :  { %5682 = shalt.err (!%p5679_p9)
}
  0xde   :  { %124 = dma.hbm_to_vmem [thread:$0]  %s5972_s3, 256, %s6147_s19, [#allocation6], %s5888_s1, %s5888_s1, %s5889_s2  }
  0xdf   :  { %s5898_s21 = smov [#allocation10]   ;;  %s5899_s30 = smov [#allocation13]  }
  0xe0   :  { %s142_s10 = sshll.u32 %s5898_s21, 4  ;;  %s165_s25 = sshll.u32 %s5899_s30, 4  ;;  %s143_s10 = int_to_ptr.vmem [resolvable:$true] %s142_s10  ;;  %s166_s25 = int_to_ptr.vmem [resolvable:$true] %s165_s25 }
  0xe1   :  { %s5683_s11 = scalar_lea.hbm %s5982_s14, 512 }
  0xe2   :  { %p5684_p10 = scmp.ne.s32.totalorder %s5982_s14, %s5683_s11  ;;  %p5687_p11 = scmp.lt.u32.totalorder %s5683_s11, %s5982_s14 }
  0xe4   :  { %p5689_p12 = pnand %p5687_p11, %p5684_p10 }
  0xe6   :  { %5692 = shalt.err (!%p5689_p12)
}
  0xe7   :  { %s5693_s16 = scalar_lea.vmem %s143_s10, 512  ;;  %p5698_p0 = scmp.lt.s32.totalorder %s143_s10, %s143_s10 }
  0xe8   :  { %p5694_p13 = scmp.ne.s32.totalorder %s143_s10, %s5693_s16  ;;  %p5699_p1 = scmp.lt.s32.totalorder %s5693_s16, %s5693_s16 }
  0xea   :  { %p5700_p2 = por %p5699_p1, %p5698_p0 }
  0xec   :  { %p5701_p3 = pnand %p5700_p2, %p5694_p13 }
  0xee   :  { %5704 = shalt.err (!%p5701_p3)
}
  0xef   :  { %148 = dma.hbm_to_vmem [thread:$0]  %s5982_s14, 512, %s143_s10, [#allocation9], %s5888_s1, %s5888_s1, %s5889_s2  }
  0xf0   :  { %s5705_s3 = scalar_lea.hbm %s5992_s24, 64 }
  0xf1   :  { %p5706_p4 = scmp.ne.s32.totalorder %s5992_s24, %s5705_s3  ;;  %p5709_p5 = scmp.lt.u32.totalorder %s5705_s3, %s5992_s24 }
  0xf3   :  { %p5711_p6 = pnand %p5709_p5, %p5706_p4 }
  0xf5   :  { %5714 = shalt.err (!%p5711_p6)
}
  0xf6   :  { %s5715_s12 = scalar_lea.vmem %s166_s25, 64  ;;  %p5720_p8 = scmp.lt.s32.totalorder %s166_s25, %s166_s25 }
  0xf7   :  { %p5716_p7 = scmp.ne.s32.totalorder %s166_s25, %s5715_s12  ;;  %p5721_p9 = scmp.lt.s32.totalorder %s5715_s12, %s5715_s12 }
  0xf9   :  { %p5722_p10 = por %p5721_p9, %p5720_p8 }
  0xfb   :  { %p5723_p11 = pnand %p5722_p10, %p5716_p7 }
  0xfd   :  { %5726 = shalt.err (!%p5723_p11)
}
  0xfe   :  { %168 = dma.hbm_to_vmem [thread:$0]  %s5992_s24, 64, %s166_s25, [#allocation12]  }
  0xff   :  { %s5900_s15 = smov [#allocation16]   ;;  %s5901_s14 = smov [#allocation19]  }
 0x100   :  { %s185_s18 = sshll.u32 %s5900_s15, 4  ;;  %s205_s22 = sshll.u32 %s5901_s14, 4  ;;  %s186_s18 = int_to_ptr.vmem [resolvable:$true] %s185_s18  ;;  %s206_s22 = int_to_ptr.vmem [resolvable:$true] %s205_s22 }
 0x101   :  { %s5727_s8 = scalar_lea.hbm %s6002_s6, 128 }
 0x102   :  { %p5728_p12 = scmp.ne.s32.totalorder %s6002_s6, %s5727_s8  ;;  %p5731_p13 = scmp.lt.u32.totalorder %s5727_s8, %s6002_s6 }
 0x104   :  { %p5733_p0 = pnand %p5731_p13, %p5728_p12 }
 0x106   :  { %5736 = shalt.err (!%p5733_p0)
}
 0x107   :  { %s5737_s27 = scalar_lea.vmem %s186_s18, 128  ;;  %p5742_p2 = scmp.lt.s32.totalorder %s186_s18, %s186_s18 }
 0x108   :  { %p5738_p1 = scmp.ne.s32.totalorder %s186_s18, %s5737_s27  ;;  %p5743_p3 = scmp.lt.s32.totalorder %s5737_s27, %s5737_s27 }
 0x10a   :  { %p5744_p4 = por %p5743_p3, %p5742_p2 }
 0x10c   :  { %p5745_p5 = pnand %p5744_p4, %p5738_p1 }
 0x10e   :  { %5748 = shalt.err (!%p5745_p5)
}
 0x10f   :  { %188 = dma.hbm_to_vmem [thread:$0]  %s6002_s6, 128, %s186_s18, [#allocation15]  }
 0x110   :  { %s5749_s24 = scalar_lea.hbm %s6012_s20, 128 }
 0x111   :  { %p5750_p6 = scmp.ne.s32.totalorder %s6012_s20, %s5749_s24  ;;  %p5753_p7 = scmp.lt.u32.totalorder %s5749_s24, %s6012_s20 }
 0x113   :  { %p5755_p8 = pnand %p5753_p7, %p5750_p6 }
 0x115   :  { %5758 = shalt.err (!%p5755_p8)
}
 0x116   :  { %s5759_s23 = scalar_lea.vmem %s206_s22, 128  ;;  %p5764_p10 = scmp.lt.s32.totalorder %s206_s22, %s206_s22 }
 0x117   :  { %p5760_p9 = scmp.ne.s32.totalorder %s206_s22, %s5759_s23  ;;  %p5765_p11 = scmp.lt.s32.totalorder %s5759_s23, %s5759_s23 }
 0x119   :  { %p5766_p12 = por %p5765_p11, %p5764_p10 }
 0x11b   :  { %p5767_p13 = pnand %p5766_p12, %p5760_p9 }
 0x11d   :  { %5770 = shalt.err (!%p5767_p13)
}
 0x11e   :  { %s6875_s13 = sld [smem:[#allocation43_spill]]  ;;  %s5902_s26 = smov [#allocation22]  }
 0x11f   :  { %208 = dma.hbm_to_vmem [thread:$0]  %s6012_s20, 128, %s206_s22, [#allocation18]  }
 0x120   :  { %s224_s28 = sshll.u32 %s5902_s26, 4  ;;  %s5903_s6 = smov [#allocation25]   ;;  %s225_s28 = int_to_ptr.vmem [resolvable:$true] %s224_s28 }
 0x121   :  { %s246_s19 = sshll.u32 %s5903_s6, 4  ;;  %s6187_s19 = int_to_ptr.vmem [resolvable:$true] %s246_s19 }
 0x124   :  { %s5771_s0 = scalar_lea.hbm %s6875_s13, 256 }
 0x125   :  { %p5772_p0 = scmp.ne.s32.totalorder %s6875_s13, %s5771_s0  ;;  %p5775_p1 = scmp.lt.u32.totalorder %s5771_s0, %s6875_s13 }
 0x127   :  { %p5777_p2 = pnand %p5775_p1, %p5772_p0 }
 0x129   :  { %5780 = shalt.err (!%p5777_p2)
}
 0x12a   :  { %s5781_s9 = scalar_lea.vmem %s225_s28, 256  ;;  %p5786_p4 = scmp.lt.s32.totalorder %s225_s28, %s225_s28 }
 0x12b   :  { %p5782_p3 = scmp.ne.s32.totalorder %s225_s28, %s5781_s9  ;;  %p5787_p5 = scmp.lt.s32.totalorder %s5781_s9, %s5781_s9 }
 0x12d   :  { %p5788_p6 = por %p5787_p5, %p5786_p4 }
 0x12f   :  { %p5789_p7 = pnand %p5788_p6, %p5782_p3 }
 0x131   :  { %5792 = shalt.err (!%p5789_p7)
}
 0x132   :  { %s6876_s20 = sld [smem:[#allocation44_spill]] }
 0x133   :  { %230 = dma.hbm_to_vmem [thread:$0]  %s6875_s13, 256, %s225_s28, [#allocation21], %s5888_s1, %s5888_s1, %s5889_s2  }
 0x138   :  { %s5793_s29 = scalar_lea.hbm %s6876_s20, 512 }
 0x139   :  { %p5794_p8 = scmp.ne.s32.totalorder %s6876_s20, %s5793_s29  ;;  %p5797_p9 = scmp.lt.u32.totalorder %s5793_s29, %s6876_s20 }
 0x13b   :  { %p5799_p10 = pnand %p5797_p9, %p5794_p8 }
 0x13d   :  { %5802 = shalt.err (!%p5799_p10)
}
 0x13e   :  { %s5803_s7 = scalar_lea.vmem %s6187_s19, 512  ;;  %p5808_p12 = scmp.lt.s32.totalorder %s6187_s19, %s6187_s19 }
 0x13f   :  { %p5804_p11 = scmp.ne.s32.totalorder %s6187_s19, %s5803_s7  ;;  %p5809_p13 = scmp.lt.s32.totalorder %s5803_s7, %s5803_s7 }
 0x141   :  { %p5810_p0 = por %p5809_p13, %p5808_p12 }
 0x143   :  { %p5811_p1 = pnand %p5810_p0, %p5804_p11 }
 0x145   :  { %5814 = shalt.err (!%p5811_p1)
}
 0x146   :  { %s6877_s21 = sld [smem:[#allocation45_spill]]  ;;  %s5904_s10 = smov [#allocation28]  }
 0x147   :  { %252 = dma.hbm_to_vmem [thread:$0]  %s6876_s20, 512, %s6187_s19, [#allocation24], %s5888_s1, %s5888_s1, %s5889_s2  }
 0x148   :  { %s271_s30 = sshll.u32 %s5904_s10, 4  ;;  %s272_s30 = int_to_ptr.vmem [resolvable:$true] %s271_s30 }
 0x14c   :  { %s5815_s25 = scalar_lea.hbm %s6877_s21, 16 }
 0x14d   :  { %p5816_p2 = scmp.ne.s32.totalorder %s6877_s21, %s5815_s25  ;;  %p5819_p3 = scmp.lt.u32.totalorder %s5815_s25, %s6877_s21 }
 0x14f   :  { %p5821_p4 = pnand %p5819_p3, %p5816_p2 }
 0x151   :  { %5824 = shalt.err (!%p5821_p4)
}
 0x152   :  { %s5825_s11 = scalar_lea.vmem %s272_s30, 16  ;;  %s5829_s16 = scalar_lea.vmem %s272_s30, 32 }
 0x153   :  { %p5826_p5 = scmp.ne.s32.totalorder %s272_s30, %s5825_s11  ;;  %p5830_p6 = scmp.lt.s32.totalorder %s272_s30, %s272_s30 }
 0x154   :  { %p5831_p7 = scmp.lt.s32.totalorder %s5829_s16, %s5825_s11 }
 0x156   :  { %p5832_p8 = por %p5831_p7, %p5830_p6 }
 0x158   :  { %p5833_p9 = pnand %p5832_p8, %p5826_p5 }
 0x15a   :  { %5836 = shalt.err (!%p5833_p9)
}
 0x15b   :  { %274 = dma.hbm_to_vmem [thread:$0]  %s6877_s21, 16, %s272_s30, [#allocation27]  }
 0x15c   :  { %5837 = dma.done.wait [#allocation4], 640  }
 0x15d   :  { %5838 = vsyncadd [#allocation4], 4294966656 }
 0x15e   :  { %5839 = dma.done.wait [#allocation6], 512  }
 0x15f   :  { %5840 = vsyncadd [#allocation6], 4294966784 }
 0x160   :  { %5841 = dma.done.wait [#allocation9], 1024  }
 0x161   :  { %5842 = vsyncadd [#allocation9], 4294966272 }
 0x162   :  { %5843 = dma.done.wait [#allocation12], 128  }
 0x163   :  { %5844 = vsyncadd [#allocation12], 4294967168 }
 0x164   :  { %5845 = dma.done.wait [#allocation15], 144  }
 0x165   :  { %5846 = vsyncadd [#allocation15], 4294967152 }
 0x166   :  { %5847 = dma.done.wait [#allocation18], 256  }
 0x167   :  { %5848 = vsyncadd [#allocation18], 4294967040 }
 0x168   :  { %5849 = dma.done.wait [#allocation21], 272  }
 0x169   :  { %5850 = vsyncadd [#allocation21], 4294967024 }
 0x16a   :  { %5851 = dma.done.wait [#allocation24], 640  }
 0x16b   :  { %5852 = vsyncadd [#allocation24], 4294966656 }
 0x16c   :  { %5853 = dma.done.wait [#allocation27], 528  }
 0x16d   :  { %5854 = vsyncadd [#allocation27], 4294966768  ;;  %s6878_s1 = sld [smem:[#allocation39_spill]]  ;;  %v5905_v1 = vmov 0.0   ;;  %vm5906_vm0 = vmmov 0   ;;  %vm376_vm1 = vcmask 1043456  }
 0x16e   :  { %4564 = vmatprep.subr.mxu0 %v5905_v1  ;;  %4566 = vmatprep.mubr.msk.f32.mxu0 %vm5906_vm0, %v5905_v1  ;;  %s6879_s3 = sld [smem:[#allocation38_spill]]  ;;  %vm366_vm2 = vcmask 31744   ;;  %v358_v2 = vld [vmem:[#allocation13] sm:$0xf]  ;;  %v571_v4 = vld [vmem:[#allocation16] sm:$0xff]  ;;  %v654_v5 = vld [vmem:[#allocation17] sm:$0xff] }
 0x16f   :  { %4581 = vmatprep.mubr.msk.f32.mxu1 %vm5906_vm0, %v5905_v1  ;;  %4565 = vmatpush3.msk.msra.mxu0 %vm376_vm1, %v358_v2  ;;  %vm572_vm3 = vcmask 64512   ;;  %v5907_v10 = vmov 0.0|0.0   ;;  %v4238_v13 = vld [vmem:[#allocation14] ss:$0 sm:$0xff]  ;;  %s6880_s12 = sld [smem:[#allocation42_spill]]  ;;  %v460_v22 = vld [vmem:[#allocation3] sm:$0xff] }
 0x170   :  { %4596 = vmatprep.subr.mxu0 %v571_v4  ;;  %4950 = vmatprep.subr.bf16.mxu1 %v5907_v10  ;;  %vm465_vm4 = vcmask 195584   ;;  %v461_v25 = vld [vmem:[#allocation3 + $0x8] sm:$0xff]  ;;  %v462_v29 = vld [vmem:[#allocation3 + $0x10] sm:$0xff]  ;;  %vm731_vm5 = vcmask 130048   ;;  %v463_v32 = vld [vmem:[#allocation3 + $0x18] sm:$0xff]  ;;  %v5908_v40 = vmov 0  }
 0x171   :  { %v730_v31 = vld [vmem:[#allocation19] sm:$0xff]  ;;  %5234 = vset.pattern.permute.xlu0 %v5908_v40  ;;  %5235 = vset.pattern.permute.xlu1 %v5908_v40  ;;  %v5909_v60 = vmov 1   ;;  %vm973_vm6 = vcmask 326656   ;;  %v5910_v63 = vmov 5   ;;  %v5911_v0 = vmov 4   ;;  %s5913_s15 = smov 120  }
 0x172   :  { %v464_v34 = vld [vmem:[#allocation3 + $0x20] sm:$0xff]  ;;  %v6329_v62 = vld [vmem:[#allocation5] sm:$0xff]  ;;  %s5917_s18 = smov 112   ;;  %s5918_s14 = smov 104  }
 0x173   :  { %v355_v3 = vld [vmem:[%s6878_s1] sm:$0xff]  ;;  %v356_v6 = vld [vmem:[%s6878_s1 + $0x8] sm:$0xff]  ;;  %v357_v7 = vld [vmem:[%s6878_s1 + $0x10] sm:$0xff]  ;;  %s6881_s22 = sld [smem:[#allocation41_spill]]  ;;  %s6882_s8 = sld [smem:[#allocation40_spill]] }
 0x174   :  { %4567 = vmatmul.mubr.msk.f32.vlgmr.msra.gmra.mrb[0].mxu0 %vm366_vm2, %v355_v3  ;;  %v344_v8 = vld [vmem:[%s6879_s3] sm:$0xff]  ;;  %v345_v9 = vld [vmem:[%s6879_s3 + $0x8] sm:$0xff]  ;;  %s5919_s27 = smov 96   ;;  %s5920_s24 = smov 64  }
 0x175   :  { %4569 = vmatprep.mubr.msk.f32.mxu0 %vm5906_vm0, %v5905_v1  ;;  %4597 = vmatpush3.msra.mxu0 %v571_v4  ;;  %v6252_v30 = vld [vmem:[%s6880_s12] sm:$0xff]  ;;  %v6263_v33 = vld [vmem:[%s6880_s12 + $0x8] sm:$0xff]  ;;  %v6273_v35 = vld [vmem:[%s6880_s12 + $0x10] sm:$0xff]  ;;  %s5921_s23 = smov 88   ;;  %s5922_s13 = smov 56  }
 0x176   :  { %4601 = vmatprep.subr.mxu0 %v654_v5  ;;  %v6281_v36 = vld [vmem:[%s6880_s12 + $0x18] sm:$0xff]  ;;  %v6288_v37 = vld [vmem:[%s6880_s12 + $0x20] sm:$0xff]  ;;  %s5923_s26 = smov 80   ;;  %s5924_s28 = smov 48  }
 0x177   :  { %s5925_s6 = smov 72   ;;  %s5926_s19 = smov 40  }
 0x178   :  { %4570 = vmatmul.mubr.msk.f32.gmra.mrb[2].mxu0 %vm366_vm2, %v356_v6  ;;  %s5927_s0 = smov 16   ;;  %s6885_s9 = sld [smem:[#allocation46_spill]] }
 0x179   :  { %4572 = vmatprep.mubr.msk.f32.mxu0 %vm5906_vm0, %v5905_v1  ;;  %s6886_s20 = sld [smem:[#allocation47_spill]]  ;;  %s6887_s29 = sld [smem:[#allocation48_spill]] }
 0x17a   :  { %s6888_s7 = sld [smem:[#allocation50_spill]]  ;;  %s6890_s21 = sld [smem:[#allocation51_spill]] }
 0x17c   :  { %4573 = vmatmul.mubr.msk.f32.gmra.mrb[4].mxu0 %vm366_vm2, %v357_v7 }
 0x17d   :  { %4598 = vmatprep.mubr.msk.f32.mxu0 %vm572_vm3, %v344_v8 }
 0x180   :  { %4599 = vmatmul.mubr.msk.f32.vlgmr.msra.gmra.mrb[6].mxu0 %vm572_vm3, %v345_v9 }
 0x181   :  { %4602 = vmatpush3.msra.mxu0 %v654_v5  ;;  %4603 = vmatprep.mubr.msk.f32.mxu0 %vm572_vm3, %v344_v8 }
 0x182   :  { %4953 = vmatprep.subr.bf16.mxu0 %v5907_v10 }
 0x184   :  { %4604 = vmatmul.mubr.msk.f32.vlgmr.msra.gmra.mrb[8].mxu0 %vm572_vm3, %v345_v9 }
 0x185   :  { %4610 = vmatprep.mubr.msk.f32.mxu0 %vm5906_vm0, %v5905_v1 }
 0x247   :  { %v446_v11 = vpop.f32.mrb[0].mxu0 }
 0x248   :  { %v4568_v12 = vpop.f32.mrb[1].mxu0  ;;  %v447_v15 = vadd.f32 %v4238_v13, %v446_v11 }
 0x24b   :  { %v451_v14 = vpop.f32.mrb[2].mxu0 }
 0x24c   :  { %v452_v16 = vadd.f32 %v4238_v13, %v451_v14  ;;  %v4571_v17 = vpop.f32.mrb[3].mxu0 }
 0x24e   :  { %v4951_v18 = vpack.c.bf16 %v452_v16, %v447_v15  ;;  %v6348_v16 = vld [vmem:[#allocation5 + $0x8] sm:$0xff] }
 0x24f   :  { %v456_v19 = vpop.f32.mrb[4].mxu0 }
 0x250   :  { %v457_v20 = vadd.f32 %v4238_v13, %v456_v19  ;;  %4952 = vmatpush3.bf16.msra.mxu1 %v4951_v18  ;;  %v4574_v21 = vpop.f32.mrb[5].mxu0 }
 0x251   :  { %4579 = vmatprep.subr.mxu1 %v5905_v1 }
 0x253   :  { %v4600_v23 = vpop.f32.mrb[6].mxu0 }
 0x254   :  { %4580 = vmatpush3.msra.mxu1 %v457_v20  ;;  %v645_v24 = vpop.f32.mrb[7].mxu0 }
 0x255   :  { %4582 = vmatmul.mubr.msk.f32.vlgmr.msra.gmra.mrb[0].mxu1 %vm465_vm4, %v460_v22  ;;  %v6294_v38 = vpack.i.bf16 %v4600_v23, %v645_v24  ;;  %v6296_v39 = vpack.c.bf16 %v4600_v23, %v645_v24 }
 0x256   :  { %4584 = vmatprep.mubr.msk.f32.mxu1 %vm5906_vm0, %v5905_v1 }
 0x257   :  { %v6242_v26 = vpop.f32.mrb[8].mxu0 }
 0x258   :  { %v6244_v27 = vpop.f32.mrb[9].mxu0 }
 0x259   :  { %4585 = vmatmul.mubr.msk.f32.gmra.mrb[2].mxu1 %vm465_vm4, %v461_v25  ;;  %v4954_v28 = vpack.c.bf16 %v6242_v26, %v6244_v27 }
 0x25a   :  { %4587 = vmatprep.mubr.msk.f32.mxu1 %vm5906_vm0, %v5905_v1 }
 0x25b   :  { %4955 = vmatpush3.bf16.msra.mxu0 %v4954_v28 }
 0x25c   :  { %4625 = vmatprep.subr.mxu0 %v5905_v1 }
 0x25d   :  { %4588 = vmatmul.mubr.msk.f32.gmra.mrb[4].mxu1 %vm465_vm4, %v462_v29 }
 0x25e   :  { %4590 = vmatprep.mubr.msk.f32.mxu1 %vm5906_vm0, %v5905_v1  ;;  %4611 = vmatmul.mubr.msk.f32.vlgmr.msra.gmra.mrb[10].mxu0 %vm731_vm5, %v6252_v30 }
 0x25f   :  { %4613 = vmatprep.mubr.msk.f32.mxu0 %vm5906_vm0, %v5905_v1  ;;  %4626 = vmatpush3.msra.mxu0 %v730_v31  ;;  %v5912_v31 = vmov 3  }
 0x261   :  { %4591 = vmatmul.mubr.msk.f32.gmra.mrb[6].mxu1 %vm465_vm4, %v463_v32 }
 0x262   :  { %4593 = vmatprep.mubr.msk.f32.mxu1 %vm5906_vm0, %v5905_v1  ;;  %4614 = vmatmul.mubr.msk.f32.gmra.mrb[12].mxu0 %vm731_vm5, %v6263_v33 }
 0x263   :  { %4616 = vmatprep.mubr.msk.f32.mxu0 %vm5906_vm0, %v5905_v1 }
 0x265   :  { %4594 = vmatmul.mubr.msk.f32.gmra.mrb[8].mxu1 %vm465_vm4, %v464_v34 }
 0x266   :  { %4617 = vmatmul.mubr.msk.f32.gmra.mrb[14].mxu0 %vm731_vm5, %v6273_v35  ;;  %4652 = vmatprep.mubr.msk.f32.mxu1 %vm973_vm6, %v6329_v62 }
 0x267   :  { %4619 = vmatprep.mubr.msk.f32.mxu0 %vm5906_vm0, %v5905_v1 }
 0x26a   :  { %4620 = vmatmul.mubr.msk.f32.gmra.mrb[16].mxu0 %vm731_vm5, %v6281_v36 }
 0x26b   :  { %4622 = vmatprep.mubr.msk.f32.mxu0 %vm5906_vm0, %v5905_v1 }
 0x26e   :  { %4623 = vmatmul.mubr.msk.f32.gmra.mrb[18].mxu0 %vm731_vm5, %v6288_v37 }
 0x26f   :  { %4627 = vmatprep.mubr.msk.f32.mxu0 %vm5906_vm0, %v5905_v1 }
 0x328   :  { %v547_v41 = vpop.f32.mrb[0].mxu1 }
 0x329   :  { %v4583_v42 = vpop.f32.mrb[1].mxu1  ;;  %4628 = vmatmul.mubr.msk.f32.vlgmr.msra.gmra.mrb[10].mxu0 %vm572_vm3, %v547_v41 }
 0x32a   :  { %4630 = vmatprep.mubr.msk.f32.mxu0 %vm5906_vm0, %v5905_v1 }
 0x32c   :  { %v552_v43 = vpop.f32.mrb[2].mxu1 }
 0x32d   :  { %v4586_v44 = vpop.f32.mrb[3].mxu1  ;;  %4631 = vmatmul.mubr.msk.f32.gmra.mrb[12].mxu0 %vm572_vm3, %v552_v43 }
 0x32e   :  { %4633 = vmatprep.mubr.msk.f32.mxu0 %vm5906_vm0, %v5905_v1 }
 0x330   :  { %v557_v45 = vpop.f32.mrb[4].mxu1 }
 0x331   :  { %v4589_v46 = vpop.f32.mrb[5].mxu1  ;;  %4634 = vmatmul.mubr.msk.f32.gmra.mrb[14].mxu0 %vm572_vm3, %v557_v45 }
 0x332   :  { %4636 = vmatprep.mubr.msk.f32.mxu0 %vm5906_vm0, %v5905_v1 }
 0x334   :  { %v562_v47 = vpop.f32.mrb[6].mxu1 }
 0x335   :  { %v4592_v48 = vpop.f32.mrb[7].mxu1  ;;  %4637 = vmatmul.mubr.msk.f32.gmra.mrb[16].mxu0 %vm572_vm3, %v562_v47 }
 0x336   :  { %4639 = vmatprep.mubr.msk.f32.mxu0 %vm5906_vm0, %v5905_v1 }
 0x338   :  { %v567_v49 = vpop.f32.mrb[8].mxu1 }
 0x339   :  { %v4595_v50 = vpop.f32.mrb[9].mxu1  ;;  %4640 = vmatmul.mubr.msk.f32.gmra.mrb[18].mxu0 %vm572_vm3, %v567_v49 }
 0x33a   :  { %4705 = vmatprep.mubr.msk.f32.mxu0 %vm973_vm6, %v6329_v62 }
 0x3fc   :  { %v6313_v51 = vpop.f32.mrb[10].mxu0 }
 0x3fd   :  { %945 = vperm.xlu0 %5234, %v6313_v51   ;;  %v4629_v52 = vpop.f32.mrb[11].mxu0 }
 0x400   :  { %v6316_v53 = vpop.f32.mrb[12].mxu0 }
 0x401   :  { %950 = vperm.xlu0 %5234, %v6316_v53   ;;  %v4632_v54 = vpop.f32.mrb[13].mxu0 }
 0x402   :  { %v6363_v54 = vld [vmem:[#allocation7 + $0x8] sm:$0xff] }
 0x403   :  { %vm1074_vm10 = vcmp.gt.f32.partialorder %v6363_v54, 0.0 }
 0x404   :  { %v6319_v55 = vpop.f32.mrb[14].mxu0 }
 0x405   :  { %955 = vperm.xlu1 %5235, %v6319_v55   ;;  %v4635_v56 = vpop.f32.mrb[15].mxu0 }
 0x406   :  { %v6365_v56 = vld [vmem:[#allocation7] sm:$0xff] }
 0x407   :  { %vm1073_vm11 = vcmp.gt.f32.partialorder %v6365_v56, 0.0 }
 0x408   :  { %v6322_v57 = vpop.f32.mrb[16].mxu0 }
 0x409   :  { %960 = vperm.xlu1 %5235, %v6322_v57   ;;  %v4638_v58 = vpop.f32.mrb[17].mxu0 }
 0x40c   :  { %v6325_v59 = vpop.f32.mrb[18].mxu0 }
 0x40d   :  { %5236 = vset.pattern.permute.xlu1 %v5909_v60  ;;  %965 = vperm.xlu0 %5234, %v6325_v59   ;;  %v4641_v61 = vpop.f32.mrb[19].mxu0 }
 0x40e   :  { %1100 = vperm.xlu1 %5236, %v6313_v51  }
 0x411   :  { %5237 = vset.pattern.permute.xlu0 %v5909_v60 }
 0x412   :  { %1108 = vperm.xlu1 %5236, %v6319_v55   ;;  %1104 = vperm.xlu0 %5237, %v6316_v53  }
 0x416   :  { %1112 = vperm.xlu1 %5236, %v6322_v57   ;;  %1116 = vperm.xlu0 %5237, %v6325_v59  }
 0x41a   :  { %5238 = vset.pattern.permute.xlu1 %v5910_v63  ;;  %5239 = vset.pattern.permute.xlu0 %v5910_v63 }
 0x41b   :  { %1200 = vperm.xlu1 %5238, %v6244_v27   ;;  %1204 = vperm.xlu0 %5239, %v6242_v26  }
 0x41f   :  { %5240 = vset.pattern.permute.xlu1 %v5911_v0  ;;  %5242 = vset.pattern.permute.xlu0 %v5912_v31 }
 0x420   :  { %1057 = vperm.xlu1 %5240, %v6244_v27  }
 0x424   :  { %1062 = vperm.xlu1 %5240, %v6242_v26  }
 0x428   :  { %5241 = vset.pattern.permute.xlu1 %v5912_v31 }
 0x47c   :  { %v946_v2 = vpop.permute.xlu0 %945 }
 0x47d   :  { %v968_v4 = vmul.f32 %v946_v2, %v6252_v30 }
 0x480   :  { %v951_v3 = vpop.permute.xlu0 %950 }
 0x481   :  { %v969_v5 = vmul.f32 %v951_v3, %v6263_v33 }
 0x483   :  { %v4956_v6 = vpack.c.bf16 %v969_v5, %v968_v4 }
 0x484   :  { %v956_v7 = vpop.permute.xlu1 %955 }
 0x485   :  { %4957 = vmatprep.subr.bf16.mxu1 %v4956_v6  ;;  %v970_v9 = vmul.f32 %v956_v7, %v6273_v35 }
 0x486   :  { %4959 = vmatpush3.bf16.msra.mxu1 %v4956_v6 }
 0x488   :  { %v961_v8 = vpop.permute.xlu1 %960 }
 0x489   :  { %v971_v11 = vmul.f32 %v961_v8, %v6281_v36 }
 0x48b   :  { %v4960_v12 = vpack.c.bf16 %v971_v11, %v970_v9 }
 0x48c   :  { %v966_v13 = vpop.permute.xlu0 %965 }
 0x48d   :  { %v972_v14 = vmul.f32 %v966_v13, %v6288_v37  ;;  %4961 = vmatprep.subr.bf16.mxu1 %v4960_v12  ;;  %v1101_v15 = vpop.permute.xlu1 %1100 }
 0x48e   :  { %4963 = vmatpush3.bf16.msra.mxu1 %v4960_v12  ;;  %v1119_v19 = vmul.f32 %v1101_v15, %v6252_v30 }
 0x48f   :  { %4650 = vmatprep.subr.mxu1 %v972_v14 }
 0x491   :  { %v1109_v17 = vpop.permute.xlu1 %1108  ;;  %v1105_v18 = vpop.permute.xlu0 %1104 }
 0x492   :  { %v1120_v20 = vmul.f32 %v1105_v18, %v6263_v33  ;;  %4651 = vmatpush3.msra.mxu1 %v972_v14  ;;  %v1121_v23 = vmul.f32 %v1109_v17, %v6273_v35 }
 0x493   :  { %4653 = vmatmul.mubr.msk.f32.vlgmr.msra.gmra.mrb[10].mxu1 %vm973_vm6, %v6348_v16 }
 0x494   :  { %v4964_v21 = vpack.c.bf16 %v1120_v20, %v1119_v19  ;;  %4665 = vmatprep.mubr.msk.f32.mxu1 %vm973_vm6, %v6329_v62 }
 0x495   :  { %v1113_v22 = vpop.permute.xlu1 %1112  ;;  %v1117_v25 = vpop.permute.xlu0 %1116 }
 0x496   :  { %v1122_v24 = vmul.f32 %v1113_v22, %v6281_v36  ;;  %4965 = vmatprep.subr.bf16.mxu1 %v4964_v21  ;;  %v1123_v29 = vmul.f32 %v1117_v25, %v6288_v37 }
 0x497   :  { %4967 = vmatpush3.bf16.msra.mxu1 %v4964_v21 }
 0x498   :  { %v4968_v28 = vpack.c.bf16 %v1122_v24, %v1121_v23 }
 0x49a   :  { %4969 = vmatprep.subr.bf16.mxu1 %v4968_v28  ;;  %v1201_v41 = vpop.permute.xlu1 %1200  ;;  %v1205_v44 = vpop.permute.xlu0 %1204 }
 0x49b   :  { %4971 = vmatpush3.bf16.msra.mxu1 %v4968_v28 }
 0x49c   :  { %4663 = vmatprep.subr.mxu1 %v1123_v29 }
 0x49f   :  { %4664 = vmatpush3.msra.mxu1 %v1123_v29  ;;  %v1058_v42 = vpop.permute.xlu1 %1057 }
 0x4a0   :  { %4666 = vmatmul.mubr.msk.f32.vlgmr.msra.gmra.mrb[12].mxu1 %vm973_vm6, %v6348_v16 }
 0x4a3   :  { %v1063_v46 = vpop.permute.xlu1 %1062 }
 0x566   :  { %v4654_v32 = vpop.f32.mrb[10].mxu1 }
 0x567   :  { %v1046_v34 = vpop.f32.mrb[11].mxu1  ;;  %v1066_v49 = vadd.f32 %v4654_v32, %v1063_v46 }
 0x568   :  { %v1065_v43 = vadd.f32 %v1058_v42, %v1046_v34  ;;  %v5915_v42 = vmov 6  }
 0x569   :  { %v1070_v63 = vmul.f32 0.2, %v1066_v49  ;;  %vm1068_vm12 = vcmp.gt.f32.partialorder %v1066_v49, 0.0 }
 0x56a   :  { %v1069_v50 = vmul.f32 0.2, %v1065_v43  ;;  %vm1067_vm8 = vcmp.gt.f32.partialorder %v1065_v43, 0.0 }
 0x56b   :  { %v1072_v8 = vsel %vm1068_vm12, %v1066_v49, %v1070_v63 }
 0x56c   :  { %v1071_v3 = vsel %vm1067_vm8, %v1065_v43, %v1069_v50  ;;  %v1076_v11 = vsel %vm1074_vm10, %v1072_v8, -1e+30  ;;  %vm2073_vm8 = vcmask 1045504  }
 0x56d   :  { %v1075_v7 = vsel %vm1073_vm11, %v1071_v3, -1e+30  ;;  %v1080_v12 = vsel %vm731_vm5, %v1076_v11, -inf }
 0x56e   :  { %v1077_v9 = vsel %vm731_vm5, %v1075_v7, -inf }
 0x573   :  { %v4667_v45 = vpop.f32.mrb[12].mxu1 }
 0x574   :  { %v1208_v47 = vadd.f32 %v4667_v45, %v1205_v44  ;;  %v1190_v48 = vpop.f32.mrb[13].mxu1 }
 0x575   :  { %v1207_v52 = vadd.f32 %v1201_v41, %v1190_v48  ;;  %v5914_v41 = vmov 2  }
 0x576   :  { %v1212_v58 = vmul.f32 0.2, %v1208_v47  ;;  %vm1210_vm7 = vcmp.gt.f32.partialorder %v1208_v47, 0.0 }
 0x577   :  { %v1211_v60 = vmul.f32 0.2, %v1207_v52  ;;  %vm1209_vm9 = vcmp.gt.f32.partialorder %v1207_v52, 0.0 }
 0x578   :  { %v1214_v61 = vsel %vm1210_vm7, %v1208_v47, %v1212_v58 }
 0x579   :  { %v1216_v0 = vsel %vm1074_vm10, %v1214_v61, -1e+30  ;;  %v1213_v2 = vsel %vm1209_vm9, %v1207_v52, %v1211_v60  ;;  %vm2060_vm9 = vcmask 48128  }
 0x57a   :  { %v1220_v4 = vsel %vm731_vm5, %v1216_v0, -inf  ;;  %v1215_v5 = vsel %vm1073_vm11, %v1213_v2, -1e+30 }
 0x57b   :  { %1221 = vmax.xlane.f32.xlu1 %v1220_v4  ;;  %v1217_v6 = vsel %vm731_vm5, %v1215_v5, -inf }
 0x57c   :  { %1218 = vmax.xlane.f32.xlu0 %v1217_v6 }
 0x580   :  { %1078 = vmax.xlane.f32.xlu0 %v1077_v9 }
 0x584   :  { %1081 = vmax.xlane.f32.xlu0 %v1080_v12 }
 0x58c   :  { %1562 = vperm.xlu1 %5241, %v6313_v51  }
 0x608   :  { %v1222_v14 = vpop.xlane.xlu1 %1221 }
 0x609   :  { %v1219_v13 = vpop.xlane.xlu0 %1218  ;;  %v1224_v18 = vsub.f32 %v1216_v0, %v1222_v14 }
 0x60b   :  { %v1227_v22 = vmul.f32 1.442695, %v1224_v18 }
 0x60d   :  { %v1079_v15 = vpop.xlane.xlu0 %1078 }
 0x60e   :  { %v1083_v17 = vsub.f32 %v1075_v7, %v1079_v15 }
 0x610   :  { %v1085_v19 = vmul.f32 1.442695, %v1083_v17 }
 0x611   :  { %v1082_v20 = vpop.xlane.xlu0 %1081 }
 0x612   :  { %5351 = vpow2.f32 %v1085_v19  ;;  %v1084_v21 = vsub.f32 %v1076_v11, %v1082_v20 }
 0x614   :  { %v1087_v23 = vmul.f32 1.442695, %v1084_v21 }
 0x616   :  { %5353 = vpow2.f32 %v1087_v23 }
 0x617   :  { %5355 = vpow2.f32 %v1227_v22 }
 0x61c   :  { %v6382_v24 = vpop.eup %5351 }
 0x61d   :  { %v1089_v25 = vsel %vm731_vm5, %v6382_v24, 0.0 }
 0x61e   :  { %1090 = vadd.xlane.f32.xlu1 %v1089_v25 }
 0x620   :  { %v6386_v28 = vpop.eup %5353 }
 0x621   :  { %v1092_v29 = vsel %vm731_vm5, %v6386_v28, 0.0  ;;  %v6390_v32 = vpop.eup %5355 }
 0x622   :  { %1093 = vadd.xlane.f32.xlu0 %v1092_v29  ;;  %v1232_v34 = vsel %vm731_vm5, %v6390_v32, 0.0 }
 0x626   :  { %1233 = vadd.xlane.f32.xlu0 %v1232_v34 }
 0x62f   :  { %1570 = vperm.xlu1 %5241, %v6319_v55  }
 0x633   :  { %1574 = vperm.xlu1 %5241, %v6322_v57  }
 0x637   :  { %5244 = vrot.lane.b32.xlu1 %v6294_v38, %s5913_s15 }
 0x638   :  { %5248 = vset.pattern.permute.xlu1 %v5914_v41 }
 0x63b   :  { %1422 = vperm.xlu1 %5248, %v6313_v51   ;;  %v1223_v51 = vsub.f32 %v1215_v5, %v1219_v13 }
 0x63c   :  { %1566 = vperm.xlu0 %5242, %v6316_v53  }
 0x63d   :  { %v1225_v43 = vmul.f32 1.442695, %v1223_v51 }
 0x63f   :  { %1426 = vperm.xlu1 %5248, %v6316_v53   ;;  %5357 = vpow2.f32 %v1225_v43 }
 0x640   :  { %5251 = vset.pattern.permute.xlu0 %v5914_v41 }
 0x641   :  { %1438 = vperm.xlu0 %5251, %v6325_v59  }
 0x643   :  { %5249 = vset.pattern.permute.xlu1 %v5912_v31  ;;  %v5916_v31 = vmov 7  }
 0x644   :  { %1578 = vperm.xlu1 %5249, %v6325_v59  }
 0x645   :  { %5253 = vset.pattern.permute.xlu0 %v5915_v42 }
 0x646   :  { %1522 = vperm.xlu0 %5253, %v6244_v27  }
 0x648   :  { %5250 = vset.pattern.permute.xlu1 %v5914_v41 }
 0x649   :  { %1430 = vperm.xlu1 %5250, %v6319_v55   ;;  %v5358_v53 = vpop.eup %5357  ;;  %v1563_v55 = vpop.permute.xlu1 %1562 }
 0x64a   :  { %5265 = vset.pattern.permute.xlu0 %v5908_v40  ;;  %v1229_v44 = vsel %vm731_vm5, %v5358_v53, 0.0  ;;  %v1581_v60 = vmul.f32 %v1563_v55, %v6252_v30 }
 0x66d   :  { %1230 = vadd.xlane.f32.xlu1 %v1229_v44 }
 0x67e   :  { %1434 = vperm.xlu1 %5250, %v6322_v57  }
 0x682   :  { %5252 = vset.pattern.permute.xlu1 %v5916_v31 }
 0x683   :  { %1662 = vperm.xlu1 %5252, %v6244_v27  }
 0x687   :  { %1666 = vperm.xlu1 %5252, %v6242_v26  }
 0x68b   :  { %5254 = vset.pattern.permute.xlu1 %v5915_v42 }
 0x68c   :  { %1526 = vperm.xlu1 %5254, %v6242_v26  }
 0x6ab   :  { %v1091_v40 = vpop.xlane.xlu1 %1090 }
 0x6ac   :  { %5359 = vrcp.f32 %v1091_v40 }
 0x6af   :  { %v1571_v59 = vpop.permute.xlu1 %1570  ;;  %v1094_v45 = vpop.xlane.xlu0 %1093 }
 0x6b0   :  { %v1583_v26 = vmul.f32 %v1571_v59, %v6273_v35 }
 0x6b3   :  { %v1575_v46 = vpop.permute.xlu1 %1574  ;;  %v1234_v47 = vpop.xlane.xlu0 %1233 }
 0x6b4   :  { %v1584_v27 = vmul.f32 %v1575_v46, %v6281_v36  ;;  %5361 = vrcp.f32 %v1234_v47 }
 0x6b6   :  { %v4992_v2 = vpack.c.bf16 %v1584_v27, %v1583_v26  ;;  %v5360_v7 = vpop.eup %5359 }
 0x6b7   :  { %v5245_v48 = vpop.permute.xlu1 %5244  ;;  %v1097_v15 = vmul.f32 %v5360_v7, %v6382_v24 }
 0x6b8   :  { %v5247_v49 = vunpack.i.h.bf16 %v5245_v48  ;;  %v5246_v50 = vunpack.i.l.bf16 %v5245_v48 }
 0x6ba   :  { %v4972_v52 = vpack.c.bf16 %v5247_v49, %v5246_v50 }
 0x6bb   :  { %v1423_v57 = vpop.permute.xlu1 %1422  ;;  %v1567_v58 = vpop.permute.xlu0 %1566 }
 0x6bc   :  { %v1582_v61 = vmul.f32 %v1567_v58, %v6263_v33  ;;  %4973 = vmatprep.subr.bf16.mxu1 %v4972_v52  ;;  %v1441_v13 = vmul.f32 %v1423_v57, %v6252_v30 }
 0x6bd   :  { %4975 = vmatpush3.bf16.msra.mxu1 %v4972_v52 }
 0x6be   :  { %v4988_v63 = vpack.c.bf16 %v1582_v61, %v1581_v60  ;;  %4977 = vmatprep.subr.bf16.mxu1 %v6296_v39  ;;  %v5362_v8 = vpop.eup %5361 }
 0x6bf   :  { %v1427_v0 = vpop.permute.xlu1 %1426  ;;  %v1238_v14 = vmul.f32 %v5362_v8, %v6390_v32 }
 0x6c0   :  { %4989 = vmatprep.subr.bf16.mxu0 %v4988_v63  ;;  %v1442_v11 = vmul.f32 %v1427_v0, %v6263_v33  ;;  %v1439_v22 = vpop.permute.xlu0 %1438 }
 0x6c1   :  { %4991 = vmatpush3.bf16.msra.mxu0 %v4988_v63 }
 0x6c2   :  { %4993 = vmatprep.subr.bf16.mxu0 %v4992_v2  ;;  %v4980_v17 = vpack.c.bf16 %v1442_v11, %v1441_v13 }
 0x6c3   :  { %v1579_v3 = vpop.permute.xlu1 %1578 }
 0x6c4   :  { %v1585_v4 = vmul.f32 %v1579_v3, %v6288_v37 }
 0x6c5   :  { %4995 = vmatpush3.bf16.msra.mxu0 %v4992_v2  ;;  %v1523_v31 = vpop.permute.xlu0 %1522 }
 0x6c6   :  { %4703 = vmatprep.subr.mxu0 %v1585_v4 }
 0x6c8   :  { %v1431_v5 = vpop.permute.xlu1 %1430 }
 0x6c9   :  { %4704 = vmatpush3.msra.mxu0 %v1585_v4  ;;  %v1443_v30 = vmul.f32 %v1431_v5, %v6273_v35 }
 0x6ca   :  { %4706 = vmatmul.mubr.msk.f32.vlgmr.msra.gmra.mrb[20].mxu0 %vm973_vm6, %v6348_v16  ;;  %5004 = vmatprep.subr.bf16.mxu0 %v5907_v10 }
 0x6cb   :  { %4726 = vmatprep.mubr.msk.f32.mxu0 %vm5906_vm0, %v5905_v1 }
 0x6fa   :  { %v1231_v6 = vpop.xlane.xlu1 %1230 }
 0x6fb   :  { %5363 = vrcp.f32 %v1231_v6 }
 0x6fc   :  { %5365 = vrcp.f32 %v1094_v45 }
 0x6fe   :  { %v1435_v18 = vpop.permute.xlu1 %1434 }
 0x6ff   :  { %v1444_v33 = vmul.f32 %v1435_v18, %v6281_v36 }
 0x701   :  { %v4984_v21 = vpack.c.bf16 %v1444_v33, %v1443_v30 }
 0x702   :  { %v1663_v35 = vpop.permute.xlu1 %1662 }
 0x705   :  { %v5364_v9 = vpop.eup %5363 }
 0x706   :  { %v1237_v12 = vmul.f32 %v5364_v9, %v5358_v53  ;;  %v5366_v19 = vpop.eup %5365  ;;  %v1667_v36 = vpop.permute.xlu1 %1666 }
 0x707   :  { %v1098_v20 = vmul.f32 %v5366_v19, %v6386_v28 }
 0x708   :  { %4672 = vmatprep.mubr.msk.f32.mxu1 %vm731_vm5, %v1237_v12 }
 0x709   :  { %4673 = vmatmul.mubr.msk.f32.vlgmr.msra.gmra.mrb[14].mxu1 %vm731_vm5, %v1238_v14  ;;  %v4270_v14 = vld [vmem:[#allocation20] ss:$0 sm:$0xff] }
 0x70a   :  { %4979 = vmatpush3.bf16.msra.mxu1 %v6296_v39  ;;  %4679 = vmatprep.mubr.msk.f32.mxu1 %vm731_vm5, %v1097_v15  ;;  %v1445_v39 = vmul.f32 %v1439_v22, %v6288_v37 }
 0x70b   :  { %4981 = vmatprep.subr.bf16.mxu1 %v4980_v17  ;;  %v1527_v53 = vpop.permute.xlu1 %1526 }
 0x711   :  { %4680 = vmatmul.mubr.msk.f32.vlgmr.msra.gmra.mrb[14].mxu1 %vm731_vm5, %v1098_v20 }
 0x712   :  { %4983 = vmatpush3.bf16.msra.mxu1 %v4980_v17  ;;  %4692 = vmatprep.mubr.msk.f32.mxu1 %vm973_vm6, %v6329_v62 }
 0x713   :  { %4985 = vmatprep.subr.bf16.mxu1 %v4984_v21 }
 0x716   :  { %4987 = vmatpush3.bf16.msra.mxu1 %v4984_v21 }
 0x717   :  { %4690 = vmatprep.subr.mxu1 %v1445_v39 }
 0x71a   :  { %4691 = vmatpush3.msra.mxu1 %v1445_v39 }
 0x71b   :  { %4693 = vmatmul.mubr.msk.f32.vlgmr.msra.gmra.mrb[16].mxu1 %vm973_vm6, %v6348_v16 }
 0x79d   :  { %v4707_v23 = vpop.f32.mrb[20].mxu0 }
 0x79e   :  { %v1670_v24 = vadd.f32 %v4707_v23, %v1667_v36  ;;  %v1652_v25 = vpop.f32.mrb[21].mxu0 }
 0x79f   :  { %v1669_v28 = vadd.f32 %v1663_v35, %v1652_v25 }
 0x7a0   :  { %v1674_v29 = vmul.f32 0.2, %v1670_v24  ;;  %vm1672_vm13 = vcmp.gt.f32.partialorder %v1670_v24, 0.0 }
 0x7a1   :  { %v1673_v32 = vmul.f32 0.2, %v1669_v28  ;;  %vm1671_vm14 = vcmp.gt.f32.partialorder %v1669_v28, 0.0 }
 0x7a2   :  { %v1676_v62 = vsel %vm1672_vm13, %v1670_v24, %v1674_v29 }
 0x7a3   :  { %v1678_v37 = vsel %vm1074_vm10, %v1676_v62, -1e+30  ;;  %v1675_v34 = vsel %vm1671_vm14, %v1669_v28, %v1673_v32 }
 0x7a4   :  { %v1682_v41 = vsel %vm731_vm5, %v1678_v37, -inf  ;;  %v1677_v16 = vsel %vm1073_vm11, %v1675_v34, -1e+30 }
 0x7a5   :  { %1683 = vmax.xlane.f32.xlu0 %v1682_v41  ;;  %v1679_v42 = vsel %vm731_vm5, %v1677_v16, -inf }
 0x7a6   :  { %1680 = vmax.xlane.f32.xlu1 %v1679_v42 }
 0x7e4   :  { %v6446_v51 = vpop.f32.mrb[14].mxu1 }
 0x7e5   :  { %v6448_v43 = vpop.f32.mrb[15].mxu1 }
 0x7ee   :  { %v4694_v44 = vpop.f32.mrb[16].mxu1 }
 0x7ef   :  { %v1530_v55 = vadd.f32 %v4694_v44, %v1527_v53  ;;  %v1512_v40 = vpop.f32.mrb[17].mxu1 }
 0x7f0   :  { %v1529_v59 = vadd.f32 %v1523_v31, %v1512_v40  ;;  %v1976_v40 = vld [vmem:[#allocation22] sm:$0xff] }
 0x7f1   :  { %v1534_v45 = vmul.f32 0.2, %v1530_v55  ;;  %vm1532_vm15 = vcmp.gt.f32.partialorder %v1530_v55, 0.0 }
 0x7f2   :  { %v1533_v46 = vmul.f32 0.2, %v1529_v59  ;;  %vm1531_vm6 = vcmp.gt.f32.partialorder %v1529_v59, 0.0 }
 0x7f3   :  { %v1536_v47 = vsel %vm1532_vm15, %v1530_v55, %v1534_v45 }
 0x7f4   :  { %v1538_v48 = vsel %vm1074_vm10, %v1536_v47, -1e+30  ;;  %v1535_v49 = vsel %vm1531_vm6, %v1529_v59, %v1533_v46  ;;  %v1977_v59 = vld [vmem:[#allocation22 + $0x8] sm:$0xff]  ;;  %vm2285_vm10 = vcmask 261120  }
 0x7f5   :  { %v1542_v50 = vsel %vm731_vm5, %v1538_v48, -inf  ;;  %v1537_v52 = vsel %vm1073_vm11, %v1535_v49, -1e+30  ;;  %v5008_v46 = vpack.c.bf16 %v1977_v59, %v1976_v40  ;;  %v1409_v49 = vmul.f32 0.5, %v6448_v43 }
 0x7f6   :  { %1543 = vmax.xlane.f32.xlu1 %v1542_v50  ;;  %v1539_v57 = vsel %vm731_vm5, %v1537_v52, -inf  ;;  %v1895_v50 = vlaneseq }
 0x7f7   :  { %1540 = vmax.xlane.f32.xlu0 %v1539_v57 }
 0x832   :  { %v1684_v58 = vpop.xlane.xlu0 %1683 }
 0x833   :  { %v1686_v60 = vsub.f32 %v1678_v37, %v1684_v58  ;;  %v1681_v27 = vpop.xlane.xlu1 %1680  ;;  %v1894_v37 = vld [vmem:[%s6881_s22] sm:$0xf]  ;;  %v1896_v58 = vand.u32 127, %v1895_v50 }
 0x834   :  { %v1685_v61 = vsub.f32 %v1677_v16, %v1681_v27 }
 0x835   :  { %v1689_v26 = vmul.f32 1.442695, %v1686_v60 }
 0x836   :  { %v1687_v63 = vmul.f32 1.442695, %v1685_v61 }
 0x837   :  { %5367 = vpow2.f32 %v1689_v26 }
 0x838   :  { %5369 = vpow2.f32 %v1687_v63 }
 0x841   :  { %v5368_v54 = vpop.eup %5367 }
 0x842   :  { %v5370_v0 = vpop.eup %5369  ;;  %v1694_v2 = vsel %vm731_vm5, %v5368_v54, 0.0 }
 0x843   :  { %1695 = vadd.xlane.f32.xlu1 %v1694_v2  ;;  %v1691_v56 = vsel %vm731_vm5, %v5370_v0, 0.0 }
 0x844   :  { %1692 = vadd.xlane.f32.xlu0 %v1691_v56  ;;  %v2059_v56 = vld [vmem:[#allocation23] sm:$0x3f] }
 0x883   :  { %v1544_v3 = vpop.xlane.xlu1 %1543 }
 0x884   :  { %v1546_v4 = vsub.f32 %v1538_v48, %v1544_v3  ;;  %v1541_v5 = vpop.xlane.xlu0 %1540  ;;  %v1410_v48 = vmul.f32 0.5, %v6446_v51  ;;  %v2055_v3 = vld [vmem:[%s6882_s8] sm:$0xff] }
 0x885   :  { %v1545_v6 = vsub.f32 %v1537_v52, %v1541_v5  ;;  %v1417_v52 = vadd.f32 %v4270_v14, %v1409_v49  ;;  %v2057_v5 = vld [vmem:[%s6882_s8 + $0x10] sm:$0xff] }
 0x886   :  { %v1549_v7 = vmul.f32 1.442695, %v1546_v4  ;;  %v1418_v57 = vadd.f32 %v4270_v14, %v1410_v48  ;;  %v2056_v4 = vld [vmem:[%s6882_s8 + $0x8] sm:$0xff] }
 0x887   :  { %v1547_v8 = vmul.f32 1.442695, %v1545_v6  ;;  %v1419_v61 = vmax.f32 %v1417_v52, 0.0  ;;  %v2058_v6 = vld [vmem:[%s6882_s8 + $0x18] sm:$0xff] }
 0x888   :  { %5371 = vpow2.f32 %v1549_v7  ;;  %v1420_v26 = vmax.f32 %v1418_v57, 0.0 }
 0x889   :  { %5373 = vpow2.f32 %v1547_v8 }
 0x892   :  { %v5372_v9 = vpop.eup %5371 }
 0x893   :  { %v5374_v11 = vpop.eup %5373  ;;  %v1554_v12 = vsel %vm731_vm5, %v5372_v9, 0.0 }
 0x894   :  { %1555 = vadd.xlane.f32.xlu1 %v1554_v12  ;;  %v1551_v13 = vsel %vm731_vm5, %v5374_v11, 0.0  ;;  %v2275_v12 = vld [vmem:[#allocation26 + $0x8] sm:$0xff] }
 0x895   :  { %1552 = vadd.xlane.f32.xlu0 %v1551_v13 }
 0x8a5   :  { %5261 = vrot.lane.b32.xlu1 %v6294_v38, %s5917_s18 }
 0x8a9   :  { %1877 = vrot.lane.b32.xlu1 %v4270_v14, %s5913_s15 }
 0x8ab   :  { %5256 = vrot.lane.b32.xlu0 %v6294_v38, %s5918_s14 }
 0x8af   :  { %1898 = vperm.xlu0 %5265, %v1894_v37  }
 0x8d0   :  { %v1696_v19 = vpop.xlane.xlu1 %1695 }
 0x8d1   :  { %v1693_v15 = vpop.xlane.xlu0 %1692 }
 0x8d2   :  { %5375 = vrcp.f32 %v1693_v15  ;;  %v2052_v15 = vld [vmem:[#allocation8 + $0x8] sm:$0xff] }
 0x8d3   :  { %5377 = vrcp.f32 %v1696_v19  ;;  %v2054_v19 = vld [vmem:[#allocation8 + $0x18] sm:$0xff] }
 0x8dc   :  { %v5376_v17 = vpop.eup %5375 }
 0x8dd   :  { %v1699_v18 = vmul.f32 %v5376_v17, %v5370_v0  ;;  %v5378_v38 = vpop.eup %5377 }
 0x8de   :  { %v1700_v28 = vmul.f32 %v5378_v38, %v5368_v54  ;;  %v2264_v38 = vld [vmem:[#allocation25 + $0x10] sm:$0xff] }
 0x8df   :  { %4712 = vmatprep.mubr.msk.f32.mxu1 %vm731_vm5, %v1699_v18  ;;  %v2053_v18 = vld [vmem:[#allocation8 + $0x10] sm:$0xff] }
 0x921   :  { %v1556_v33 = vpop.xlane.xlu1 %1555 }
 0x922   :  { %v1553_v30 = vpop.xlane.xlu0 %1552 }
 0x923   :  { %5379 = vrcp.f32 %v1553_v30  ;;  %v2277_v30 = vld [vmem:[#allocation26 + $0x18] sm:$0xff] }
 0x924   :  { %5381 = vrcp.f32 %v1556_v33  ;;  %v2276_v33 = vld [vmem:[#allocation26 + $0x10] sm:$0xff] }
 0x925   :  { %v5262_v20 = vpop.permute.xlu1 %5261 }
 0x926   :  { %v5257_v21 = vpop.permute.xlu0 %5256  ;;  %v5264_v22 = vunpack.i.h.bf16 %v5262_v20  ;;  %v5263_v39 = vunpack.i.l.bf16 %v5262_v20  ;;  %v5014_v20 = vpack.c.bf16 %v2277_v30, %v2276_v33 }
 0x927   :  { %v5259_v35 = vunpack.i.h.bf16 %v5257_v21  ;;  %v5258_v36 = vunpack.i.l.bf16 %v5257_v21  ;;  %v2262_v21 = vld [vmem:[#allocation25] sm:$0xff] }
 0x928   :  { %v5000_v24 = vpack.c.bf16 %v5264_v22, %v5263_v39  ;;  %v2263_v39 = vld [vmem:[#allocation25 + $0x8] sm:$0xff] }
 0x929   :  { %v4996_v23 = vpack.c.bf16 %v5259_v35, %v5258_v36  ;;  %v1878_v41 = vpop.permute.xlu1 %1877 }
 0x92b   :  { %4997 = vmatprep.subr.bf16.mxu1 %v4996_v23 }
 0x92c   :  { %4999 = vmatpush3.bf16.msra.mxu1 %v4996_v23 }
 0x92d   :  { %v5380_v25 = vpop.eup %5379  ;;  %5001 = vmatprep.subr.bf16.mxu1 %v5000_v24 }
 0x92e   :  { %v1559_v29 = vmul.f32 %v5380_v25, %v5374_v11  ;;  %v5382_v32 = vpop.eup %5381  ;;  %v1899_v27 = vpop.permute.xlu0 %1898  ;;  %v2274_v11 = vld [vmem:[#allocation26] sm:$0xff]  ;;  %v2265_v25 = vld [vmem:[#allocation25 + $0x18] sm:$0xff] }
 0x92f   :  { %4713 = vmatmul.mubr.msk.f32.vlgmr.msra.gmra.mrb[18].mxu1 %vm731_vm5, %v1700_v28  ;;  %v1560_v62 = vmul.f32 %v5382_v32, %v5372_v9  ;;  %vm1900_vm7 = vcmp.eq.s32.totalorder %v1899_v27, %v1896_v58  ;;  %v2051_v9 = vld [vmem:[#allocation8] sm:$0xff]  ;;  %v5010_v13 = vpack.c.bf16 %v2275_v12, %v2274_v11 }
 0x930   :  { %5003 = vmatpush3.bf16.msra.mxu1 %v5000_v24  ;;  %4719 = vmatprep.mubr.msk.f32.mxu1 %vm731_vm5, %v1559_v29  ;;  %v4279_v2 = vsel %vm1900_vm7, 1.0, %v5905_v1  ;;  %v6550_v27 = vld [vmem:[#allocation10] sm:$0xff] }
 0x931   :  { %5007 = vmatprep.subr.bf16.mxu1 %v5907_v10  ;;  %vm2500_vm11 = vcmp.gt.f32.partialorder %v6550_v27, 0.0 }
 0x937   :  { %4720 = vmatmul.mubr.msk.f32.vlgmr.msra.gmra.mrb[18].mxu1 %vm731_vm5, %v1560_v62  ;;  %v4292_v62 = vld [vmem:[#allocation28] ss:$0 sm:$0xff] }
 0x938   :  { %4733 = vmatprep.mubr.msk.f32.mxu1 %vm5906_vm0, %v5905_v1  ;;  %5009 = vmatpush3.bf16.msra.mxu1 %v5008_v46 }
 0x939   :  { %5011 = vmatprep.subr.bf16.mxu1 %v5010_v13 }
 0xa0a   :  { %v4721_v34 = vpop.f32.mrb[18].mxu1 }
 0xa0b   :  { %v1876_v16 = vmul.f32 0.5, %v4721_v34  ;;  %v1866_v42 = vpop.f32.mrb[19].mxu1 }
 0xa0c   :  { %v1875_v53 = vmul.f32 0.5, %v1866_v42 }
 0xa0d   :  { %v1881_v44 = vadd.f32 %v1878_v41, %v1876_v16 }
 0xa0e   :  { %v1880_v31 = vadd.f32 %v1878_v41, %v1875_v53 }
 0xa0f   :  { %v1883_v55 = vmax.f32 %v1881_v44, 0.0 }
 0xa10   :  { %v1882_v45 = vmax.f32 %v1880_v31, 0.0 }
 0xa12   :  { %v5266_v47 = vpack.i.bf16 %v1883_v55, %v1882_v45 }
 0xa14   :  { %5267 = vrot.lane.b32.xlu1 %v5266_v47, %s5889_s2 }
 0xa86   :  { %v5268_v60 = vpop.permute.xlu1 %5267 }
 0xa87   :  { %v5270_v63 = vunpack.i.h.bf16 %v5268_v60  ;;  %v5269_v54 = vunpack.i.l.bf16 %v5268_v60  ;;  %v6548_v60 = vld [vmem:[#allocation10 + $0x8] sm:$0xff] }
 0xa89   :  { %v1893_v0 = vsel %vm572_vm3, %v1420_v26, %v5270_v63  ;;  %v1892_v51 = vsel %vm572_vm3, %v1419_v61, %v5269_v54  ;;  %v6554_v54 = vld [vmem:[#allocation10 + $0x18] sm:$0xff] }
 0xa8a   :  { %v5005_v43 = vpack.c.bf16 %v1893_v0, %v1892_v51  ;;  %v6556_v51 = vld [vmem:[#allocation10 + $0x10] sm:$0xff]  ;;  %vm2503_vm12 = vcmp.gt.f32.partialorder %v6554_v54, 0.0 }
 0xa8b   :  { %vm2502_vm13 = vcmp.gt.f32.partialorder %v6556_v51, 0.0 }
 0xa8c   :  { %5006 = vmatpush3.bf16.msra.mxu0 %v5005_v43 }
 0xa8d   :  { %4736 = vmatprep.subr.msk.mxu0 %vm2073_vm8, %v2059_v56 }
 0xa8f   :  { %4727 = vmatmul.mubr.msk.f32.vlgmr.msra.gmra.mrb[22].mxu0 %vm731_vm5, %v4279_v2 }
 0xa90   :  { %4738 = vmatprep.mubr.msk.f32.mxu0 %vm2060_vm9, %v2055_v3  ;;  %4737 = vmatpush3.msk.msra.mxu0 %vm2073_vm8, %v2059_v56 }
 0xa93   :  { %4739 = vmatmul.mubr.msk.f32.vlgmr.msra.gmra.mrb[24].mxu0 %vm2060_vm9, %v2056_v4 }
 0xa94   :  { %4741 = vmatprep.mubr.msk.f32.mxu0 %vm2060_vm9, %v2057_v5 }
 0xa97   :  { %4742 = vmatmul.mubr.msk.f32.gmra.mrb[26].mxu0 %vm2060_vm9, %v2058_v6 }
 0xa98   :  { %4746 = vmatprep.mubr.msk.f32.mxu0 %vm366_vm2, %v2051_v9 }
 0xb62   :  { %v1972_v7 = vpop.f32.mrb[22].mxu0 }
 0xb63   :  { %v4728_v8 = vpop.f32.mrb[23].mxu0  ;;  %4734 = vmatmul.mubr.msk.f32.vlgmr.msra.gmra.mrb[20].mxu1 %vm731_vm5, %v1972_v7 }
 0xb64   :  { %5013 = vmatpush3.bf16.msra.mxu1 %v5010_v13 }
 0xb65   :  { %5015 = vmatprep.subr.bf16.mxu1 %v5014_v20 }
 0xb68   :  { %5017 = vmatpush3.bf16.msra.mxu1 %v5014_v20 }
 0xc36   :  { %v2047_v14 = vpop.f32.mrb[20].mxu1 }
 0xc37   :  { %v4735_v17 = vpop.f32.mrb[21].mxu1  ;;  %4744 = vmatprep.subr.msk.mxu0 %vm376_vm1, %v2047_v14 }
 0xc38   :  { %4745 = vmatpush3.msk.msra.mxu0 %vm376_vm1, %v2047_v14  ;;  %vm6530_vm1 = vmpackc.low %vm572_vm3, %vm572_vm3 }
 0xc39   :  { %4747 = vmatmul.mubr.msk.f32.vlgmr.msra.gmra.mrb[24].mxu0 %vm366_vm2, %v2052_v15 }
 0xc3a   :  { %4749 = vmatprep.mubr.msk.f32.mxu0 %vm366_vm2, %v2053_v18 }
 0xc3d   :  { %4750 = vmatmul.mubr.msk.f32.gmra.mrb[26].mxu0 %vm366_vm2, %v2054_v19  ;;  %vm2501_vm2 = vcmp.gt.f32.partialorder %v6548_v60, 0.0 }
 0xd0c   :  { %v4748_v22 = vpop.f32.mrb[24].mxu0 }
 0xd0d   :  { %v2243_v35 = vpop.f32.mrb[25].mxu0  ;;  %v6494_v23 = vadd.f32 %v4748_v22, %v2263_v39 }
 0xd0e   :  { %v6492_v36 = vadd.f32 %v2262_v21, %v2243_v35 }
 0xd10   :  { %v4751_v24 = vpop.f32.mrb[26].mxu0  ;;  %4760 = vmatprep.mubr.msk.f32.mxu1 %vm2285_vm10, %v6492_v36 }
 0xd11   :  { %v2253_v28 = vpop.f32.mrb[27].mxu0  ;;  %4761 = vmatmul.mubr.msk.f32.vlgmr.msra.gmra.mrb[22].mxu1 %vm2285_vm10, %v6494_v23  ;;  %v6502_v32 = vadd.f32 %v4751_v24, %v2265_v25 }
 0xd12   :  { %v6500_v29 = vadd.f32 %v2264_v38, %v2253_v28 }
 0xd14   :  { %4763 = vmatprep.mubr.msk.f32.mxu1 %vm2285_vm10, %v6500_v29 }
 0xd15   :  { %4764 = vmatmul.mubr.msk.f32.gmra.mrb[24].mxu1 %vm2285_vm10, %v6502_v32 }
 0xde4   :  { %v4762_v37 = vpop.f32.mrb[22].mxu1 }
 0xde5   :  { %v6508_v34 = vadd.f32 %v4762_v37, %v4292_v62  ;;  %v2364_v41 = vpop.f32.mrb[23].mxu1 }
 0xde6   :  { %v6510_v16 = vadd.f32 %v4292_v62, %v2364_v41 }
 0xde8   :  { %v4765_v42 = vpop.f32.mrb[24].mxu1  ;;  %4774 = vmatprep.mubr.msk.f32.mxu1 %vm572_vm3, %v6510_v16  ;;  %v6516_v53 = vpack.i.bf16 %v6508_v34, %v6510_v16 }
 0xde9   :  { %v6518_v44 = vadd.f32 %v4765_v42, %v4292_v62  ;;  %v2374_v31 = vpop.f32.mrb[25].mxu1 }
 0xdea   :  { %v6520_v55 = vadd.f32 %v4292_v62, %v2374_v31  ;;  %5272 = vrot.lane.b32.xlu1 %v6516_v53, %s5919_s27 }
 0xdec   :  { %v6525_v40 = vpack.i.bf16 %v6518_v44, %v6520_v55 }
 0xdee   :  { %5277 = vrot.lane.b32.xlu0 %v6525_v40, %s5919_s27 }
 0xe5c   :  { %v5273_v59 = vpop.permute.xlu1 %5272 }
 0xe5d   :  { %v5275_v45 = vunpack.i.h.bf16 %v5273_v59  ;;  %v5274_v46 = vunpack.i.l.bf16 %v5273_v59 }
 0xe5f   :  { %v5018_v48 = vpack.c.bf16 %v5275_v45, %v5274_v46 }
 0xe60   :  { %v5278_v49 = vpop.permute.xlu0 %5277 }
 0xe61   :  { %v5280_v52 = vunpack.i.h.bf16 %v5278_v49  ;;  %v5279_v57 = vunpack.i.l.bf16 %v5278_v49  ;;  %5020 = vmatprep.subr.msk.bf16.mxu1 %vm6530_vm1, %v5018_v48 }
 0xe62   :  { %5023 = vmatpush3.bf16.xpose.msk.msra.mxu1 %vm6530_vm1, %v5018_v48 }
 0xe63   :  { %v5024_v58 = vpack.c.bf16 %v5280_v52, %v5279_v57 }
 0xe65   :  { %5026 = vmatprep.subr.msk.bf16.mxu1 %vm6530_vm1, %v5024_v58 }
 0xe6a   :  { %5029 = vmatpush3.bf16.xpose.msk.msra.mxu1 %vm6530_vm1, %v5024_v58 }
 0xe71   :  { %4775 = vmatmul.mubr.msk.f32.vlgmr.msra.gmra.mrb[26].mxu1 %vm572_vm3, %v6508_v34 }
 0xe72   :  { %4777 = vmatprep.mubr.msk.f32.mxu1 %vm572_vm3, %v6520_v55 }
 0xe75   :  { %4778 = vmatmul.mubr.msk.f32.gmra.mrb[28].mxu1 %vm572_vm3, %v6518_v44 }
 0xf44   :  { %v4776_v61 = vpop.f32.mrb[26].mxu1 }
 0xf45   :  { %v2497_v26 = vmul.f32 0.35355338, %v4776_v61  ;;  %v2477_v63 = vpop.f32.mrb[27].mxu1 }
 0xf46   :  { %v2496_v0 = vmul.f32 0.35355338, %v2477_v63 }
 0xf47   :  { %v2505_v43 = vsel %vm2501_vm2, %v2497_v26, -1e+30 }
 0xf48   :  { %v4779_v2 = vpop.f32.mrb[28].mxu1  ;;  %v2511_v56 = vsel %vm2285_vm10, %v2505_v43, -inf  ;;  %v2504_v3 = vsel %vm2500_vm11, %v2496_v0, -1e+30 }
 0xf49   :  { %v2499_v4 = vmul.f32 0.35355338, %v4779_v2  ;;  %2512 = vmax.xlane.f32.xlu0 %v2511_v56  ;;  %v2487_v5 = vpop.f32.mrb[29].mxu1  ;;  %v2508_v6 = vsel %vm2285_vm10, %v2504_v3, -inf }
 0xf4a   :  { %v2498_v7 = vmul.f32 0.35355338, %v2487_v5  ;;  %2509 = vmax.xlane.f32.xlu1 %v2508_v6 }
 0xf4b   :  { %v2507_v8 = vsel %vm2503_vm12, %v2499_v4, -1e+30 }
 0xf4c   :  { %v2517_v9 = vsel %vm2285_vm10, %v2507_v8, -inf  ;;  %v2506_v11 = vsel %vm2502_vm13, %v2498_v7, -1e+30 }
 0xf4d   :  { %v2514_v12 = vsel %vm2285_vm10, %v2506_v11, -inf }
 0xf4e   :  { %2518 = vmax.xlane.f32.xlu1 %v2517_v9  ;;  %2515 = vmax.xlane.f32.xlu0 %v2514_v12 }
 0xf5f   :  { %5287 = vrot.lane.b32.xlu1 %v6525_v40, %s5920_s24 }
 0xf64   :  { %5282 = vrot.lane.b32.xlu0 %v6516_v53, %s5920_s24 }
 0xfd6   :  { %v2513_v13 = vpop.xlane.xlu0 %2512 }
 0xfd7   :  { %v2521_v14 = vsub.f32 %v2505_v43, %v2513_v13  ;;  %v2510_v15 = vpop.xlane.xlu1 %2509 }
 0xfd8   :  { %v2520_v17 = vsub.f32 %v2504_v3, %v2510_v15 }
 0xfd9   :  { %v2526_v18 = vmul.f32 1.442695, %v2521_v14 }
 0xfda   :  { %v2524_v19 = vmul.f32 1.442695, %v2520_v17 }
 0xfdb   :  { %5383 = vpow2.f32 %v2526_v18  ;;  %v2519_v33 = vpop.xlane.xlu1 %2518  ;;  %v2516_v30 = vpop.xlane.xlu0 %2515 }
 0xfdc   :  { %5385 = vpow2.f32 %v2524_v19  ;;  %v2522_v20 = vsub.f32 %v2506_v11, %v2516_v30  ;;  %v2523_v46 = vsub.f32 %v2507_v8, %v2519_v33 }
 0xfde   :  { %v2528_v21 = vmul.f32 1.442695, %v2522_v20  ;;  %v2530_v48 = vmul.f32 1.442695, %v2523_v46 }
 0xfdf   :  { %v5288_v22 = vpop.permute.xlu1 %5287  ;;  %v5283_v39 = vpop.permute.xlu0 %5282 }
 0xfe0   :  { %v5285_v35 = vunpack.i.h.bf16 %v5283_v39  ;;  %5387 = vpow2.f32 %v2528_v21  ;;  %v5290_v38 = vunpack.i.h.bf16 %v5288_v22  ;;  %v5289_v24 = vunpack.i.l.bf16 %v5288_v22 }
 0xfe1   :  { %v5284_v25 = vunpack.i.l.bf16 %v5283_v39  ;;  %5389 = vpow2.f32 %v2530_v48 }
 0xfe2   :  { %v5034_v37 = vpack.c.bf16 %v5290_v38, %v5289_v24 }
 0xfe3   :  { %v5030_v28 = vpack.c.bf16 %v5285_v35, %v5284_v25 }
 0xfe5   :  { %v5384_v62 = vpop.eup %5383  ;;  %5031 = vmatprep.subr.bf16.mxu0 %v5030_v28 }
 0xfe6   :  { %v5386_v41 = vpop.eup %5385  ;;  %5033 = vmatpush3.bf16.msra.mxu0 %v5030_v28  ;;  %v2535_v42 = vsel %vm2285_vm10, %v5384_v62, 0.0 }
 0xfe7   :  { %5035 = vmatprep.subr.bf16.mxu0 %v5034_v37  ;;  %2536 = vadd.xlane.f32.xlu1 %v2535_v42  ;;  %v2532_v31 = vsel %vm2285_vm10, %v5386_v41, 0.0 }
 0xfe8   :  { %2533 = vadd.xlane.f32.xlu0 %v2532_v31 }
 0xfea   :  { %5037 = vmatpush3.bf16.msra.mxu0 %v5034_v37  ;;  %v5388_v59 = vpop.eup %5387 }
 0xfeb   :  { %v2538_v45 = vsel %vm2285_vm10, %v5388_v59, 0.0  ;;  %v5390_v49 = vpop.eup %5389 }
 0xfec   :  { %2539 = vadd.xlane.f32.xlu0 %v2538_v45  ;;  %v2541_v52 = vsel %vm2285_vm10, %v5390_v49, 0.0 }
 0xff8   :  { %5292 = vrot.lane.b32.xlu1 %v6516_v53, %s5921_s23 }
0x1002   :  { %5297 = vrot.lane.b32.xlu0 %v6525_v40, %s5921_s23 }
0x1006   :  { %2663 = vrot.lane.b32.xlu0 %v6508_v34, %s5913_s15 }
0x100a   :  { %2667 = vrot.lane.b32.xlu0 %v6518_v44, %s5913_s15 }
0x101c   :  { %2542 = vadd.xlane.f32.xlu1 %v2541_v52 }
0x102d   :  { %2661 = vrot.lane.b32.xlu1 %v6510_v16, %s5913_s15 }
0x1031   :  { %2665 = vrot.lane.b32.xlu1 %v6520_v55, %s5913_s15 }
0x1074   :  { %v2537_v57 = vpop.xlane.xlu1 %2536 }
0x1075   :  { %5391 = vrcp.f32 %v2537_v57  ;;  %v2534_v58 = vpop.xlane.xlu0 %2533 }
0x1076   :  { %5393 = vrcp.f32 %v2534_v58 }
0x1078   :  { %v5293_v61 = vpop.permute.xlu1 %5292 }
0x1079   :  { %v5295_v26 = vunpack.i.h.bf16 %v5293_v61  ;;  %v5294_v63 = vunpack.i.l.bf16 %v5293_v61  ;;  %v2540_v0 = vpop.xlane.xlu0 %2539 }
0x107a   :  { %5395 = vrcp.f32 %v2540_v0 }
0x107b   :  { %v5038_v43 = vpack.c.bf16 %v5295_v26, %v5294_v63 }
0x107d   :  { %5040 = vmatprep.subr.msk.bf16.mxu0 %vm6530_vm1, %v5038_v43  ;;  %v5298_v2 = vpop.permute.xlu0 %5297 }
0x107e   :  { %v5300_v4 = vunpack.i.h.bf16 %v5298_v2  ;;  %v5299_v5 = vunpack.i.l.bf16 %v5298_v2 }
0x107f   :  { %v5392_v56 = vpop.eup %5391 }
0x1080   :  { %v5394_v3 = vpop.eup %5393  ;;  %v2549_v7 = vmul.f32 %v5392_v56, %v5384_v62  ;;  %v5044_v8 = vpack.c.bf16 %v5300_v4, %v5299_v5 }
0x1081   :  { %v2548_v6 = vmul.f32 %v5394_v3, %v5386_v41  ;;  %v2664_v17 = vpop.permute.xlu0 %2663 }
0x1083   :  { %4788 = vmatprep.mubr.msk.f32.mxu0 %vm2285_vm10, %v2548_v6 }
0x1084   :  { %4789 = vmatmul.mubr.msk.f32.vlgmr.msra.gmra.mrb[28].mxu0 %vm2285_vm10, %v2549_v7  ;;  %v5396_v9 = vpop.eup %5395 }
0x1085   :  { %5043 = vmatpush3.bf16.xpose.msk.msra.mxu0 %vm6530_vm1, %v5038_v43  ;;  %v2550_v11 = vmul.f32 %v5396_v9, %v5388_v59  ;;  %v2668_v19 = vpop.permute.xlu0 %2667 }
0x1086   :  { %5046 = vmatprep.subr.msk.bf16.mxu0 %vm6530_vm1, %v5044_v8 }
0x1087   :  { %4791 = vmatprep.mubr.msk.f32.mxu0 %vm2285_vm10, %v2550_v11 }
0x108d   :  { %5049 = vmatpush3.bf16.xpose.msk.msra.mxu0 %vm6530_vm1, %v5044_v8 }
0x10a9   :  { %v2543_v12 = vpop.xlane.xlu1 %2542 }
0x10aa   :  { %5397 = vrcp.f32 %v2543_v12 }
0x10ad   :  { %v2662_v14 = vpop.permute.xlu1 %2661 }
0x10b1   :  { %v2666_v18 = vpop.permute.xlu1 %2665 }
0x10b4   :  { %v5398_v13 = vpop.eup %5397 }
0x10b5   :  { %v2551_v15 = vmul.f32 %v5398_v13, %v5390_v49 }
0x10b7   :  { %4792 = vmatmul.mubr.msk.f32.gmra.mrb[30].mxu0 %vm2285_vm10, %v2551_v15 }
0x10b8   :  { %4802 = vmatprep.mubr.msk.f32.mxu0 %vm572_vm3, %v2662_v14 }
0x10bb   :  { %4803 = vmatmul.mubr.msk.f32.vlgmr.msra.gmra.mrb[32].mxu0 %vm572_vm3, %v2664_v17 }
0x10bc   :  { %4805 = vmatprep.mubr.msk.f32.mxu0 %vm572_vm3, %v2666_v18 }
0x10bf   :  { %4806 = vmatmul.mubr.msk.f32.gmra.mrb[34].mxu0 %vm572_vm3, %v2668_v19 }
0x1157   :  { %v6604_v33 = vpop.f32.mrb[28].mxu0 }
0x1158   :  { %v6606_v30 = vpop.f32.mrb[29].mxu0 }
0x118a   :  { %v6608_v20 = vpop.f32.mrb[30].mxu0 }
0x118b   :  { %v6610_v21 = vpop.f32.mrb[31].mxu0 }
0x118e   :  { %v4804_v22 = vpop.f32.mrb[32].mxu0 }
0x118f   :  { %v2779_v39 = vmul.f32 0.35355338, %v4804_v22  ;;  %v2759_v35 = vpop.f32.mrb[33].mxu0 }
0x1190   :  { %v2778_v38 = vmul.f32 0.35355338, %v2759_v35 }
0x1191   :  { %v2783_v24 = vsel %vm2501_vm2, %v2779_v39, -1e+30 }
0x1192   :  { %v4807_v25 = vpop.f32.mrb[34].mxu0  ;;  %v2789_v28 = vsel %vm2285_vm10, %v2783_v24, -inf  ;;  %v2782_v62 = vsel %vm2500_vm11, %v2778_v38, -1e+30 }
0x1193   :  { %v2781_v37 = vmul.f32 0.35355338, %v4807_v25  ;;  %2790 = vmax.xlane.f32.xlu0 %v2789_v28  ;;  %v2769_v41 = vpop.f32.mrb[35].mxu0  ;;  %v2786_v42 = vsel %vm2285_vm10, %v2782_v62, -inf }
0x1194   :  { %v2780_v31 = vmul.f32 0.35355338, %v2769_v41  ;;  %2787 = vmax.xlane.f32.xlu1 %v2786_v42 }
0x1195   :  { %v2785_v59 = vsel %vm2503_vm12, %v2781_v37, -1e+30 }
0x1196   :  { %v2795_v45 = vsel %vm2285_vm10, %v2785_v59, -inf  ;;  %v2784_v46 = vsel %vm2502_vm13, %v2780_v31, -1e+30 }
0x1197   :  { %v2792_v48 = vsel %vm2285_vm10, %v2784_v46, -inf }
0x1198   :  { %2796 = vmax.xlane.f32.xlu1 %v2795_v45  ;;  %2793 = vmax.xlane.f32.xlu0 %v2792_v48 }
0x11a9   :  { %5307 = vrot.lane.b32.xlu1 %v6525_v40, %s5922_s13 }
0x11ae   :  { %5302 = vrot.lane.b32.xlu0 %v6516_v53, %s5922_s13 }
0x1220   :  { %v2791_v49 = vpop.xlane.xlu0 %2790 }
0x1221   :  { %v2799_v52 = vsub.f32 %v2783_v24, %v2791_v49  ;;  %v2788_v57 = vpop.xlane.xlu1 %2787 }
0x1222   :  { %v2798_v58 = vsub.f32 %v2782_v62, %v2788_v57 }
0x1223   :  { %v2804_v61 = vmul.f32 1.442695, %v2799_v52 }
0x1224   :  { %v2802_v26 = vmul.f32 1.442695, %v2798_v58 }
0x1225   :  { %5399 = vpow2.f32 %v2804_v61  ;;  %v2797_v63 = vpop.xlane.xlu1 %2796  ;;  %v2794_v0 = vpop.xlane.xlu0 %2793 }
0x1226   :  { %5401 = vpow2.f32 %v2802_v26  ;;  %v2800_v43 = vsub.f32 %v2784_v46, %v2794_v0  ;;  %v2801_v18 = vsub.f32 %v2785_v59, %v2797_v63 }
0x1228   :  { %v2806_v2 = vmul.f32 1.442695, %v2800_v43  ;;  %v2808_v19 = vmul.f32 1.442695, %v2801_v18 }
0x1229   :  { %v5308_v56 = vpop.permute.xlu1 %5307  ;;  %v5303_v3 = vpop.permute.xlu0 %5302 }
0x122a   :  { %v5305_v4 = vunpack.i.h.bf16 %v5303_v3  ;;  %5403 = vpow2.f32 %v2806_v2  ;;  %v5310_v5 = vunpack.i.h.bf16 %v5308_v56  ;;  %v5309_v6 = vunpack.i.l.bf16 %v5308_v56 }
0x122b   :  { %v5304_v7 = vunpack.i.l.bf16 %v5303_v3  ;;  %5405 = vpow2.f32 %v2808_v19 }
0x122c   :  { %v5054_v11 = vpack.c.bf16 %v5310_v5, %v5309_v6 }
0x122d   :  { %v5050_v8 = vpack.c.bf16 %v5305_v4, %v5304_v7 }
0x122f   :  { %v5400_v9 = vpop.eup %5399  ;;  %5051 = vmatprep.subr.bf16.mxu1 %v5050_v8 }
0x1230   :  { %v5402_v12 = vpop.eup %5401  ;;  %5053 = vmatpush3.bf16.msra.mxu1 %v5050_v8  ;;  %v2813_v13 = vsel %vm2285_vm10, %v5400_v9, 0.0 }
0x1231   :  { %5055 = vmatprep.subr.bf16.mxu1 %v5054_v11  ;;  %2814 = vadd.xlane.f32.xlu1 %v2813_v13  ;;  %v2810_v14 = vsel %vm2285_vm10, %v5402_v12, 0.0 }
0x1232   :  { %2811 = vadd.xlane.f32.xlu0 %v2810_v14 }
0x1234   :  { %5057 = vmatpush3.bf16.msra.mxu1 %v5054_v11  ;;  %v5404_v15 = vpop.eup %5403 }
0x1235   :  { %v2816_v17 = vsel %vm2285_vm10, %v5404_v15, 0.0  ;;  %v5406_v22 = vpop.eup %5405 }
0x1236   :  { %2817 = vadd.xlane.f32.xlu0 %v2816_v17  ;;  %v2819_v39 = vsel %vm2285_vm10, %v5406_v22, 0.0 }
0x1242   :  { %5312 = vrot.lane.b32.xlu1 %v6516_v53, %s5923_s26 }
0x124c   :  { %5317 = vrot.lane.b32.xlu0 %v6525_v40, %s5923_s26 }
0x1250   :  { %2941 = vrot.lane.b32.xlu0 %v6508_v34, %s5917_s18 }
0x1254   :  { %2945 = vrot.lane.b32.xlu0 %v6518_v44, %s5917_s18 }
0x1266   :  { %2820 = vadd.xlane.f32.xlu1 %v2819_v39 }
0x1277   :  { %2939 = vrot.lane.b32.xlu1 %v6510_v16, %s5917_s18 }
0x127b   :  { %2943 = vrot.lane.b32.xlu1 %v6520_v55, %s5917_s18 }
0x12be   :  { %v2815_v35 = vpop.xlane.xlu1 %2814 }
0x12bf   :  { %5407 = vrcp.f32 %v2815_v35  ;;  %v2812_v38 = vpop.xlane.xlu0 %2811 }
0x12c0   :  { %5409 = vrcp.f32 %v2812_v38 }
0x12c2   :  { %v5313_v24 = vpop.permute.xlu1 %5312 }
0x12c3   :  { %v5315_v25 = vunpack.i.h.bf16 %v5313_v24  ;;  %v5314_v28 = vunpack.i.l.bf16 %v5313_v24  ;;  %v2818_v62 = vpop.xlane.xlu0 %2817 }
0x12c4   :  { %5411 = vrcp.f32 %v2818_v62 }
0x12c5   :  { %v5058_v37 = vpack.c.bf16 %v5315_v25, %v5314_v28 }
0x12c7   :  { %5060 = vmatprep.subr.msk.bf16.mxu1 %vm6530_vm1, %v5058_v37  ;;  %v5318_v41 = vpop.permute.xlu0 %5317 }
0x12c8   :  { %v5320_v59 = vunpack.i.h.bf16 %v5318_v41  ;;  %v5319_v45 = vunpack.i.l.bf16 %v5318_v41 }
0x12c9   :  { %v5408_v42 = vpop.eup %5407 }
0x12ca   :  { %v5410_v31 = vpop.eup %5409  ;;  %v2827_v48 = vmul.f32 %v5408_v42, %v5400_v9  ;;  %v5064_v49 = vpack.c.bf16 %v5320_v59, %v5319_v45 }
0x12cb   :  { %v2826_v46 = vmul.f32 %v5410_v31, %v5402_v12  ;;  %v2942_v0 = vpop.permute.xlu0 %2941 }
0x12cd   :  { %4816 = vmatprep.mubr.msk.f32.mxu1 %vm2285_vm10, %v2826_v46 }
0x12ce   :  { %4817 = vmatmul.mubr.msk.f32.vlgmr.msra.gmra.mrb[30].mxu1 %vm2285_vm10, %v2827_v48  ;;  %v5412_v52 = vpop.eup %5411 }
0x12cf   :  { %5063 = vmatpush3.bf16.xpose.msk.msra.mxu1 %vm6530_vm1, %v5058_v37  ;;  %v2828_v57 = vmul.f32 %v5412_v52, %v5404_v15  ;;  %v2946_v2 = vpop.permute.xlu0 %2945 }
0x12d0   :  { %5066 = vmatprep.subr.msk.bf16.mxu1 %vm6530_vm1, %v5064_v49 }
0x12d1   :  { %4819 = vmatprep.mubr.msk.f32.mxu1 %vm2285_vm10, %v2828_v57 }
0x12d7   :  { %5069 = vmatpush3.bf16.xpose.msk.msra.mxu1 %vm6530_vm1, %v5064_v49 }
0x12f3   :  { %v2821_v58 = vpop.xlane.xlu1 %2820 }
0x12f4   :  { %5413 = vrcp.f32 %v2821_v58 }
0x12f7   :  { %v2940_v26 = vpop.permute.xlu1 %2939 }
0x12fb   :  { %v2944_v43 = vpop.permute.xlu1 %2943 }
0x12fe   :  { %v5414_v61 = vpop.eup %5413 }
0x12ff   :  { %v2829_v63 = vmul.f32 %v5414_v61, %v5406_v22 }
0x1301   :  { %4820 = vmatmul.mubr.msk.f32.gmra.mrb[32].mxu1 %vm2285_vm10, %v2829_v63 }
0x1302   :  { %4830 = vmatprep.mubr.msk.f32.mxu1 %vm572_vm3, %v2940_v26 }
0x1305   :  { %4831 = vmatmul.mubr.msk.f32.vlgmr.msra.gmra.mrb[34].mxu1 %vm572_vm3, %v2942_v0 }
0x1306   :  { %4833 = vmatprep.mubr.msk.f32.mxu1 %vm572_vm3, %v2944_v43 }
0x1309   :  { %4834 = vmatmul.mubr.msk.f32.gmra.mrb[36].mxu1 %vm572_vm3, %v2946_v2 }
0x13a1   :  { %v6656_v56 = vpop.f32.mrb[30].mxu1 }
0x13a2   :  { %v6658_v3 = vpop.f32.mrb[31].mxu1 }
0x13d4   :  { %v6660_v4 = vpop.f32.mrb[32].mxu1 }
0x13d5   :  { %v6662_v5 = vpop.f32.mrb[33].mxu1 }
0x13d8   :  { %v4832_v6 = vpop.f32.mrb[34].mxu1 }
0x13d9   :  { %v3057_v7 = vmul.f32 0.35355338, %v4832_v6  ;;  %v3037_v8 = vpop.f32.mrb[35].mxu1 }
0x13da   :  { %v3056_v9 = vmul.f32 0.35355338, %v3037_v8 }
0x13db   :  { %v3061_v11 = vsel %vm2501_vm2, %v3057_v7, -1e+30 }
0x13dc   :  { %v4835_v12 = vpop.f32.mrb[36].mxu1  ;;  %v3067_v13 = vsel %vm2285_vm10, %v3061_v11, -inf  ;;  %v3060_v14 = vsel %vm2500_vm11, %v3056_v9, -1e+30 }
0x13dd   :  { %v3059_v15 = vmul.f32 0.35355338, %v4835_v12  ;;  %3068 = vmax.xlane.f32.xlu0 %v3067_v13  ;;  %v3047_v17 = vpop.f32.mrb[37].mxu1  ;;  %v3064_v18 = vsel %vm2285_vm10, %v3060_v14, -inf }
0x13de   :  { %v3058_v19 = vmul.f32 0.35355338, %v3047_v17  ;;  %3065 = vmax.xlane.f32.xlu1 %v3064_v18 }
0x13df   :  { %v3063_v22 = vsel %vm2503_vm12, %v3059_v15, -1e+30 }
0x13e0   :  { %v3073_v39 = vsel %vm2285_vm10, %v3063_v22, -inf  ;;  %v3062_v35 = vsel %vm2502_vm13, %v3058_v19, -1e+30 }
0x13e1   :  { %v3070_v38 = vsel %vm2285_vm10, %v3062_v35, -inf }
0x13e2   :  { %3074 = vmax.xlane.f32.xlu1 %v3073_v39  ;;  %3071 = vmax.xlane.f32.xlu0 %v3070_v38 }
0x13f3   :  { %5327 = vrot.lane.b32.xlu1 %v6525_v40, %s5924_s28 }
0x13f8   :  { %5322 = vrot.lane.b32.xlu0 %v6516_v53, %s5924_s28 }
0x146a   :  { %v3069_v24 = vpop.xlane.xlu0 %3068 }
0x146b   :  { %v3077_v25 = vsub.f32 %v3061_v11, %v3069_v24  ;;  %v3066_v28 = vpop.xlane.xlu1 %3065 }
0x146c   :  { %v3076_v62 = vsub.f32 %v3060_v14, %v3066_v28 }
0x146d   :  { %v3082_v37 = vmul.f32 1.442695, %v3077_v25 }
0x146e   :  { %v3080_v41 = vmul.f32 1.442695, %v3076_v62 }
0x146f   :  { %5415 = vpow2.f32 %v3082_v37  ;;  %v3075_v42 = vpop.xlane.xlu1 %3074  ;;  %v3072_v31 = vpop.xlane.xlu0 %3071 }
0x1470   :  { %5417 = vpow2.f32 %v3080_v41  ;;  %v3078_v59 = vsub.f32 %v3062_v35, %v3072_v31  ;;  %v3079_v8 = vsub.f32 %v3063_v22, %v3075_v42 }
0x1472   :  { %v3084_v45 = vmul.f32 1.442695, %v3078_v59  ;;  %v3086_v9 = vmul.f32 1.442695, %v3079_v8 }
0x1473   :  { %v5328_v46 = vpop.permute.xlu1 %5327  ;;  %v5323_v48 = vpop.permute.xlu0 %5322 }
0x1474   :  { %v5325_v49 = vunpack.i.h.bf16 %v5323_v48  ;;  %5419 = vpow2.f32 %v3084_v45  ;;  %v5330_v52 = vunpack.i.h.bf16 %v5328_v46  ;;  %v5329_v57 = vunpack.i.l.bf16 %v5328_v46 }
0x1475   :  { %v5324_v58 = vunpack.i.l.bf16 %v5323_v48  ;;  %5421 = vpow2.f32 %v3086_v9 }
0x1476   :  { %v5074_v63 = vpack.c.bf16 %v5330_v52, %v5329_v57 }
0x1477   :  { %v5070_v61 = vpack.c.bf16 %v5325_v49, %v5324_v58 }
0x1479   :  { %v5416_v26 = vpop.eup %5415  ;;  %5071 = vmatprep.subr.bf16.mxu0 %v5070_v61 }
0x147a   :  { %v5418_v0 = vpop.eup %5417  ;;  %5073 = vmatpush3.bf16.msra.mxu0 %v5070_v61  ;;  %v3091_v43 = vsel %vm2285_vm10, %v5416_v26, 0.0 }
0x147b   :  { %5075 = vmatprep.subr.bf16.mxu0 %v5074_v63  ;;  %3092 = vadd.xlane.f32.xlu1 %v3091_v43  ;;  %v3088_v2 = vsel %vm2285_vm10, %v5418_v0, 0.0 }
0x147c   :  { %3089 = vadd.xlane.f32.xlu0 %v3088_v2 }
0x147e   :  { %5077 = vmatpush3.bf16.msra.mxu0 %v5074_v63  ;;  %v5420_v6 = vpop.eup %5419 }
0x147f   :  { %v3094_v7 = vsel %vm2285_vm10, %v5420_v6, 0.0  ;;  %v5422_v11 = vpop.eup %5421 }
0x1480   :  { %3095 = vadd.xlane.f32.xlu0 %v3094_v7  ;;  %v3097_v12 = vsel %vm2285_vm10, %v5422_v11, 0.0 }
0x148c   :  { %5332 = vrot.lane.b32.xlu1 %v6516_v53, %s5925_s6 }
0x1496   :  { %5337 = vrot.lane.b32.xlu0 %v6525_v40, %s5925_s6 }
0x149a   :  { %3219 = vrot.lane.b32.xlu0 %v6508_v34, %s5918_s14 }
0x149e   :  { %3223 = vrot.lane.b32.xlu0 %v6518_v44, %s5918_s14 }
0x14b0   :  { %3098 = vadd.xlane.f32.xlu1 %v3097_v12 }
0x14c1   :  { %3217 = vrot.lane.b32.xlu1 %v6510_v16, %s5918_s14 }
0x14c5   :  { %3221 = vrot.lane.b32.xlu1 %v6520_v55, %s5918_s14 }
0x1508   :  { %v3093_v13 = vpop.xlane.xlu1 %3092 }
0x1509   :  { %5423 = vrcp.f32 %v3093_v13  ;;  %v3090_v14 = vpop.xlane.xlu0 %3089 }
0x150a   :  { %5425 = vrcp.f32 %v3090_v14 }
0x150c   :  { %v5333_v34 = vpop.permute.xlu1 %5332 }
0x150d   :  { %v5335_v15 = vunpack.i.h.bf16 %v5333_v34  ;;  %v5334_v17 = vunpack.i.l.bf16 %v5333_v34  ;;  %v3096_v18 = vpop.xlane.xlu0 %3095 }
0x150e   :  { %5427 = vrcp.f32 %v3096_v18 }
0x150f   :  { %v5078_v44 = vpack.c.bf16 %v5335_v15, %v5334_v17 }
0x1511   :  { %5080 = vmatprep.subr.msk.bf16.mxu0 %vm6530_vm1, %v5078_v44  ;;  %v5338_v19 = vpop.permute.xlu0 %5337 }
0x1512   :  { %v5340_v16 = vunpack.i.h.bf16 %v5338_v19  ;;  %v5339_v35 = vunpack.i.l.bf16 %v5338_v19 }
0x1513   :  { %v5424_v22 = vpop.eup %5423 }
0x1514   :  { %v5426_v39 = vpop.eup %5425  ;;  %v3105_v55 = vmul.f32 %v5424_v22, %v5416_v26  ;;  %v5084_v24 = vpack.c.bf16 %v5340_v16, %v5339_v35 }
0x1515   :  { %v3104_v38 = vmul.f32 %v5426_v39, %v5418_v0  ;;  %v3220_v31 = vpop.permute.xlu0 %3219 }
0x1517   :  { %4844 = vmatprep.mubr.msk.f32.mxu0 %vm2285_vm10, %v3104_v38 }
0x1518   :  { %4845 = vmatmul.mubr.msk.f32.vlgmr.msra.gmra.mrb[36].mxu0 %vm2285_vm10, %v3105_v55  ;;  %v5428_v25 = vpop.eup %5427 }
0x1519   :  { %5083 = vmatpush3.bf16.xpose.msk.msra.mxu0 %vm6530_vm1, %v5078_v44  ;;  %v3106_v28 = vmul.f32 %v5428_v25, %v5420_v6  ;;  %v3224_v45 = vpop.permute.xlu0 %3223 }
0x151a   :  { %5086 = vmatprep.subr.msk.bf16.mxu0 %vm6530_vm1, %v5084_v24 }
0x151b   :  { %4847 = vmatprep.mubr.msk.f32.mxu0 %vm2285_vm10, %v3106_v28 }
0x1521   :  { %5089 = vmatpush3.bf16.xpose.msk.msra.mxu0 %vm6530_vm1, %v5084_v24 }
0x153d   :  { %v3099_v62 = vpop.xlane.xlu1 %3098 }
0x153e   :  { %5429 = vrcp.f32 %v3099_v62 }
0x1541   :  { %v3218_v41 = vpop.permute.xlu1 %3217 }
0x1545   :  { %v3222_v59 = vpop.permute.xlu1 %3221 }
0x1548   :  { %v5430_v37 = vpop.eup %5429 }
0x1549   :  { %v3107_v42 = vmul.f32 %v5430_v37, %v5422_v11 }
0x154b   :  { %4848 = vmatmul.mubr.msk.f32.gmra.mrb[38].mxu0 %vm2285_vm10, %v3107_v42 }
0x154c   :  { %4858 = vmatprep.mubr.msk.f32.mxu0 %vm572_vm3, %v3218_v41 }
0x154f   :  { %4859 = vmatmul.mubr.msk.f32.vlgmr.msra.gmra.mrb[40].mxu0 %vm572_vm3, %v3220_v31 }
0x1550   :  { %4861 = vmatprep.mubr.msk.f32.mxu0 %vm572_vm3, %v3222_v59 }
0x1553   :  { %4862 = vmatmul.mubr.msk.f32.gmra.mrb[42].mxu0 %vm572_vm3, %v3224_v45 }
0x15eb   :  { %v4846_v47 = vpop.f32.mrb[36].mxu0 }
0x15ec   :  { %v3198_v46 = vpop.f32.mrb[37].mxu0 }
0x161e   :  { %v4849_v48 = vpop.f32.mrb[38].mxu0 }
0x161f   :  { %v3208_v49 = vpop.f32.mrb[39].mxu0 }
0x1622   :  { %v4860_v52 = vpop.f32.mrb[40].mxu0 }
0x1623   :  { %v3335_v57 = vmul.f32 0.35355338, %v4860_v52  ;;  %v3315_v58 = vpop.f32.mrb[41].mxu0 }
0x1624   :  { %v3334_v61 = vmul.f32 0.35355338, %v3315_v58 }
0x1625   :  { %v3339_v26 = vsel %vm2501_vm2, %v3335_v57, -1e+30 }
0x1626   :  { %v3338_v63 = vsel %vm2500_vm11, %v3334_v61, -1e+30  ;;  %v4863_v0 = vpop.f32.mrb[42].mxu0  ;;  %v3345_v43 = vsel %vm2285_vm10, %v3339_v26, -inf  ;;  %v3555_v61 = vld [vmem:[%s6885_s9] sm:$0xff] }
0x1627   :  { %v3337_v2 = vmul.f32 0.35355338, %v4863_v0  ;;  %3346 = vmax.xlane.f32.xlu0 %v3345_v43  ;;  %v3325_v6 = vpop.f32.mrb[43].mxu0  ;;  %v3342_v7 = vsel %vm2285_vm10, %v3338_v63, -inf  ;;  %v3558_v43 = vld [vmem:[%s6885_s9 + $0x18] sm:$0xff] }
0x1628   :  { %v3336_v8 = vmul.f32 0.35355338, %v3325_v6  ;;  %3343 = vmax.xlane.f32.xlu1 %v3342_v7 }
0x1629   :  { %v3341_v9 = vsel %vm2503_vm12, %v3337_v2, -1e+30 }
0x162a   :  { %v3351_v11 = vsel %vm2285_vm10, %v3341_v9, -inf  ;;  %v3340_v60 = vsel %vm2502_vm13, %v3336_v8, -1e+30 }
0x162b   :  { %v3348_v27 = vsel %vm2285_vm10, %v3340_v60, -inf }
0x162c   :  { %3352 = vmax.xlane.f32.xlu1 %v3351_v11  ;;  %3349 = vmax.xlane.f32.xlu0 %v3348_v27 }
0x16b4   :  { %v3347_v12 = vpop.xlane.xlu0 %3346 }
0x16b5   :  { %v3355_v13 = vsub.f32 %v3339_v26, %v3347_v12  ;;  %v3344_v14 = vpop.xlane.xlu1 %3343  ;;  %v3556_v26 = vld [vmem:[%s6885_s9 + $0x8] sm:$0xff] }
0x16b6   :  { %v3354_v34 = vsub.f32 %v3338_v63, %v3344_v14  ;;  %v3557_v63 = vld [vmem:[%s6885_s9 + $0x10] sm:$0xff]  ;;  %v5098_v0 = vpack.c.bf16 %v3556_v26, %v3555_v61 }
0x16b7   :  { %v3360_v15 = vmul.f32 1.442695, %v3355_v13  ;;  %v5102_v2 = vpack.c.bf16 %v3558_v43, %v3557_v63 }
0x16b8   :  { %v3358_v17 = vmul.f32 1.442695, %v3354_v34 }
0x16b9   :  { %5431 = vpow2.f32 %v3360_v15  ;;  %v3353_v18 = vpop.xlane.xlu1 %3352  ;;  %v3350_v44 = vpop.xlane.xlu0 %3349 }
0x16ba   :  { %5433 = vpow2.f32 %v3358_v17  ;;  %v3357_v54 = vsub.f32 %v3341_v9, %v3353_v18  ;;  %v3356_v19 = vsub.f32 %v3340_v60, %v3350_v44 }
0x16bc   :  { %v3364_v22 = vmul.f32 1.442695, %v3357_v54  ;;  %v3362_v39 = vmul.f32 1.442695, %v3356_v19 }
0x16be   :  { %5435 = vpow2.f32 %v3364_v22 }
0x16bf   :  { %5437 = vpow2.f32 %v3362_v39 }
0x16c3   :  { %v5432_v51 = vpop.eup %5431 }
0x16c4   :  { %v5434_v16 = vpop.eup %5433  ;;  %v3369_v35 = vsel %vm2285_vm10, %v5432_v51, 0.0 }
0x16c5   :  { %3370 = vadd.xlane.f32.xlu1 %v3369_v35  ;;  %v3366_v38 = vsel %vm2285_vm10, %v5434_v16, 0.0 }
0x16c6   :  { %3367 = vadd.xlane.f32.xlu0 %v3366_v38 }
0x16c8   :  { %v5436_v55 = vpop.eup %5435 }
0x16c9   :  { %v5438_v24 = vpop.eup %5437  ;;  %v3375_v25 = vsel %vm2285_vm10, %v5436_v55, 0.0 }
0x16ca   :  { %3376 = vadd.xlane.f32.xlu1 %v3375_v25  ;;  %v3372_v28 = vsel %vm2285_vm10, %v5438_v24, 0.0 }
0x16cb   :  { %3373 = vadd.xlane.f32.xlu0 %v3372_v28 }
0x16db   :  { %5347 = vrot.lane.b32.xlu1 %v6525_v40, %s5926_s19 }
0x16df   :  { %3499 = vrot.lane.b32.xlu1 %v6658_v3, %s5889_s2 }
0x16e1   :  { %5342 = vrot.lane.b32.xlu0 %v6516_v53, %s5926_s19 }
0x16e3   :  { %3515 = vrot.lane.b32.xlu1 %v3198_v46, %s5927_s0 }
0x16e5   :  { %3501 = vrot.lane.b32.xlu0 %v6656_v56, %s5889_s2 }
0x16e7   :  { %3503 = vrot.lane.b32.xlu1 %v6662_v5, %s5889_s2 }
0x16e9   :  { %3517 = vrot.lane.b32.xlu0 %v4846_v47, %s5927_s0 }
0x16eb   :  { %3519 = vrot.lane.b32.xlu1 %v3208_v49, %s5927_s0 }
0x16ed   :  { %3505 = vrot.lane.b32.xlu0 %v6660_v4, %s5889_s2  ;;  %s5928_s2 = smov 24  }
0x16f1   :  { %3521 = vrot.lane.b32.xlu0 %v4849_v48, %s5927_s0 }
0x1752   :  { %v3371_v40 = vpop.xlane.xlu1 %3370 }
0x1753   :  { %v3368_v62 = vpop.xlane.xlu0 %3367 }
0x1754   :  { %5439 = vrcp.f32 %v3368_v62 }
0x1755   :  { %5441 = vrcp.f32 %v3371_v40 }
0x1757   :  { %v3377_v3 = vpop.xlane.xlu1 %3376 }
0x1758   :  { %v3374_v37 = vpop.xlane.xlu0 %3373 }
0x1759   :  { %5443 = vrcp.f32 %v3374_v37 }
0x175a   :  { %5445 = vrcp.f32 %v3377_v3 }
0x175b   :  { %v5348_v53 = vpop.permute.xlu1 %5347 }
0x175c   :  { %v5343_v41 = vpop.permute.xlu0 %5342  ;;  %v5350_v42 = vunpack.i.h.bf16 %v5348_v53  ;;  %v5349_v56 = vunpack.i.l.bf16 %v5348_v53 }
0x175d   :  { %v5345_v31 = vunpack.i.h.bf16 %v5343_v41  ;;  %v5344_v59 = vunpack.i.l.bf16 %v5343_v41 }
0x175e   :  { %v5440_v5 = vpop.eup %5439  ;;  %v5094_v4 = vpack.c.bf16 %v5350_v42, %v5349_v56 }
0x175f   :  { %v5090_v45 = vpack.c.bf16 %v5345_v31, %v5344_v59  ;;  %v3382_v47 = vmul.f32 %v5440_v5, %v5434_v16  ;;  %v5442_v46 = vpop.eup %5441  ;;  %v3500_v60 = vpop.permute.xlu1 %3499 }
0x1760   :  { %v3383_v49 = vmul.f32 %v5442_v46, %v5432_v51  ;;  %v3502_v11 = vpop.permute.xlu0 %3501  ;;  %v3543_v17 = vsel %vm572_vm3, %v6606_v30, %v3500_v60  ;;  %v3738_v60 = vld [vmem:[%s6887_s29 + $0x8] sm:$0xff] }
0x1761   :  { %5091 = vmatprep.subr.bf16.mxu1 %v5090_v45  ;;  %4872 = vmatprep.mubr.msk.f32.mxu1 %vm2285_vm10, %v3382_v47  ;;  %v3544_v44 = vsel %vm572_vm3, %v6604_v33, %v3502_v11  ;;  %v3737_v11 = vld [vmem:[%s6887_s29] sm:$0xff] }
0x1762   :  { %5093 = vmatpush3.bf16.msra.mxu1 %v5090_v45 }
0x1763   :  { %5095 = vmatprep.subr.bf16.mxu1 %v5094_v4  ;;  %v5444_v48 = vpop.eup %5443  ;;  %v3516_v12 = vpop.permute.xlu1 %3515 }
0x1764   :  { %v5446_v52 = vpop.eup %5445  ;;  %v3384_v57 = vmul.f32 %v5444_v48, %v5438_v24  ;;  %v3518_v27 = vpop.permute.xlu0 %3517  ;;  %v3547_v54 = vsel %vm731_vm5, %v3543_v17, %v3516_v12  ;;  %v3739_v12 = vld [vmem:[%s6887_s29 + $0x10] sm:$0xff] }
0x1765   :  { %v3385_v58 = vmul.f32 %v5446_v52, %v5436_v55  ;;  %v3548_v22 = vsel %vm731_vm5, %v3544_v44, %v3518_v27  ;;  %v5106_v27 = vpack.c.bf16 %v3738_v60, %v3737_v11  ;;  %v3851_v17 = vld [vmem:[%s6888_s7 + $0x10] sm:$0xff]  ;;  %v3852_v44 = vld [vmem:[%s6888_s7 + $0x18] sm:$0xff] }
0x1766   :  { %5097 = vmatpush3.bf16.msra.mxu1 %v5094_v4 }
0x1767   :  { %5099 = vmatprep.subr.bf16.mxu1 %v5098_v0  ;;  %v3504_v14 = vpop.permute.xlu1 %3503  ;;  %5107 = vmatprep.subr.bf16.mxu0 %v5106_v27 }
0x1768   :  { %v3506_v13 = vpop.permute.xlu0 %3505  ;;  %v3545_v16 = vsel %vm572_vm3, %v6610_v21, %v3504_v14  ;;  %v4345_v21 = vld [vmem:[%s6886_s20] ss:$0 sm:$0xff]  ;;  %5109 = vmatpush3.bf16.msra.mxu0 %v5106_v27 }
0x1769   :  { %4873 = vmatmul.mubr.msk.f32.vlgmr.msra.gmra.mrb[38].mxu1 %vm2285_vm10, %v3383_v49  ;;  %v3546_v33 = vsel %vm572_vm3, %v6608_v20, %v3506_v13  ;;  %v3740_v13 = vld [vmem:[%s6887_s29 + $0x18] sm:$0xff]  ;;  %vm3864_vm3 = vcmask 523264  }
0x176a   :  { %4875 = vmatprep.mubr.msk.f32.mxu1 %vm2285_vm10, %v3384_v57  ;;  %5101 = vmatpush3.bf16.msra.mxu1 %v5098_v0  ;;  %v5110_v14 = vpack.c.bf16 %v3740_v13, %v3739_v12  ;;  %v4355_v12 = vld [vmem:[%s6890_s21] ss:$0 sm:$0xff] }
0x176b   :  { %5103 = vmatprep.subr.bf16.mxu1 %v5102_v2  ;;  %v3520_v15 = vpop.permute.xlu1 %3519 }
0x176c   :  { %v3522_v34 = vpop.permute.xlu0 %3521  ;;  %v3549_v35 = vsel %vm731_vm5, %v3545_v16, %v3520_v15  ;;  %5111 = vmatprep.subr.bf16.mxu0 %v5110_v14  ;;  %v3850_v15 = vld [vmem:[%s6888_s7 + $0x8] sm:$0xff] }
0x176d   :  { %4876 = vmatmul.mubr.msk.f32.gmra.mrb[40].mxu1 %vm2285_vm10, %v3385_v58  ;;  %v3550_v55 = vsel %vm731_vm5, %v3546_v33, %v3522_v34  ;;  %5113 = vmatpush3.bf16.msra.mxu0 %v5110_v14  ;;  %v3849_v34 = vld [vmem:[%s6888_s7] sm:$0xff] }
0x176e   :  { %5105 = vmatpush3.bf16.msra.mxu1 %v5102_v2  ;;  %5130 = vmatprep.subr.bf16.mxu0 %v5907_v10 }
0x183c   :  { %v4874_v6 = vpop.f32.mrb[38].mxu1 }
0x183d   :  { %3533 = vrot.lane.b32.xlu0 %v4874_v6, %s5928_s2  ;;  %v3476_v7 = vpop.f32.mrb[39].mxu1 }
0x183e   :  { %3531 = vrot.lane.b32.xlu1 %v3476_v7, %s5928_s2 }
0x1840   :  { %v4877_v8 = vpop.f32.mrb[40].mxu1 }
0x1841   :  { %3537 = vrot.lane.b32.xlu0 %v4877_v8, %s5928_s2  ;;  %v3486_v9 = vpop.f32.mrb[41].mxu1 }
0x1842   :  { %3535 = vrot.lane.b32.xlu1 %v3486_v9, %s5928_s2 }
0x18af   :  { %v3534_v18 = vpop.permute.xlu0 %3533 }
0x18b0   :  { %v3532_v19 = vpop.permute.xlu1 %3531  ;;  %v3552_v51 = vsel %vm465_vm4, %v3548_v22, %v3534_v18  ;;  %v5114_v18 = vpack.c.bf16 %v3850_v15, %v3849_v34  ;;  %v3854_v22 = vld [vmem:[%s6888_s7 + $0x28] sm:$0xff] }
0x18b1   :  { %v3551_v39 = vsel %vm465_vm4, %v3547_v54, %v3532_v19  ;;  %v5118_v54 = vpack.c.bf16 %v3852_v44, %v3851_v17  ;;  %v3853_v19 = vld [vmem:[%s6888_s7 + $0x20] sm:$0xff] }
0x18b2   :  { %4886 = vmatprep.mubr.msk.f32.mxu1 %vm2285_vm10, %v3551_v39  ;;  %5115 = vmatprep.subr.bf16.mxu1 %v5114_v18  ;;  %v5122_v39 = vpack.c.bf16 %v3854_v22, %v3853_v19 }
0x18b3   :  { %4887 = vmatmul.mubr.msk.f32.vlgmr.msra.gmra.mrb[42].mxu1 %vm2285_vm10, %v3552_v51  ;;  %v3538_v30 = vpop.permute.xlu0 %3537 }
0x18b4   :  { %v3536_v38 = vpop.permute.xlu1 %3535  ;;  %v3554_v25 = vsel %vm465_vm4, %v3550_v55, %v3538_v30  ;;  %5117 = vmatpush3.bf16.msra.mxu1 %v5114_v18 }
0x18b5   :  { %v3553_v24 = vsel %vm465_vm4, %v3549_v35, %v3536_v38  ;;  %5119 = vmatprep.subr.bf16.mxu1 %v5118_v54  ;;  %vm4192_vm4 = vcmask 3072  }
0x18b6   :  { %4889 = vmatprep.mubr.msk.f32.mxu1 %vm2285_vm10, %v3553_v24 }
0x18b7   :  { %4890 = vmatmul.mubr.msk.f32.gmra.mrb[44].mxu1 %vm2285_vm10, %v3554_v25  ;;  %v6803_v25 = vshrl.u32 %v1895_v50, 7 }
0x18b8   :  { %5121 = vmatpush3.bf16.msra.mxu1 %v5118_v54 }
0x18b9   :  { %5123 = vmatprep.subr.bf16.mxu1 %v5122_v39 }
0x18bc   :  { %5125 = vmatpush3.bf16.msra.mxu1 %v5122_v39 }
0x1986   :  { %v4888_v28 = vpop.f32.mrb[42].mxu1 }
0x1987   :  { %v3650_v40 = vadd.f32 %v4888_v28, %v4345_v21  ;;  %v3644_v62 = vpop.f32.mrb[43].mxu1 }
0x1988   :  { %v3645_v3 = vadd.f32 %v4345_v21, %v3644_v62 }
0x1989   :  { %v3665_v20 = vadd.f32 %v3650_v40, %v6494_v23 }
0x198a   :  { %v3664_v37 = vadd.f32 %v3645_v3, %v6492_v36  ;;  %v4891_v53 = vpop.f32.mrb[44].mxu1  ;;  %v3723_v3 = vsub.s32 0, %v6803_v25 }
0x198b   :  { %v3660_v41 = vadd.f32 %v4891_v53, %v4345_v21  ;;  %v3654_v42 = vpop.f32.mrb[45].mxu1  ;;  %v3671_v56 = vsel %vm2285_vm10, %v3665_v20, 0.0 }
0x198c   :  { %v3655_v31 = vadd.f32 %v4345_v21, %v3654_v42  ;;  %3672 = vadd.xlane.f32.xlu0 %v3671_v56  ;;  %v3668_v59 = vsel %vm2285_vm10, %v3664_v37, 0.0 }
0x198d   :  { %v3667_v5 = vadd.f32 %v3660_v41, %v6502_v32  ;;  %3669 = vadd.xlane.f32.xlu1 %v3668_v59 }
0x198e   :  { %v3666_v45 = vadd.f32 %v3655_v31, %v6500_v29 }
0x198f   :  { %v3677_v47 = vsel %vm2285_vm10, %v3667_v5, 0.0 }
0x1990   :  { %v3674_v23 = vsel %vm2285_vm10, %v3666_v45, 0.0 }
0x1991   :  { %3675 = vadd.xlane.f32.xlu0 %v3674_v23  ;;  %3678 = vadd.xlane.f32.xlu1 %v3677_v47 }
0x1a19   :  { %v3673_v36 = vpop.xlane.xlu0 %3672 }
0x1a1a   :  { %v3682_v4 = vmul.f32 0.03125, %v3673_v36  ;;  %v3670_v46 = vpop.xlane.xlu1 %3669 }
0x1a1b   :  { %v3681_v48 = vmul.f32 0.03125, %v3670_v46 }
0x1a1c   :  { %v6771_v49 = vsub.f32 %v3665_v20, %v3682_v4  ;;  %v6807_v20 = vld [vmem:[%s6077_s4] sm:$0xf]  ;;  %s6889_s4 = sld [smem:[#allocation49_spill]] }
0x1a1d   :  { %v6773_v52 = vsub.f32 %v3664_v37, %v3681_v48  ;;  %v3731_v37 = vsub.s32 1, %v6803_v25  ;;  %v3724_v53 = vrot.slane %v6807_v20, %v3723_v3 }
0x1a1e   :  { %v3676_v57 = vpop.xlane.xlu0 %3675  ;;  %v3679_v58 = vpop.xlane.xlu1 %3678  ;;  %v3690_v32 = vmul.f32 %v6771_v49, %v6771_v49 }
0x1a1f   :  { %v3683_v29 = vmul.f32 0.03125, %v3676_v57  ;;  %v3684_v61 = vmul.f32 0.03125, %v3679_v58  ;;  %v3689_v26 = vmul.f32 %v6773_v52, %v6773_v52  ;;  %v3732_v31 = vrot.slane %v6807_v20, %v3731_v37  ;;  %v3855_v58 = vld [vmem:[%s6888_s7 + $0x30] sm:$0xff] }
0x1a20   :  { %v3696_v63 = vsel %vm2285_vm10, %v3690_v32, 0.0  ;;  %v3856_v32 = vld [vmem:[%s6888_s7 + $0x38] sm:$0xff] }
0x1a21   :  { %v6780_v0 = vsub.f32 %v3666_v45, %v3683_v29  ;;  %v6782_v43 = vsub.f32 %v3667_v5, %v3684_v61  ;;  %3697 = vadd.xlane.f32.xlu1 %v3696_v63  ;;  %v3693_v2 = vsel %vm2285_vm10, %v3689_v26, 0.0  ;;  %v5126_v29 = vpack.c.bf16 %v3856_v32, %v3855_v58 }
0x1a22   :  { %3694 = vadd.xlane.f32.xlu0 %v3693_v2  ;;  %v4350_v61 = vld [vmem:[%s6889_s4] ss:$0 sm:$0xff] }
0x1a23   :  { %v3691_v6 = vmul.f32 %v6780_v0, %v6780_v0  ;;  %v3692_v7 = vmul.f32 %v6782_v43, %v6782_v43  ;;  %5127 = vmatprep.subr.bf16.mxu1 %v5126_v29 }
0x1a24   :  { %5129 = vmatpush3.bf16.msra.mxu1 %v5126_v29 }
0x1a25   :  { %v3699_v8 = vsel %vm2285_vm10, %v3691_v6, 0.0  ;;  %v3702_v9 = vsel %vm2285_vm10, %v3692_v7, 0.0 }
0x1a26   :  { %3700 = vadd.xlane.f32.xlu0 %v3699_v8  ;;  %3703 = vadd.xlane.f32.xlu1 %v3702_v9 }
0x1aae   :  { %v3698_v51 = vpop.xlane.xlu1 %3697 }
0x1aaf   :  { %v3706_v16 = vmul.f32 0.03125, %v3698_v51  ;;  %v3695_v30 = vpop.xlane.xlu0 %3694 }
0x1ab0   :  { %v3705_v33 = vmul.f32 0.03125, %v3695_v30 }
0x1ab1   :  { %v3710_v35 = vadd.f32 1e-05, %v3706_v16 }
0x1ab2   :  { %v3709_v38 = vadd.f32 1e-05, %v3705_v33 }
0x1ab3   :  { %5447 = vrsqrt.f32 %v3710_v35  ;;  %v3701_v55 = vpop.xlane.xlu0 %3700  ;;  %v3704_v24 = vpop.xlane.xlu1 %3703 }
0x1ab4   :  { %5449 = vrsqrt.f32 %v3709_v38  ;;  %v3707_v21 = vmul.f32 0.03125, %v3701_v55  ;;  %v3708_v28 = vmul.f32 0.03125, %v3704_v24 }
0x1ab6   :  { %v3711_v40 = vadd.f32 1e-05, %v3707_v21  ;;  %v3712_v62 = vadd.f32 1e-05, %v3708_v28 }
0x1ab8   :  { %5451 = vrsqrt.f32 %v3711_v40 }
0x1ab9   :  { %5453 = vrsqrt.f32 %v3712_v62 }
0x1abd   :  { %v5448_v41 = vpop.eup %5447 }
0x1abe   :  { %v5450_v42 = vpop.eup %5449  ;;  %v3718_v50 = vmul.f32 %v5448_v41, %v6771_v49 }
0x1abf   :  { %v3717_v56 = vmul.f32 %v5450_v42, %v6773_v52 }
0x1ac0   :  { %v3726_v59 = vmul.f32 %v3724_v53, %v3718_v50 }
0x1ac1   :  { %v3725_v5 = vmul.f32 %v3724_v53, %v3717_v56 }
0x1ac2   :  { %v5452_v45 = vpop.eup %5451  ;;  %v3734_v4 = vadd.f32 %v3732_v31, %v3726_v59 }
0x1ac3   :  { %v5454_v47 = vpop.eup %5453  ;;  %v3733_v23 = vadd.f32 %v3732_v31, %v3725_v5  ;;  %v3719_v36 = vmul.f32 %v5452_v45, %v6780_v0 }
0x1ac4   :  { %v3720_v46 = vmul.f32 %v5454_v47, %v6782_v43 }
0x1ac5   :  { %4900 = vmatprep.mubr.msk.f32.mxu0 %vm2285_vm10, %v3733_v23  ;;  %v3727_v48 = vmul.f32 %v3724_v53, %v3719_v36 }
0x1ac6   :  { %4901 = vmatmul.mubr.msk.f32.vlgmr.msra.gmra.mrb[44].mxu0 %vm2285_vm10, %v3734_v4  ;;  %v3728_v49 = vmul.f32 %v3724_v53, %v3720_v46 }
0x1ac7   :  { %v3735_v52 = vadd.f32 %v3732_v31, %v3727_v48 }
0x1ac8   :  { %v3736_v57 = vadd.f32 %v3732_v31, %v3728_v49 }
0x1ac9   :  { %4903 = vmatprep.mubr.msk.f32.mxu0 %vm2285_vm10, %v3735_v52 }
0x1aca   :  { %4904 = vmatmul.mubr.msk.f32.gmra.mrb[46].mxu0 %vm2285_vm10, %v3736_v57 }
0x1acb   :  { %4936 = vmatprep.mubr.msk.f32.mxu0 %vm5906_vm0, %v5905_v1 }
0x1b99   :  { %v4902_v26 = vpop.f32.mrb[44].mxu0 }
0x1b9a   :  { %v3832_v63 = vadd.f32 %v4902_v26, %v4350_v61  ;;  %v3826_v0 = vpop.f32.mrb[45].mxu0 }
0x1b9b   :  { %v3827_v43 = vadd.f32 %v4350_v61, %v3826_v0  ;;  %v4028_v0 = vsub.s32 3, %v6803_v25 }
0x1b9c   :  { %v3846_v7 = vmax.f32 %v3832_v63, 0.0  ;;  %v4020_v63 = vsub.s32 2, %v6803_v25 }
0x1b9d   :  { %v3845_v2 = vmax.f32 %v3827_v43, 0.0  ;;  %v4905_v6 = vpop.f32.mrb[46].mxu0 }
0x1b9e   :  { %v3842_v8 = vadd.f32 %v4905_v6, %v4350_v61  ;;  %v3836_v9 = vpop.f32.mrb[47].mxu0  ;;  %v4021_v43 = vrot.slane %v6807_v20, %v4020_v63 }
0x1b9f   :  { %v3837_v11 = vadd.f32 %v4350_v61, %v3836_v9  ;;  %4922 = vmatprep.mubr.msk.f32.mxu1 %vm3864_vm3, %v3845_v2 }
0x1ba0   :  { %4923 = vmatmul.mubr.msk.f32.vlgmr.msra.gmra.mrb[46].mxu1 %vm3864_vm3, %v3846_v7  ;;  %v3848_v27 = vmax.f32 %v3842_v8, 0.0  ;;  %v4029_v7 = vrot.slane %v6807_v20, %v4028_v0 }
0x1ba1   :  { %v3847_v60 = vmax.f32 %v3837_v11, 0.0 }
0x1ba3   :  { %4925 = vmatprep.mubr.msk.f32.mxu1 %vm3864_vm3, %v3847_v60 }
0x1ba4   :  { %4926 = vmatmul.mubr.msk.f32.gmra.mrb[48].mxu1 %vm3864_vm3, %v3848_v27 }
0x1c73   :  { %v4924_v13 = vpop.f32.mrb[46].mxu1 }
0x1c74   :  { %v3949_v14 = vadd.f32 %v4924_v13, %v4355_v12  ;;  %v3943_v34 = vpop.f32.mrb[47].mxu1 }
0x1c75   :  { %v3944_v15 = vadd.f32 %v4355_v12, %v3943_v34 }
0x1c76   :  { %v3963_v17 = vadd.f32 %v3949_v14, %v3734_v4 }
0x1c77   :  { %v3962_v18 = vadd.f32 %v3944_v15, %v3733_v23  ;;  %v4927_v44 = vpop.f32.mrb[48].mxu1 }
0x1c78   :  { %v3959_v54 = vadd.f32 %v4927_v44, %v4355_v12  ;;  %v3953_v19 = vpop.f32.mrb[49].mxu1  ;;  %v3969_v22 = vsel %vm2285_vm10, %v3963_v17, 0.0 }
0x1c79   :  { %v3954_v39 = vadd.f32 %v4355_v12, %v3953_v19  ;;  %3970 = vadd.xlane.f32.xlu1 %v3969_v22  ;;  %v3966_v51 = vsel %vm2285_vm10, %v3962_v18, 0.0  ;;  %v4109_v19 = vld [vmem:[%s6082_s5 + $0x8] sm:$0xff] }
0x1c7a   :  { %v3965_v16 = vadd.f32 %v3959_v54, %v3736_v57  ;;  %3967 = vadd.xlane.f32.xlu0 %v3966_v51  ;;  %v4108_v54 = vld [vmem:[%s6082_s5] sm:$0xff] }
0x1c7b   :  { %v3964_v30 = vadd.f32 %v3954_v39, %v3735_v52  ;;  %v4034_v39 = vld [vmem:[#allocation11] sm:$0xf]  ;;  %v5137_v51 = vpack.c.bf16 %v4109_v19, %v4108_v54 }
0x1c7c   :  { %v3975_v33 = vsel %vm2285_vm10, %v3965_v16, 0.0 }
0x1c7d   :  { %3976 = vadd.xlane.f32.xlu1 %v3975_v33  ;;  %v3972_v35 = vsel %vm2285_vm10, %v3964_v30, 0.0 }
0x1c7e   :  { %3973 = vadd.xlane.f32.xlu0 %v3972_v35 }
0x1d06   :  { %v3971_v38 = vpop.xlane.xlu1 %3970 }
0x1d07   :  { %v3979_v55 = vmul.f32 0.03125, %v3971_v38  ;;  %v3968_v24 = vpop.xlane.xlu0 %3967 }
0x1d08   :  { %v3978_v21 = vmul.f32 0.03125, %v3968_v24 }
0x1d09   :  { %v3983_v28 = vsub.f32 %v3963_v17, %v3979_v55  ;;  %v4361_v55 = vld [vmem:[#allocation2] ss:$0 sm:$0xff] }
0x1d0a   :  { %v3982_v40 = vsub.f32 %v3962_v18, %v3978_v21  ;;  %v3977_v62 = vpop.xlane.xlu1 %3976 }
0x1d0b   :  { %v3981_v3 = vmul.f32 0.03125, %v3977_v62  ;;  %v3974_v37 = vpop.xlane.xlu0 %3973  ;;  %v3987_v53 = vmul.f32 %v3983_v28, %v3983_v28 }
0x1d0c   :  { %v3980_v41 = vmul.f32 0.03125, %v3974_v37  ;;  %v3986_v42 = vmul.f32 %v3982_v40, %v3982_v40 }
0x1d0d   :  { %v3985_v50 = vsub.f32 %v3965_v16, %v3981_v3  ;;  %v3993_v56 = vsel %vm2285_vm10, %v3987_v53, 0.0  ;;  %v4110_v16 = vld [vmem:[%s6082_s5 + $0x10] sm:$0xff] }
0x1d0e   :  { %v3984_v31 = vsub.f32 %v3964_v30, %v3980_v41  ;;  %3994 = vadd.xlane.f32.xlu1 %v3993_v56  ;;  %v3990_v59 = vsel %vm2285_vm10, %v3986_v42, 0.0  ;;  %v4111_v30 = vld [vmem:[%s6082_s5 + $0x18] sm:$0xff] }
0x1d0f   :  { %3991 = vadd.xlane.f32.xlu0 %v3990_v59  ;;  %v3989_v5 = vmul.f32 %v3985_v50, %v3985_v50  ;;  %v5140_v33 = vpack.c.bf16 %v4111_v30, %v4110_v16 }
0x1d10   :  { %v3988_v45 = vmul.f32 %v3984_v31, %v3984_v31 }
0x1d11   :  { %v3999_v47 = vsel %vm2285_vm10, %v3989_v5, 0.0 }
0x1d12   :  { %4000 = vadd.xlane.f32.xlu1 %v3999_v47  ;;  %v3996_v23 = vsel %vm2285_vm10, %v3988_v45, 0.0 }
0x1d13   :  { %3997 = vadd.xlane.f32.xlu0 %v3996_v23 }
0x1d9b   :  { %v3995_v36 = vpop.xlane.xlu1 %3994 }
0x1d9c   :  { %v4003_v4 = vmul.f32 0.03125, %v3995_v36  ;;  %v3992_v46 = vpop.xlane.xlu0 %3991 }
0x1d9d   :  { %v4002_v48 = vmul.f32 0.03125, %v3992_v46 }
0x1d9e   :  { %v4007_v49 = vadd.f32 1e-05, %v4003_v4 }
0x1d9f   :  { %v4006_v52 = vadd.f32 1e-05, %v4002_v48  ;;  %v4001_v57 = vpop.xlane.xlu1 %4000 }
0x1da0   :  { %5455 = vrsqrt.f32 %v4007_v49  ;;  %v4005_v58 = vmul.f32 0.03125, %v4001_v57  ;;  %v3998_v32 = vpop.xlane.xlu0 %3997 }
0x1da1   :  { %5457 = vrsqrt.f32 %v4006_v52  ;;  %v4004_v29 = vmul.f32 0.03125, %v3998_v32 }
0x1da2   :  { %v4009_v61 = vadd.f32 1e-05, %v4005_v58 }
0x1da3   :  { %v4008_v26 = vadd.f32 1e-05, %v4004_v29 }
0x1da4   :  { %5459 = vrsqrt.f32 %v4009_v61 }
0x1da5   :  { %5461 = vrsqrt.f32 %v4008_v26 }
0x1daa   :  { %v5456_v2 = vpop.eup %5455 }
0x1dab   :  { %v5458_v6 = vpop.eup %5457  ;;  %v4015_v8 = vmul.f32 %v5456_v2, %v3983_v28 }
0x1dac   :  { %v4014_v9 = vmul.f32 %v5458_v6, %v3982_v40 }
0x1dad   :  { %v4023_v11 = vmul.f32 %v4021_v43, %v4015_v8 }
0x1dae   :  { %v5460_v60 = vpop.eup %5459  ;;  %v4022_v27 = vmul.f32 %v4021_v43, %v4014_v9 }
0x1daf   :  { %v5462_v12 = vpop.eup %5461  ;;  %v4017_v13 = vmul.f32 %v5460_v60, %v3985_v50  ;;  %v4031_v14 = vadd.f32 %v4029_v7, %v4023_v11 }
0x1db0   :  { %v4016_v34 = vmul.f32 %v5462_v12, %v3984_v31  ;;  %v4030_v15 = vadd.f32 %v4029_v7, %v4022_v27 }
0x1db1   :  { %v4025_v25 = vmul.f32 %v4021_v43, %v4017_v13 }
0x1db2   :  { %v5131_v17 = vpack.c.bf16 %v4031_v14, %v4030_v15  ;;  %v4024_v18 = vmul.f32 %v4021_v43, %v4016_v34 }
0x1db3   :  { %v4033_v44 = vadd.f32 %v4029_v7, %v4025_v25 }
0x1db4   :  { %5132 = vmatpush3.bf16.msra.mxu0 %v5131_v17  ;;  %v4032_v20 = vadd.f32 %v4029_v7, %v4024_v18 }
0x1db5   :  { %5133 = vmatprep.subr.bf16.mxu0 %v5907_v10 }
0x1db6   :  { %v5134_v22 = vpack.c.bf16 %v4033_v44, %v4032_v20 }
0x1db8   :  { %5135 = vmatpush3.bf16.msra.mxu0 %v5134_v22 }
0x1db9   :  { %5136 = vmatprep.subr.bf16.mxu0 %v5907_v10 }
0x1dbb   :  { %4937 = vmatmul.mubr.msk.f32.vlgmr.msra.gmra.mrb[48].mxu0 %vm2285_vm10, %v4034_v39 }
0x1dbc   :  { %5138 = vmatpush3.bf16.msra.mxu0 %v5137_v51  ;;  %4947 = vmatprep.mubr.msk.f32.mxu0 %vm5906_vm0, %v5905_v1 }
0x1dbd   :  { %5139 = vmatprep.subr.bf16.mxu0 %v5907_v10 }
0x1dc0   :  { %5141 = vmatpush3.bf16.msra.mxu0 %v5140_v33 }
0x1e8e   :  { %v4104_v35 = vpop.f32.mrb[48].mxu0 }
0x1e8f   :  { %v4938_v38 = vpop.f32.mrb[49].mxu0  ;;  %4948 = vmatmul.mubr.msk.f32.vlgmr.msra.gmra.mrb[50].mxu0 %vm2285_vm10, %v4104_v35 }
0x1f62   :  { %v4188_v24 = vpop.f32.mrb[50].mxu0 }
0x1f63   :  { %v4189_v21 = vadd.f32 %v4361_v55, %v4188_v24  ;;  %v4949_v28 = vpop.f32.mrb[51].mxu0 }
0x1f65   :  { %4193 = vst.msk [vmem:[%s6090_s17] sm:$0xf] %vm4192_vm4, %v4189_v21 }
0x1f66   :  { %4198 = vsyncpa [#allocation4], 1 }
0x1f67   :  { %4199 = vsyncpa [#allocation6], 1 }
0x1f68   :  { %4200 = vsyncpa [#allocation9], 1 }
0x1f69   :  { %4201 = vsyncpa [#allocation12], 1 }
0x1f6a   :  { %4202 = vsyncpa [#allocation15], 1 }
0x1f6b   :  { %4203 = vsyncpa [#allocation18], 1 }
0x1f6c   :  { %4204 = vsyncpa [#allocation21], 1 }
0x1f6d   :  { %4205 = vsyncpa [#allocation24], 1 }
0x1f6e   :  { %4206 = vsyncpa [#allocation27], 1 }

</bundles_post_ra>
